<compile_context>
chip_gen: v6e
topology: v6e:2x2x1
jax: 0.10.0
libtpu: 0.0.40
codegen_flags: <defaults>
</compile_context>

<pallas_src>
import jax
import jax.numpy as jnp
from jax.experimental import pallas as pl
from jax.experimental.pallas import tpu as pltpu


def _leaky_relu(x):
    # nn.LeakyReLU default negative_slope = 0.01; max(x, 0.01*x) is exact for slope < 1.
    return jnp.maximum(x, 0.01 * x)


def _gru_decoder_kernel(
    y_h1_ref,      # (B, Hp)       y @ hm1_wy + hm1_b   (loop invariant, precomputed)
    gi0_ref,       # (B, 3Gp)      step-0 input gates   (precomputed)
    emb_hm1_ref,   # (Vp, Hp)      emb @ hm1_we
    wcomb_ref,     # (Hp, 3Gp)     hm2_w @ w_ih  (gate-blocked [r|z|n], each Gp wide)
    bcomb_ref,     # (1, 3Gp)      hm2_b @ w_ih + b_ih
    wfused_ref,    # (Gp, 4Gp)     [ wp1_w | w_hh ]
    bfused_ref,    # (1, 4Gp)      [ wp1_b | b_hh ]
    wp2_ref,       # (Gp, Wp)
    bp2_ref,       # (1, Wp)       padding columns = -1e30
    predicts_ref,  # out block (B, Wp)  (slice t of (T, B, Wp))
    h_out_ref,     # out block (B, Gp)  (slice t of (T, B, Gp))
    gi_ref,        # scratch (B, 3Gp)  current step's input gates
    gh_ref,        # scratch (B, 3Gp)  current step's hidden gates
    prev_h_ref,    # scratch (B, Gp)   previous GRU hidden state
):
    t = pl.program_id(0)
    Gp = prev_h_ref.shape[-1]

    @pl.when(t == 0)
    def _init():
        gi_ref[...] = gi0_ref[...]
        # h_prev = 0  =>  gh = b_hh (the [Gp:] half of the fused bias), no matmul needed.
        gh_ref[...] = jnp.broadcast_to(bfused_ref[:, Gp:], gh_ref.shape)
        prev_h_ref[...] = jnp.zeros_like(prev_h_ref)

    gi = gi_ref[...]
    gh = gh_ref[...]
    h_prev = prev_h_ref[...]

    # ---- GRU cell (PyTorch gate order r, z, n); gate slices are 128-lane aligned ----
    r = jax.nn.sigmoid(gi[:, 0:Gp] + gh[:, 0:Gp])
    z = jax.nn.sigmoid(gi[:, Gp:2 * Gp] + gh[:, Gp:2 * Gp])
    n = jnp.tanh(gi[:, 2 * Gp:3 * Gp] + r * gh[:, 2 * Gp:3 * Gp])
    h_new = (1.0 - z) * n + z * h_prev
    h_out_ref[...] = h_new.astype(h_out_ref.dtype)

    # ---- one fused matmul: prediction-head-1 pre-activation AND next step's gh ----
    fused = (jnp.dot(h_new, wfused_ref[...], preferred_element_type=jnp.float32)
             + bfused_ref[...])
    p1 = _leaky_relu(fused[:, 0:Gp])
    logits = (jnp.dot(p1, wp2_ref[...], preferred_element_type=jnp.float32)
              + bp2_ref[...])
    predicts_ref[...] = logits.astype(predicts_ref.dtype)

    # ---- greedy token -> next step's input gates (skipped after the last step) ----
    @pl.when(t + 1 < pl.num_programs(0))
    def _next_input():
        B, Wp = logits.shape
        Vp = emb_hm1_ref.shape[0]
        m = jnp.max(logits, axis=-1, keepdims=True)
        col = jax.lax.broadcasted_iota(jnp.int32, (B, Wp), 1)
        # first index attaining the max == torch.argmax / jnp.argmax convention;
        # padding columns hold -1e30 so they never win.
        idx = jnp.min(jnp.where(logits == m, col, Wp), axis=-1, keepdims=True)  # (B, 1)
        rows = jax.lax.broadcasted_iota(jnp.int32, (B, Vp), 1)
        onehot = (rows == (idx + 1)).astype(jnp.float32)                         # (B, Vp)
        # embedding lookup + hiddenMap1 embedding-rows collapsed into one matmul
        h1 = _leaky_relu(
            y_h1_ref[...] + jnp.dot(onehot, emb_hm1_ref[...],
                                    preferred_element_type=jnp.float32))
        # hiddenMap2 folded into the GRU input weights
        gi_ref[...] = (jnp.dot(h1, wcomb_ref[...],
                               preferred_element_type=jnp.float32) + bcomb_ref[...])
        gh_ref[...] = fused[:, Gp:]     # next step's hidden gates, already computed
        prev_h_ref[...] = h_new


def _rup(n, m):
    return ((n + m - 1) // m) * m


def _pad_axis(a, axis, new, val=0.0):
    pad = [(0, 0)] * a.ndim
    pad[axis] = (0, new - a.shape[axis])
    return jnp.pad(a, pad, constant_values=val)


def _pad_gates(a, G, Gp):
    """(..., 3G) -> (..., 3Gp): zero-pad each of the [r|z|n] gate chunks to Gp lanes."""
    pad = [(0, 0)] * (a.ndim - 1) + [(0, Gp - G)]
    return jnp.concatenate([jnp.pad(a[..., i * G:(i + 1) * G], pad) for i in range(3)],
                           axis=-1)


def gru_decoder_t_forward(y, emb, hm1_w, hm1_b, hm2_w, hm2_b,
                          w_ih, b_ih, w_hh, b_hh,
                          wp1_w, wp1_b, wp2_w, wp2_b, *, max_seq):
    """Returns (gru_predicts, h_de): shapes (max_seq, B, num_word), (max_seq, B, num_glove)."""
    B, H = y.shape
    V, G = emb.shape
    W = wp2_w.shape[1]
    assert hm1_w.shape == (H + G, H)

    Hp, Gp, Wp, Vp = _rup(H, 128), _rup(G, 128), _rup(W, 128), _rup(V, 128)
    f32 = jnp.float32
    hdot = lambda a, b: jnp.dot(a, b, precision=jax.lax.Precision.HIGHEST)
    as2d = lambda b: b.reshape(1, -1)

    # ---------- one-time weight folding / step-0 hoisting (plain XLA, full precision) ----------
    hm1_wy = hm1_w[:H]                     # rows of hiddenMap1 that multiply y
    hm1_we = hm1_w[H:]                     # rows of hiddenMap1 that multiply the embedding

    w_comb = hdot(hm2_w, w_ih)             # (H, 3G)   hiddenMap2 folded into GRU input weights
    b_comb = hdot(hm2_b, w_ih) + b_ih      # (3G,)
    emb_hm1 = hdot(emb, hm1_we)            # (V, H)    embedding table pre-mapped through hm1
    y_h1 = hdot(y, hm1_wy) + hm1_b         # (B, H)    loop-invariant y contribution
    gi0 = hdot(_leaky_relu(y_h1), w_comb) + b_comb     # (B, 3G)  step-0 input gates (e = 0)

    # ---------- lane-alignment padding (zero weights in padded lanes -> exact) ----------
    y_h1_p = _pad_axis(y_h1, 1, Hp)                                   # (B, Hp)
    gi0_p = _pad_gates(gi0, G, Gp)                                    # (B, 3Gp)
    emb_hm1_p = _pad_axis(_pad_axis(emb_hm1, 1, Hp), 0, Vp)           # (Vp, Hp)
    wcomb_p = _pad_axis(_pad_gates(w_comb, G, Gp), 0, Hp)             # (Hp, 3Gp)
    bcomb_p = _pad_gates(as2d(b_comb), G, Gp)                         # (1, 3Gp)

    wp1_p = _pad_axis(_pad_axis(wp1_w, 1, Gp), 0, Gp)                 # (Gp, Gp)
    bp1_p = _pad_axis(as2d(wp1_b), 1, Gp)                             # (1, Gp)
    whh_p = _pad_axis(_pad_gates(w_hh, G, Gp), 0, Gp)                 # (Gp, 3Gp)
    bhh_p = _pad_gates(as2d(b_hh), G, Gp)                             # (1, 3Gp)
    wfused = jnp.concatenate([wp1_p, whh_p], axis=1)                  # (Gp, 4Gp)
    bfused = jnp.concatenate([bp1_p, bhh_p], axis=1)                  # (1, 4Gp)

    wp2_p = _pad_axis(_pad_axis(wp2_w, 1, Wp), 0, Gp)                 # (Gp, Wp)
    bp2_p = _pad_axis(as2d(wp2_b), 1, Wp, val=-1e30)                  # (1, Wp) pad = -inf-ish

    const2 = lambda t: (0, 0)      # weights: same block every step -> VMEM-resident
    in_specs = [
        pl.BlockSpec((B, Hp), const2),          # y_h1
        pl.BlockSpec((B, 3 * Gp), const2),      # gi0
        pl.BlockSpec((Vp, Hp), const2),         # emb_hm1
        pl.BlockSpec((Hp, 3 * Gp), const2),     # w_comb
        pl.BlockSpec((1, 3 * Gp), const2),      # b_comb
        pl.BlockSpec((Gp, 4 * Gp), const2),     # wfused = [wp1_w | w_hh]
        pl.BlockSpec((1, 4 * Gp), const2),      # bfused = [wp1_b | b_hh]
        pl.BlockSpec((Gp, Wp), const2),         # wp2_w
        pl.BlockSpec((1, Wp), const2),          # wp2_b
    ]
    out_specs = [
        pl.BlockSpec((None, B, Wp), lambda t: (t, 0, 0)),   # gru_predicts[t]
        pl.BlockSpec((None, B, Gp), lambda t: (t, 0, 0)),   # h_de[t]
    ]
    out_shape = (
        jax.ShapeDtypeStruct((max_seq, B, Wp), f32),
        jax.ShapeDtypeStruct((max_seq, B, Gp), f32),
    )
    scratch_shapes = [
        pltpu.VMEM((B, 3 * Gp), f32),    # gi  (current step's input gates)
        pltpu.VMEM((B, 3 * Gp), f32),    # gh  (current step's hidden gates)
        pltpu.VMEM((B, Gp), f32),        # previous hidden state
    ]
    preds_p, h_p = pl.pallas_call(
        _gru_decoder_kernel,
        out_shape=out_shape,
        grid=(max_seq,),
        in_specs=in_specs,
        out_specs=out_specs,
        scratch_shapes=scratch_shapes,
        compiler_params=pltpu.CompilerParams(
            dimension_semantics=("arbitrary",),   # recurrent carry across steps
        ),
    )(y_h1_p, gi0_p, emb_hm1_p, wcomb_p, bcomb_p, wfused, bfused, wp2_p, bp2_p)

    return preds_p[:, :, :W], h_p[:, :, :G]


def gru_decoder_t_reference(y, emb, hm1_w, hm1_b, hm2_w, hm2_b,
                            w_ih, b_ih, w_hh, b_hh,
                            wp1_w, wp1_b, wp2_w, wp2_b, *, max_seq):
    """Pure-JAX reference of the ORIGINAL (unfolded) module math, full precision."""
    B, H = y.shape
    V, G = emb.shape
    dot = lambda a, b: jnp.dot(a, b, precision=jax.lax.Precision.HIGHEST)
    leaky = lambda x: jnp.maximum(x, 0.01 * x)

    pad = jnp.zeros((B, G), jnp.float32)
    cur = dot(leaky(dot(jnp.concatenate([y, pad], 1), hm1_w) + hm1_b), hm2_w) + hm2_b
    h = jnp.zeros((B, G), jnp.float32)
    preds, hs = [], []
    for _ in range(max_seq):
        gi = dot(cur, w_ih) + b_ih
        gh = dot(h, w_hh) + b_hh
        r = jax.nn.sigmoid(gi[:, :G] + gh[:, :G])
        z = jax.nn.sigmoid(gi[:, G:2 * G] + gh[:, G:2 * G])
        n = jnp.tanh(gi[:, 2 * G:] + r * gh[:, 2 * G:])
        h = (1.0 - z) * n + z * h
        hs.append(h)
        logits = dot(leaky(dot(h, wp1_w) + wp1_b), wp2_w) + wp2_b
        preds.append(logits)
        idx = jnp.argmax(logits, axis=1)
        e = emb[idx + 1]
        cur = dot(leaky(dot(jnp.concatenate([y, e], 1), hm1_w) + hm1_b), hm2_w) + hm2_b
    return jnp.stack(preds, 0), jnp.stack(hs, 0)


if __name__ == "__main__":
    B = 8
    num_hidden = 96      # deliberately not 128-aligned: exercises the Hp padding path
    num_glove = 300      # module default; padded to Gp = 384 gate lanes in the wrapper
    num_word = 200       # padded to Wp = 256 logit lanes (-1e30 bias on padding columns)
    max_seq = 5

    key = jax.random.PRNGKey(0)
    (k_y, k_emb, k_hm1w, k_hm1b, k_hm2w, k_hm2b, k_wih, k_bih, k_whh, k_bhh,
     k_wp1w, k_wp1b, k_wp2w, k_wp2b) = jax.random.split(key, 14)

    s = 0.1    # Linear weight scale (module uses N(0, 0.01); larger keeps argmax separated)
    s2 = 0.5   # word-prediction head scale: keeps greedy argmax gaps well above rounding
    y = jax.random.normal(k_y, (B, num_hidden), jnp.float32)
    glove = jax.random.normal(k_emb, (num_word, num_glove), jnp.float32)
    emb = jnp.concatenate([jnp.zeros((1, num_glove), jnp.float32), glove], 0)  # row 0 = pad

    hm1_w = s * jax.random.normal(k_hm1w, (num_hidden + num_glove, num_hidden), jnp.float32)
    hm1_b = s * jax.random.normal(k_hm1b, (num_hidden,), jnp.float32)
    hm2_w = s * jax.random.normal(k_hm2w, (num_hidden, num_hidden), jnp.float32)
    hm2_b = s * jax.random.normal(k_hm2b, (num_hidden,), jnp.float32)
    bound = 1.0 / (num_glove ** 0.5)
    w_ih = jax.random.uniform(k_wih, (num_hidden, 3 * num_glove), jnp.float32, -bound, bound)
    b_ih = jax.random.uniform(k_bih, (3 * num_glove,), jnp.float32, -bound, bound)
    w_hh = jax.random.uniform(k_whh, (num_glove, 3 * num_glove), jnp.float32, -bound, bound)
    b_hh = jax.random.uniform(k_bhh, (3 * num_glove,), jnp.float32, -bound, bound)
    wp1_w = s * jax.random.normal(k_wp1w, (num_glove, num_glove), jnp.float32)
    wp1_b = s * jax.random.normal(k_wp1b, (num_glove,), jnp.float32)
    wp2_w = s2 * jax.random.normal(k_wp2w, (num_glove, num_word), jnp.float32)
    wp2_b = s2 * jax.random.normal(k_wp2b, (num_word,), jnp.float32)

    args = (y, emb, hm1_w, hm1_b, hm2_w, hm2_b, w_ih, b_ih, w_hh, b_hh,
            wp1_w, wp1_b, wp2_w, wp2_b)

    preds, h_de = gru_decoder_t_forward(*args, max_seq=max_seq)
    preds, h_de = jax.block_until_ready((preds, h_de))

    preds_ref, h_ref = gru_decoder_t_reference(*args, max_seq=max_seq)

    assert preds.shape == (max_seq, B, num_word)
    assert h_de.shape == (max_seq, B, num_glove)
    assert jnp.allclose(preds, preds_ref, atol=2e-3, rtol=2e-3)
    assert jnp.allclose(h_de, h_ref, atol=2e-3, rtol=2e-3)

    print("KERNEL_OK")
</pallas_src>

<mosaic_0001>
module attributes {stable_mosaic.version = 11 : i64} {
  func.func @_gru_decoder_kernel(%arg0: i32, %arg1: memref<8x128xf32, #tpu.memory_space<vmem>>, %arg2: memref<8x1152xf32, #tpu.memory_space<vmem>>, %arg3: memref<256x128xf32, #tpu.memory_space<vmem>>, %arg4: memref<128x1152xf32, #tpu.memory_space<vmem>>, %arg5: memref<1x1152xf32, #tpu.memory_space<vmem>>, %arg6: memref<384x1536xf32, #tpu.memory_space<vmem>>, %arg7: memref<1x1536xf32, #tpu.memory_space<vmem>>, %arg8: memref<384x256xf32, #tpu.memory_space<vmem>>, %arg9: memref<1x256xf32, #tpu.memory_space<vmem>>, %arg10: memref<1x8x256xf32, #tpu.memory_space<vmem>>, %arg11: memref<1x8x384xf32, #tpu.memory_space<vmem>>, %arg12: memref<8x1152xf32, #tpu.memory_space<vmem>>, %arg13: memref<8x1152xf32, #tpu.memory_space<vmem>>, %arg14: memref<8x384xf32, #tpu.memory_space<vmem>>) attributes {dimension_semantics = [#tpu.dimension_semantics<arbitrary>], iteration_bounds = array<i64: 5>, scalar_prefetch = 0 : i64, scratch_operands = 3 : i64, tpu.core_type = #tpu.core_type<tc>, window_params = [{pipeline_mode = #tpu.pipeline_mode<synchronous>, transform_indices = @transform_0, window_bounds = array<i64: 8, 128>}, {pipeline_mode = #tpu.pipeline_mode<synchronous>, transform_indices = @transform_1, window_bounds = array<i64: 8, 1152>}, {pipeline_mode = #tpu.pipeline_mode<synchronous>, transform_indices = @transform_2, window_bounds = array<i64: 256, 128>}, {pipeline_mode = #tpu.pipeline_mode<synchronous>, transform_indices = @transform_3, window_bounds = array<i64: 128, 1152>}, {pipeline_mode = #tpu.pipeline_mode<synchronous>, transform_indices = @transform_4, window_bounds = array<i64: 1, 1152>}, {pipeline_mode = #tpu.pipeline_mode<synchronous>, transform_indices = @transform_5, window_bounds = array<i64: 384, 1536>}, {pipeline_mode = #tpu.pipeline_mode<synchronous>, transform_indices = @transform_6, window_bounds = array<i64: 1, 1536>}, {pipeline_mode = #tpu.pipeline_mode<synchronous>, transform_indices = @transform_7, window_bounds = array<i64: 384, 256>}, {pipeline_mode = #tpu.pipeline_mode<synchronous>, transform_indices = @transform_8, window_bounds = array<i64: 1, 256>}, {transform_indices = @transform_9, window_bounds = array<i64: 1, 8, 256>}, {transform_indices = @transform_10, window_bounds = array<i64: 1, 8, 384>}]} {
    %c0_i32 = arith.constant 0 : i32
    %0 = arith.cmpi eq, %arg0, %c0_i32 : i32
    %1 = arith.extui %0 : i1 to i32
    %c0_i32_0 = arith.constant 0 : i32
    %2 = arith.cmpi ne, %1, %c0_i32_0 : i32
    scf.if %2 {
      %c0_26 = arith.constant 0 : index
      %c0_27 = arith.constant 0 : index
      %56 = vector.load %arg2[%c0_26, %c0_27] : memref<8x1152xf32, #tpu.memory_space<vmem>>, vector<8x1152xf32>
      %c0_28 = arith.constant 0 : index
      %c0_29 = arith.constant 0 : index
      %57 = vector.load %arg12[%c0_28, %c0_29] : memref<8x1152xf32, #tpu.memory_space<vmem>>, vector<8x1152xf32>
      tpu.vector_store %arg12[%c0_28, %c0_29], %56 {strides = array<i32>} : memref<8x1152xf32, #tpu.memory_space<vmem>>, vector<8x1152xf32>,
      %c0_30 = arith.constant 0 : index
      %c384 = arith.constant 384 : index
      %58 = vector.load %arg7[%c0_30, %c384] : memref<1x1536xf32, #tpu.memory_space<vmem>>, vector<1x1152xf32>
      %59 = vector.shape_cast %58 : vector<1x1152xf32> to vector<1x1152xf32>
      %60 = vector.broadcast %59 : vector<1x1152xf32> to vector<8x1152xf32>
      %c0_31 = arith.constant 0 : index
      %c0_32 = arith.constant 0 : index
      %61 = vector.load %arg13[%c0_31, %c0_32] : memref<8x1152xf32, #tpu.memory_space<vmem>>, vector<8x1152xf32>
      tpu.vector_store %arg13[%c0_31, %c0_32], %60 {strides = array<i32>} : memref<8x1152xf32, #tpu.memory_space<vmem>>, vector<8x1152xf32>,
      %cst_33 = arith.constant 0.000000e+00 : f32
      %62 = vector.broadcast %cst_33 : f32 to vector<8x384xf32>
      %c0_34 = arith.constant 0 : index
      %c0_35 = arith.constant 0 : index
      %63 = vector.load %arg14[%c0_34, %c0_35] : memref<8x384xf32, #tpu.memory_space<vmem>>, vector<8x384xf32>
      tpu.vector_store %arg14[%c0_34, %c0_35], %62 {strides = array<i32>} : memref<8x384xf32, #tpu.memory_space<vmem>>, vector<8x384xf32>,
    } else {
    }
    %c0 = arith.constant 0 : index
    %c0_1 = arith.constant 0 : index
    %3 = vector.load %arg12[%c0, %c0_1] : memref<8x1152xf32, #tpu.memory_space<vmem>>, vector<8x1152xf32>
    %c0_2 = arith.constant 0 : index
    %c0_3 = arith.constant 0 : index
    %4 = vector.load %arg13[%c0_2, %c0_3] : memref<8x1152xf32, #tpu.memory_space<vmem>>, vector<8x1152xf32>
    %c0_4 = arith.constant 0 : index
    %c0_5 = arith.constant 0 : index
    %5 = vector.load %arg14[%c0_4, %c0_5] : memref<8x384xf32, #tpu.memory_space<vmem>>, vector<8x384xf32>
    %6 = vector.extract_strided_slice %3 {offsets = [0, 0], sizes = [8, 384], strides = [1, 1]} : vector<8x1152xf32> to vector<8x384xf32>
    %7 = vector.extract_strided_slice %4 {offsets = [0, 0], sizes = [8, 384], strides = [1, 1]} : vector<8x1152xf32> to vector<8x384xf32>
    %8 = arith.addf %6, %7 : vector<8x384xf32>
    %9 = arith.negf %8 : vector<8x384xf32>
    %10 = math.exp %9 : vector<8x384xf32>
    %cst = arith.constant 1.000000e+00 : f32
    %11 = vector.broadcast %cst : f32 to vector<8x384xf32>
    %12 = arith.addf %11, %10 : vector<8x384xf32>
    %13 = arith.divf %11, %12 : vector<8x384xf32>
    %14 = vector.extract_strided_slice %3 {offsets = [0, 384], sizes = [8, 384], strides = [1, 1]} : vector<8x1152xf32> to vector<8x384xf32>
    %15 = vector.extract_strided_slice %4 {offsets = [0, 384], sizes = [8, 384], strides = [1, 1]} : vector<8x1152xf32> to vector<8x384xf32>
    %16 = arith.addf %14, %15 : vector<8x384xf32>
    %17 = arith.negf %16 : vector<8x384xf32>
    %18 = math.exp %17 : vector<8x384xf32>
    %cst_6 = arith.constant 1.000000e+00 : f32
    %19 = vector.broadcast %cst_6 : f32 to vector<8x384xf32>
    %20 = arith.addf %19, %18 : vector<8x384xf32>
    %21 = arith.divf %19, %20 : vector<8x384xf32>
    %22 = vector.extract_strided_slice %3 {offsets = [0, 768], sizes = [8, 384], strides = [1, 1]} : vector<8x1152xf32> to vector<8x384xf32>
    %23 = vector.extract_strided_slice %4 {offsets = [0, 768], sizes = [8, 384], strides = [1, 1]} : vector<8x1152xf32> to vector<8x384xf32>
    %24 = arith.mulf %13, %23 : vector<8x384xf32>
    %25 = arith.addf %22, %24 : vector<8x384xf32>
    %26 = math.tanh %25 : vector<8x384xf32>
    %cst_7 = arith.constant 1.000000e+00 : f32
    %27 = vector.broadcast %cst_7 : f32 to vector<8x384xf32>
    %28 = arith.subf %27, %21 : vector<8x384xf32>
    %29 = arith.mulf %28, %26 : vector<8x384xf32>
    %30 = arith.mulf %21, %5 : vector<8x384xf32>
    %31 = arith.addf %29, %30 : vector<8x384xf32>
    %c0_8 = arith.constant 0 : index
    %c0_9 = arith.constant 0 : index
    %c0_10 = arith.constant 0 : index
    %32 = vector.load %arg11[%c0_8, %c0_9, %c0_10] : memref<1x8x384xf32, #tpu.memory_space<vmem>>, vector<1x8x384xf32>
    %33 = vector.shape_cast %32 : vector<1x8x384xf32> to vector<8x384xf32>
    %34 = vector.shape_cast %31 : vector<8x384xf32> to vector<1x8x384xf32>
    tpu.vector_store %arg11[%c0_8, %c0_9, %c0_10], %34 {strides = array<i32>} : memref<1x8x384xf32, #tpu.memory_space<vmem>>, vector<1x8x384xf32>,
    %c0_11 = arith.constant 0 : index
    %c0_12 = arith.constant 0 : index
    %35 = vector.load %arg6[%c0_11, %c0_12] : memref<384x1536xf32, #tpu.memory_space<vmem>>, vector<384x1536xf32>
    %cst_13 = arith.constant dense<0.000000e+00> : vector<8x1536xf32>
    %36 = tpu.matmul %31, %35, %cst_13 {dimension_numbers = #tpu.dot_dimension_numbers<[1], [0], [0], [1], [0, 0, 1, 1], [], []>} : vector<8x384xf32>, vector<384x1536xf32>, vector<8x1536xf32> -> vector<8x1536xf32>
    %c0_14 = arith.constant 0 : index
    %c0_15 = arith.constant 0 : index
    %37 = vector.load %arg7[%c0_14, %c0_15] : memref<1x1536xf32, #tpu.memory_space<vmem>>, vector<1x1536xf32>
    %38 = vector.broadcast %37 : vector<1x1536xf32> to vector<8x1536xf32>
    %39 = arith.addf %36, %38 : vector<8x1536xf32>
    %40 = vector.extract_strided_slice %39 {offsets = [0, 0], sizes = [8, 384], strides = [1, 1]} : vector<8x1536xf32> to vector<8x384xf32>
    %cst_16 = arith.constant 0.00999999977 : f32
    %41 = vector.broadcast %cst_16 : f32 to vector<8x384xf32>
    %42 = arith.mulf %41, %40 : vector<8x384xf32>
    %43 = arith.maximumf %40, %42 : vector<8x384xf32>
    %c0_17 = arith.constant 0 : index
    %c0_18 = arith.constant 0 : index
    %44 = vector.load %arg8[%c0_17, %c0_18] : memref<384x256xf32, #tpu.memory_space<vmem>>, vector<384x256xf32>
    %cst_19 = arith.constant dense<0.000000e+00> : vector<8x256xf32>
    %45 = tpu.matmul %43, %44, %cst_19 {dimension_numbers = #tpu.dot_dimension_numbers<[1], [0], [0], [1], [0, 0, 1, 1], [], []>} : vector<8x384xf32>, vector<384x256xf32>, vector<8x256xf32> -> vector<8x256xf32>
    %c0_20 = arith.constant 0 : index
    %c0_21 = arith.constant 0 : index
    %46 = vector.load %arg9[%c0_20, %c0_21] : memref<1x256xf32, #tpu.memory_space<vmem>>, vector<1x256xf32>
    %47 = vector.broadcast %46 : vector<1x256xf32> to vector<8x256xf32>
    %48 = arith.addf %45, %47 : vector<8x256xf32>
    %c0_22 = arith.constant 0 : index
    %c0_23 = arith.constant 0 : index
    %c0_24 = arith.constant 0 : index
    %49 = vector.load %arg10[%c0_22, %c0_23, %c0_24] : memref<1x8x256xf32, #tpu.memory_space<vmem>>, vector<1x8x256xf32>
    %50 = vector.shape_cast %49 : vector<1x8x256xf32> to vector<8x256xf32>
    %51 = vector.shape_cast %48 : vector<8x256xf32> to vector<1x8x256xf32>
    tpu.vector_store %arg10[%c0_22, %c0_23, %c0_24], %51 {strides = array<i32>} : memref<1x8x256xf32, #tpu.memory_space<vmem>>, vector<1x8x256xf32>,
    %c1_i32 = arith.constant 1 : i32
    %52 = arith.addi %arg0, %c1_i32 : i32
    %c5_i32 = arith.constant 5 : i32
    %53 = arith.cmpi slt, %52, %c5_i32 : i32
    %54 = arith.extui %53 : i1 to i32
    %c0_i32_25 = arith.constant 0 : i32
    %55 = arith.cmpi ne, %54, %c0_i32_25 : i32
    scf.if %55 {
      %cst_26 = arith.constant dense<0xFF800000> : vector<8xf32>
      %56 = vector.multi_reduction <maximumf>, %48, %cst_26 [1] : vector<8x256xf32> to vector<8xf32>
      %57 = vector.shape_cast %56 : vector<8xf32> to vector<8x1xf32>
      %58 = tpu.iota {dimensions = array<i32: 1>} : vector<8x256xi32>
      %59 = vector.broadcast %57 : vector<8x1xf32> to vector<8x256xf32>
      %60 = arith.cmpf oeq, %48, %59 : vector<8x256xf32>
      %c256_i32 = arith.constant 256 : i32
      %61 = vector.broadcast %c256_i32 : i32 to vector<8x256xi32>
      %62 = arith.select %60, %58, %61 : vector<8x256xi1>, vector<8x256xi32>
      %cst_27 = arith.constant dense<2147483647> : vector<8xi32>
      %63 = vector.multi_reduction <minsi>, %62, %cst_27 [1] : vector<8x256xi32> to vector<8xi32>
      %64 = vector.shape_cast %63 : vector<8xi32> to vector<8x1xi32>
      %65 = tpu.iota {dimensions = array<i32: 1>} : vector<8x256xi32>
      %c1_i32_28 = arith.constant 1 : i32
      %66 = vector.broadcast %c1_i32_28 : i32 to vector<8x1xi32>
      %67 = arith.addi %64, %66 : vector<8x1xi32>
      %68 = vector.broadcast %67 : vector<8x1xi32> to vector<8x256xi32>
      %69 = arith.cmpi eq, %65, %68 : vector<8x256xi32>
      %70 = arith.extui %69 : vector<8x256xi1> to vector<8x256xi32>
      %71 = arith.sitofp %70 : vector<8x256xi32> to vector<8x256xf32>
      %c0_29 = arith.constant 0 : index
      %c0_30 = arith.constant 0 : index
      %72 = vector.load %arg1[%c0_29, %c0_30] : memref<8x128xf32, #tpu.memory_space<vmem>>, vector<8x128xf32>
      %c0_31 = arith.constant 0 : index
      %c0_32 = arith.constant 0 : index
      %73 = vector.load %arg3[%c0_31, %c0_32] : memref<256x128xf32, #tpu.memory_space<vmem>>, vector<256x128xf32>
      %cst_33 = arith.constant dense<0.000000e+00> : vector<8x128xf32>
      %74 = tpu.matmul %71, %73, %cst_33 {dimension_numbers = #tpu.dot_dimension_numbers<[1], [0], [0], [1], [0, 0, 1, 1], [], []>} : vector<8x256xf32>, vector<256x128xf32>, vector<8x128xf32> -> vector<8x128xf32>
      %75 = arith.addf %72, %74 : vector<8x128xf32>
      %cst_34 = arith.constant 0.00999999977 : f32
      %76 = vector.broadcast %cst_34 : f32 to vector<8x128xf32>
      %77 = arith.mulf %76, %75 : vector<8x128xf32>
      %78 = arith.maximumf %75, %77 : vector<8x128xf32>
      %c0_35 = arith.constant 0 : index
      %c0_36 = arith.constant 0 : index
      %79 = vector.load %arg4[%c0_35, %c0_36] : memref<128x1152xf32, #tpu.memory_space<vmem>>, vector<128x1152xf32>
      %cst_37 = arith.constant dense<0.000000e+00> : vector<8x1152xf32>
      %80 = tpu.matmul %78, %79, %cst_37 {dimension_numbers = #tpu.dot_dimension_numbers<[1], [0], [0], [1], [0, 0, 1, 1], [], []>} : vector<8x128xf32>, vector<128x1152xf32>, vector<8x1152xf32> -> vector<8x1152xf32>
      %c0_38 = arith.constant 0 : index
      %c0_39 = arith.constant 0 : index
      %81 = vector.load %arg5[%c0_38, %c0_39] : memref<1x1152xf32, #tpu.memory_space<vmem>>, vector<1x1152xf32>
      %82 = vector.broadcast %81 : vector<1x1152xf32> to vector<8x1152xf32>
      %83 = arith.addf %80, %82 : vector<8x1152xf32>
      %c0_40 = arith.constant 0 : index
      %c0_41 = arith.constant 0 : index
      %84 = vector.load %arg12[%c0_40, %c0_41] : memref<8x1152xf32, #tpu.memory_space<vmem>>, vector<8x1152xf32>
      tpu.vector_store %arg12[%c0_40, %c0_41], %83 {strides = array<i32>} : memref<8x1152xf32, #tpu.memory_space<vmem>>, vector<8x1152xf32>,
      %85 = vector.extract_strided_slice %39 {offsets = [0, 384], sizes = [8, 1152], strides = [1, 1]} : vector<8x1536xf32> to vector<8x1152xf32>
      %c0_42 = arith.constant 0 : index
      %c0_43 = arith.constant 0 : index
      %86 = vector.load %arg13[%c0_42, %c0_43] : memref<8x1152xf32, #tpu.memory_space<vmem>>, vector<8x1152xf32>
      tpu.vector_store %arg13[%c0_42, %c0_43], %85 {strides = array<i32>} : memref<8x1152xf32, #tpu.memory_space<vmem>>, vector<8x1152xf32>,
      %c0_44 = arith.constant 0 : index
      %c0_45 = arith.constant 0 : index
      %87 = vector.load %arg14[%c0_44, %c0_45] : memref<8x384xf32, #tpu.memory_space<vmem>>, vector<8x384xf32>
      tpu.vector_store %arg14[%c0_44, %c0_45], %31 {strides = array<i32>} : memref<8x384xf32, #tpu.memory_space<vmem>>, vector<8x384xf32>,
    } else {
    }
    return
  }
  func.func @transform_0(%arg0: i32) -> (i32, i32) {
    %c0_i32 = arith.constant 0 : i32
    %c0_i32_0 = arith.constant 0 : i32
    %c0_i32_1 = arith.constant 0 : i32
    return %c0_i32, %c0_i32_0 : i32, i32
  }
  func.func @transform_1(%arg0: i32) -> (i32, i32) {
    %c0_i32 = arith.constant 0 : i32
    %c0_i32_0 = arith.constant 0 : i32
    %c0_i32_1 = arith.constant 0 : i32
    return %c0_i32, %c0_i32_0 : i32, i32
  }
  func.func @transform_2(%arg0: i32) -> (i32, i32) {
    %c0_i32 = arith.constant 0 : i32
    %c0_i32_0 = arith.constant 0 : i32
    %c0_i32_1 = arith.constant 0 : i32
    return %c0_i32, %c0_i32_0 : i32, i32
  }
  func.func @transform_3(%arg0: i32) -> (i32, i32) {
    %c0_i32 = arith.constant 0 : i32
    %c0_i32_0 = arith.constant 0 : i32
    %c0_i32_1 = arith.constant 0 : i32
    return %c0_i32, %c0_i32_0 : i32, i32
  }
  func.func @transform_4(%arg0: i32) -> (i32, i32) {
    %c0_i32 = arith.constant 0 : i32
    %c0_i32_0 = arith.constant 0 : i32
    %c0_i32_1 = arith.constant 0 : i32
    return %c0_i32, %c0_i32_0 : i32, i32
  }
  func.func @transform_5(%arg0: i32) -> (i32, i32) {
    %c0_i32 = arith.constant 0 : i32
    %c0_i32_0 = arith.constant 0 : i32
    %c0_i32_1 = arith.constant 0 : i32
    return %c0_i32, %c0_i32_0 : i32, i32
  }
  func.func @transform_6(%arg0: i32) -> (i32, i32) {
    %c0_i32 = arith.constant 0 : i32
    %c0_i32_0 = arith.constant 0 : i32
    %c0_i32_1 = arith.constant 0 : i32
    return %c0_i32, %c0_i32_0 : i32, i32
  }
  func.func @transform_7(%arg0: i32) -> (i32, i32) {
    %c0_i32 = arith.constant 0 : i32
    %c0_i32_0 = arith.constant 0 : i32
    %c0_i32_1 = arith.constant 0 : i32
    return %c0_i32, %c0_i32_0 : i32, i32
  }
  func.func @transform_8(%arg0: i32) -> (i32, i32) {
    %c0_i32 = arith.constant 0 : i32
    %c0_i32_0 = arith.constant 0 : i32
    %c0_i32_1 = arith.constant 0 : i32
    return %c0_i32, %c0_i32_0 : i32, i32
  }
  func.func @transform_9(%arg0: i32) -> (i32, i32, i32) {
    %c0_i32 = arith.constant 0 : i32
    %c0_i32_0 = arith.constant 0 : i32
    %c0_i32_1 = arith.constant 0 : i32
    return %arg0, %c0_i32, %c0_i32_0 : i32, i32, i32
  }
  func.func @transform_10(%arg0: i32) -> (i32, i32, i32) {
    %c0_i32 = arith.constant 0 : i32
    %c0_i32_0 = arith.constant 0 : i32
    %c0_i32_1 = arith.constant 0 : i32
    return %arg0, %c0_i32, %c0_i32_0 : i32, i32, i32
  }
}

</mosaic_0001>

<bundles_post_ra>
// kernel: tpu_custom_call.1
= control target key start
LH: loop header
LB: loop body
LE: loop exit
PB: predicated region body
PF: predicated region fallthrough
CT: control target
= control target key end

     0   :  { %s4426_s0 = inlined_call_operand.hbm [shape: f32[8,128], index: 0, kind: input, shape index: {}]   ;;  %s4427_s1 = inlined_call_operand.hbm [shape: f32[8,1152], index: 1, kind: input, shape index: {}]   ;;  %s4428_s2 = inlined_call_operand.hbm [shape: f32[256,128], index: 2, kind: input, shape index: {}]   ;;  %s4429_s3 = inlined_call_operand.hbm [shape: f32[128,1152], index: 3, kind: input, shape index: {}]   ;;  %s4430_s4 = inlined_call_operand.hbm [shape: f32[1,1152], index: 4, kind: input, shape index: {}]   ;;  %s4431_s5 = inlined_call_operand.hbm [shape: f32[384,1536], index: 5, kind: input, shape index: {}]   ;;  %s4432_s6 = inlined_call_operand.hbm [shape: f32[1,1536], index: 6, kind: input, shape index: {}]   ;;  %s4433_s7 = inlined_call_operand.hbm [shape: f32[384,256], index: 7, kind: input, shape index: {}]   ;;  %s4434_s8 = inlined_call_operand.hbm [shape: f32[1,256], index: 8, kind: input, shape index: {}]   ;;  %s4435_s9 = inlined_call_operand.hbm [shape: f32[5,8,256], index: 9, kind: output, shape index: {0}]   ;;  %s4436_s10 = inlined_call_operand.hbm [shape: f32[5,8,384], index: 10, kind: output, shape index: {1}]  }
   0x1   :  { %4441 = sst [smem:[#allocation32_spill]] %s4426_s0 }
   0x2   :  { %4442 = sst [smem:[#allocation33_spill]] %s4427_s1 }
   0x3   :  { %16 = vsyncpa [#allocation6], 0 }
   0x4   :  { %17 = vsyncpa [#allocation9], 0 }
   0x5   :  { %18 = vsyncpa [#allocation12], 0 }
   0x6   :  { %19 = vsyncpa [#allocation15], 0 }
   0x7   :  { %20 = vsyncpa [#allocation18], 0 }
   0x8   :  { %21 = vsyncpa [#allocation7], 0 }
   0x9   :  { %23 = vsyncpa [#allocation7 + $0x1], 0 }
   0xa   :  { %24 = vsyncpa [#allocation22], 0 }
   0xb   :  { %26 = vsyncpa [#allocation22 + $0x1], 0  ;;  %s4041_s13 = smov 0   ;;  %s4043_s14 = smov 0  }
   0xc   :  { %s4045_s15 = smov 0   ;;  %s4047_s16 = smov 0  }
   0xd LB: > { %4443 = sst [smem:[#allocation30_spill]] %s3956_s15  ;;  %s4062_s17 = sadd.s32 4294967295, %s3960_s16   ;;  %s3960_s16 = sphi %s4047_s16, %s4470_s16   ;;  %s3956_s15 = sphi %s4045_s15, %s4467_s15   ;;  %s3952_s14 = sphi %s4043_s14, %s4469_s14   ;;  %s3948_s13 = sphi %s4041_s13, %s4468_s13  }
   0xe   : > { %s3303_s18 = sadd.s32 4294967294, %s3960_s16   ;;  %s4066_s19 = sadd.s32 1, %s3960_s16  }
   0xf   : > { %s228_s20 = sadd.s32 1, %s3956_s15  ;;  %s225_s21 = ssub.s32 %s3960_s16, %s4066_s19 }
  0x10   : > { %p238_p0 = scmp.ne.s32.totalorder %s3956_s15, %s3952_s14  ;;  %p226_p1 = scmp.eq.s32.totalorder %s225_s21, 0 }
  0x11   : > { %p239_p2 = scmp.eq.s32.totalorder %s4062_s17, 4  ;;  %p244_p3 = scmp.ne.s32.totalorder %s3952_s14, %s3948_s13 }
  0x12   : > { %p245_p4 = scmp.eq.s32.totalorder %s3303_s18, 4  ;;  %p3304_p7 = scmp.ge.s32.totalorder %s3960_s16, 1 }
  0x13   : > { %s4077_s22 = scalar_select %p226_p1, %s3956_s15, %s228_s20  }
  0x14   : > { %p4079_p5 = por %p239_p2, %p238_p0  ;;  %p4083_p6 = por %p245_p4, %p244_p3 }
  0x15   : > { %4444 = sst [smem:[#allocation31_spill]] %s4077_s22  ;;  %p278_p8 = scmp.lt.s32.totalorder %s3960_s16, 6 }
  0x16   : > { %s4445_s23 = scalar_select %p4079_p5, 1, 0 }
  0x17   : > { %s4446_s24 = scalar_select %p4083_p6, 1, 0 }
  0x18   : > { %p4437_p10 = scmp.eq.s32.totalorder %s4062_s17, 0  ;;  %p4091_p11 = pnand %p3304_p7, %p278_p8 }
  0x19   : > { %s3962_s26 = smov [#allocation8]   ;;  %s3963_s28 = smov [#allocation11]  }
  0x1a   : > { %s4447_s25 = scalar_select %p4091_p11, 1, 0 }
  0x1b   : > { %s302_s27 = sshll.u32 %s3962_s26, 4  ;;  %p3475_p12 = pneg %p4091_p11  ;;  %s303_s27 = int_to_ptr.vmem [resolvable:$true] %s302_s27 }
  0x1c   : > { %s325_s29 = sshll.u32 %s3963_s28, 4  ;;  %s3964_s11 = smov [#allocation14]   ;;  %s326_s29 = int_to_ptr.vmem [resolvable:$true] %s325_s29 }
  0x1d   : > { %p4099_p13 = pnand %p4437_p10, %p3475_p12  ;;  %s349_s12 = sshll.u32 %s3964_s11, 4  ;;  %s350_s12 = int_to_ptr.vmem [resolvable:$true] %s349_s12 }
  0x1e   : > { %s3627_s20 = scalar_lea.vmem %s303_s27, 1152  ;;  %p3635_p4 = scmp.lt.s32.totalorder %s303_s27, %s303_s27 }
  0x1f   : > { %p4105_p0 = pneg %p4099_p13  ;;  %p3628_p1 = scmp.ne.s32.totalorder %s303_s27, %s3627_s20 }
  0x20   : > { %p3636_p7 = scmp.lt.s32.totalorder %s3627_s20, %s3627_s20 }
  0x21   : > { %p3630_p2 = pnand %p3628_p1, %p4105_p0 }
  0x22   : > { %p3637_p8 = por %p3636_p7, %p3635_p4 }
  0x23   : > { %p3631_p3 = pneg %p3630_p2 }
  0x25   : > { %p3638_p12 = pnand %p3637_p8, %p3631_p3 }
  0x27   : > { %3641 = shalt.err (!%p3638_p12)
}
  0x28   : > { %s4450_s1 = sld [smem:[#allocation33_spill]]  ;;  %s3653_s28 = scalar_lea.vmem %s326_s29, 18432 }
  0x29   : > { %p3654_p9 = scmp.ne.s32.totalorder %s326_s29, %s3653_s28  ;;  %p3661_p5 = scmp.lt.s32.totalorder %s326_s29, %s326_s29 }
  0x2a   : > { %p3662_p1 = scmp.lt.s32.totalorder %s3653_s28, %s3653_s28 }
  0x2b   : > { %p3656_p10 = pnand %p3654_p9, %p4105_p0 }
  0x2c   : > { %p3663_p2 = por %p3662_p1, %p3661_p5 }
  0x2d   : > { %p3657_p6 = pneg %p3656_p10 }
  0x2e   : > { %3481 = dma.hbm_to_vmem [thread:$0]  (!%p4099_p13), %s4450_s1, 1152, %s303_s27, [#allocation9]  }
  0x2f   : > { %p3664_p11 = pnand %p3663_p2, %p3657_p6 }
  0x31   : > { %3667 = shalt.err (!%p3664_p11)
}
  0x32   : > { %s3965_s11 = smov 1152   ;;  %s3966_s20 = smov 72  }
  0x33   : > { %3487 = dma.hbm_to_vmem [thread:$0]  (!%p4099_p13), %s4429_s3, 18432, %s326_s29, [#allocation12], %s3965_s11, %s3965_s11, %s3966_s20  }
  0x34   : > { %s3679_s27 = scalar_lea.vmem %s350_s12, 73728  ;;  %p3687_p4 = scmp.lt.s32.totalorder %s350_s12, %s350_s12 }
  0x35   : > { %p3680_p3 = scmp.ne.s32.totalorder %s350_s12, %s3679_s27  ;;  %p3688_p7 = scmp.lt.s32.totalorder %s3679_s27, %s3679_s27 }
  0x37   : > { %p3682_p9 = pnand %p3680_p3, %p4105_p0  ;;  %p3689_p5 = por %p3688_p7, %p3687_p4 }
  0x39   : > { %p3683_p10 = pneg %p3682_p9 }
  0x3b   : > { %p3690_p6 = pnand %p3689_p5, %p3683_p10 }
  0x3d   : > { %3693 = shalt.err (!%p3690_p6)
}
  0x3e   : > { %s3967_s21 = smov 1536   ;;  %s3968_s26 = smov 96  }
  0x3f   : > { %3493 = dma.hbm_to_vmem [thread:$0]  (!%p4099_p13), %s4431_s5, 73728, %s350_s12, [#allocation15], %s3967_s21, %s3967_s21, %s3968_s26  }
  0x40   : > { %s3969_s15 = smov [#allocation17]  }
  0x41   : > { %s373_s22 = sshll.u32 %s3969_s15, 4  ;;  %s374_s22 = int_to_ptr.vmem [resolvable:$true] %s373_s22 }
  0x42   : > { %s3705_s29 = scalar_lea.vmem %s374_s22, 12288  ;;  %p3713_p1 = scmp.lt.s32.totalorder %s374_s22, %s374_s22 }
  0x43   : > { %p3706_p11 = scmp.ne.s32.totalorder %s374_s22, %s3705_s29  ;;  %p3714_p2 = scmp.lt.s32.totalorder %s3705_s29, %s3705_s29 }
  0x45   : > { %p3708_p8 = pnand %p3706_p11, %p4105_p0  ;;  %p3715_p3 = por %p3714_p2, %p3713_p1 }
  0x47   : > { %p3709_p12 = pneg %p3708_p8 }
  0x49   : > { %p3716_p9 = pnand %p3715_p3, %p3709_p12 }
  0x4b   : > { %3719 = shalt.err (!%p3716_p9)
}
  0x4c   : > { %s3970_s11 = smov 256   ;;  %s3971_s20 = smov 16  }
  0x4d   : > { %3499 = dma.hbm_to_vmem [thread:$0]  (!%p4099_p13), %s4433_s7, 12288, %s374_s22, [#allocation18], %s3970_s11, %s3970_s11, %s3971_s20  }
  0x4e   : > { %s3972_s27 = smov [#allocation5]   ;;  %s3973_s26 = smov [#allocation10]  }
  0x4f   : > { %s291_s21 = sshll.u32 %s3972_s27, 4  ;;  %s312_s28 = sshll.u32 %s3973_s26, 4  ;;  %s292_s21 = int_to_ptr.vmem [resolvable:$true] %s291_s21  ;;  %s313_s28 = int_to_ptr.vmem [resolvable:$true] %s312_s28 }
  0x50   : > { %s3731_s15 = scalar_lea.vmem %s292_s21, 128  ;;  %p3739_p5 = scmp.lt.s32.totalorder %s292_s21, %s292_s21 }
  0x51   : > { %p3732_p10 = scmp.ne.s32.totalorder %s292_s21, %s3731_s15  ;;  %p3740_p6 = scmp.lt.s32.totalorder %s3731_s15, %s3731_s15 }
  0x53   : > { %p3734_p4 = pnand %p3732_p10, %p4105_p0  ;;  %p3741_p11 = por %p3740_p6, %p3739_p5 }
  0x55   : > { %p3735_p7 = pneg %p3734_p4 }
  0x57   : > { %p3742_p8 = pnand %p3741_p11, %p3735_p7 }
  0x59   : > { %3745 = shalt.err (!%p3742_p8)
}
  0x5a   : > { %s4451_s0 = sld [smem:[#allocation32_spill]]  ;;  %s3757_s11 = scalar_lea.vmem %s313_s28, 4096 }
  0x5b   : > { %p3758_p12 = scmp.ne.s32.totalorder %s313_s28, %s3757_s11  ;;  %p3765_p3 = scmp.lt.s32.totalorder %s313_s28, %s313_s28 }
  0x5c   : > { %p3766_p9 = scmp.lt.s32.totalorder %s3757_s11, %s3757_s11 }
  0x5d   : > { %p3760_p1 = pnand %p3758_p12, %p4105_p0 }
  0x5e   : > { %p3767_p10 = por %p3766_p9, %p3765_p3 }
  0x5f   : > { %p3761_p2 = pneg %p3760_p1 }
  0x60   : > { %3478 = dma.hbm_to_vmem [thread:$0]  (!%p4099_p13), %s4451_s0, 128, %s292_s21, [#allocation6]  }
  0x61   : > { %p3768_p4 = pnand %p3767_p10, %p3761_p2 }
  0x63   : > { %3771 = shalt.err (!%p3768_p4)
}
  0x64   : > { %s3974_s20 = smov 128   ;;  %s3975_s1 = smov 8  }
  0x65   : > { %3484 = dma.hbm_to_vmem [thread:$0]  (!%p4099_p13), %s4428_s2, 4096, %s313_s28, [#allocation9], %s3974_s20, %s3974_s20, %s3975_s1  }
  0x66   : > { %s3976_s21 = smov [#allocation13]   ;;  %s3977_s15 = smov [#allocation16]  }
  0x67   : > { %s339_s26 = sshll.u32 %s3976_s21, 4  ;;  %s363_s29 = sshll.u32 %s3977_s15, 4  ;;  %s340_s26 = int_to_ptr.vmem [resolvable:$true] %s339_s26  ;;  %s364_s29 = int_to_ptr.vmem [resolvable:$true] %s363_s29 }
  0x68   : > { %s3783_s22 = scalar_lea.vmem %s340_s26, 144  ;;  %s3790_s11 = scalar_lea.vmem %s340_s26, 160 }
  0x69   : > { %p3784_p7 = scmp.ne.s32.totalorder %s340_s26, %s3783_s22  ;;  %p3791_p11 = scmp.lt.s32.totalorder %s340_s26, %s340_s26 }
  0x6a   : > { %p3792_p8 = scmp.lt.s32.totalorder %s3790_s11, %s3783_s22 }
  0x6b   : > { %p3786_p5 = pnand %p3784_p7, %p4105_p0 }
  0x6c   : > { %p3793_p12 = por %p3792_p8, %p3791_p11 }
  0x6d   : > { %p3787_p6 = pneg %p3786_p5 }
  0x6f   : > { %p3794_p1 = pnand %p3793_p12, %p3787_p6 }
  0x71   : > { %3797 = shalt.err (!%p3794_p1)
}
  0x72   : > { %3490 = dma.hbm_to_vmem [thread:$0]  (!%p4099_p13), %s4430_s4, 144, %s340_s26, [#allocation12]  }
  0x73   : > { %s3809_s1 = scalar_lea.vmem %s364_s29, 192  ;;  %p3817_p10 = scmp.lt.s32.totalorder %s364_s29, %s364_s29 }
  0x74   : > { %p3810_p2 = scmp.ne.s32.totalorder %s364_s29, %s3809_s1  ;;  %p3818_p4 = scmp.lt.s32.totalorder %s3809_s1, %s3809_s1 }
  0x76   : > { %p3812_p3 = pnand %p3810_p2, %p4105_p0  ;;  %p3819_p7 = por %p3818_p4, %p3817_p10 }
  0x78   : > { %p3813_p9 = pneg %p3812_p3 }
  0x7a   : > { %p3820_p5 = pnand %p3819_p7, %p3813_p9 }
  0x7c   : > { %3823 = shalt.err (!%p3820_p5)
}
  0x7d   : > { %3496 = dma.hbm_to_vmem [thread:$0]  (!%p4099_p13), %s4432_s6, 192, %s364_s29, [#allocation15]  }
  0x7e   : > { %s3978_s21 = smov [#allocation19]  }
  0x7f   : > { %s387_s15 = sshll.u32 %s3978_s21, 4  ;;  %s388_s15 = int_to_ptr.vmem [resolvable:$true] %s387_s15 }
  0x80   : > { %s3835_s26 = scalar_lea.vmem %s388_s15, 32  ;;  %p3843_p12 = scmp.lt.s32.totalorder %s388_s15, %s388_s15 }
  0x81   : > { %p3836_p6 = scmp.ne.s32.totalorder %s388_s15, %s3835_s26  ;;  %p3844_p1 = scmp.lt.s32.totalorder %s3835_s26, %s3835_s26 }
  0x83   : > { %p3838_p11 = pnand %p3836_p6, %p4105_p0  ;;  %p3845_p2 = por %p3844_p1, %p3843_p12 }
  0x85   : > { %p3839_p8 = pneg %p3838_p11 }
  0x87   : > { %p3846_p3 = pnand %p3845_p2, %p3839_p8 }
  0x89   : > { %3849 = shalt.err (!%p3846_p3)
}
  0x8a   : > { %3502 = dma.hbm_to_vmem [thread:$0]  (!%p4099_p13), %s4434_s8, 32, %s388_s15, [#allocation18]  }
  0x8b   : > { %p4452_p9 = scmp.ne.s32.totalorder %s4447_s25, 0 }
  0x8c   : > { %p4453_p10 = scmp.eq.s32.totalorder (!%p4452_p9), %s4062_s17, 0 }
  0x8d   : > { %400 = sbr.rel (%p4452_p9) target bundleno = 1723 (0x6bb), region = 56 }
  0x92   : > { %3919 = dma.done.wait (%p4453_p10), [#allocation6], 128   ;;  %p4454_p0 = pmov %p4453_p10 }
  0x94   : > { %3921 = vsyncadd (%p4454_p0), [#allocation6], 4294967168  ;;  %p4455_p4 = pmov %p4454_p0 }
  0x95   : > { %p4456_p7 = pmov %p4454_p0 }
  0x96   : > { %3923 = dma.done.wait (%p4455_p4), [#allocation9], 5248  }
  0x97   : > { %3925 = vsyncadd (%p4456_p7), [#allocation9], 4294962048  ;;  %p4457_p5 = pmov %p4454_p0 }
  0x98   : > { %p4458_p13 = pmov %p4454_p0 }
  0x99   : > { %3927 = dma.done.wait (%p4457_p5), [#allocation12], 18576  }
  0x9a   : > { %3929 = vsyncadd (%p4458_p13), [#allocation12], 4294948720  ;;  %p4459_p6 = pmov %p4454_p0 }
  0x9b   : > { %p4460_p11 = pmov %p4454_p0 }
  0x9c   : > { %3931 = dma.done.wait (%p4459_p6), [#allocation15], 73920  }
  0x9d   : > { %3933 = vsyncadd (%p4460_p11), [#allocation15], 4294893376  ;;  %p4461_p8 = pmov %p4454_p0 }
  0x9e   : > { %p4462_p12 = pmov %p4454_p0 }
  0x9f   : > { %3935 = dma.done.wait (%p4461_p8), [#allocation18], 12320  }
  0xa0   : > { %3937 = vsyncadd (%p4462_p12), [#allocation18], 4294954976  ;;  %s4195_s25 = sand.u32 1, %s3952_s14   ;;  %p4463_p1 = scmp.ne.s32.totalorder %s4062_s17, 0 }
  0xa1   : > { %s3324_s30 = sshll.u32 %s4195_s25, 4  ;;  %s3433_s18 = smul.u32 24, %s4195_s25 }
  0xa2   : > { %s4199_s29 = scalar_lea.vmem [#allocation20], %s3324_s30  ;;  %473 = sbr.rel (%p4463_p1) target bundleno = 180 (0xb4), region = 96 }
  0xa3   : > { %s4201_s28 = scalar_lea.vmem [#allocation21], %s3433_s18 }
  0xa7   : > { %v474_v0 = vld [vmem:[#allocation8] sm:$0xff]  ;;  %v475_v1 = vld [vmem:[#allocation8 + $0x8] sm:$0xff]  ;;  %v476_v2 = vld [vmem:[#allocation8 + $0x10] sm:$0xff]  ;;  %v496_v3 = vlaneseq  ;;  %v3979_v7 = vmov 0.0  }
  0xa8   : > { %483 = vst [vmem:[#allocation2 + $0x30] sm:$0xff] %v474_v0  ;;  %484 = vst [vmem:[#allocation2] sm:$0xff] %v475_v1  ;;  %v477_v4 = vld [vmem:[#allocation8 + $0x18] sm:$0xff]  ;;  %v478_v5 = vld [vmem:[#allocation8 + $0x20] sm:$0xff] }
  0xa9   : > { %485 = vst [vmem:[#allocation2 + $0x18] sm:$0xff] %v476_v2  ;;  %v479_v6 = vld [vmem:[#allocation8 + $0x28] sm:$0xff]  ;;  %550 = vst [vmem:[#allocation4 + $0x8] sm:$0xff] %v3979_v7  ;;  %v480_v8 = vld [vmem:[#allocation8 + $0x30] sm:$0xff]  ;;  %v497_v11 = vshrl.u32 %v496_v3, 7 }
  0xaa   : > { %551 = vst [vmem:[#allocation4] sm:$0xff] %v3979_v7  ;;  %552 = vst [vmem:[#allocation4 + $0x10] sm:$0xff] %v3979_v7  ;;  %v481_v9 = vld [vmem:[#allocation8 + $0x38] sm:$0xff]  ;;  %v482_v10 = vld [vmem:[#allocation8 + $0x40] sm:$0xff] }
  0xab   : > { %486 = vst [vmem:[#allocation2 + $0x10] sm:$0xff] %v477_v4  ;;  %487 = vst [vmem:[#allocation2 + $0x20] sm:$0xff] %v478_v5  ;;  %v492_v12 = vld [vmem:[#allocation16 + $0x3] sm:$0xff]  ;;  %v3326_v13 = vld [vmem:[#allocation16 + $0xb] ss:$0 sm:$0xff]  ;;  %v498_v14 = vsub.s32 0, %v497_v11 }
  0xac   : > { %488 = vst [vmem:[#allocation2 + $0x28] sm:$0xff] %v479_v6  ;;  %489 = vst [vmem:[#allocation2 + $0x40] sm:$0xff] %v480_v8  ;;  %v502_v15 = vsub.s32 1, %v497_v11  ;;  %v506_v16 = vsub.s32 2, %v497_v11  ;;  %v510_v17 = vsub.s32 3, %v497_v11  ;;  %v514_v18 = vsub.s32 4, %v497_v11 }
  0xad   : > { %490 = vst [vmem:[#allocation2 + $0x38] sm:$0xff] %v481_v9  ;;  %491 = vst [vmem:[#allocation2 + $0x8] sm:$0xff] %v482_v10  ;;  %v518_v19 = vsub.s32 5, %v497_v11  ;;  %v522_v20 = vsub.s32 6, %v497_v11  ;;  %v526_v21 = vsub.s32 7, %v497_v11  ;;  %v499_v22 = vrot.slane %v492_v12, %v498_v14 }
  0xae   : > { %549 = vst [vmem:[#allocation3 + $0x18] sm:$0xff] %v3326_v13  ;;  %v503_v23 = vrot.slane %v492_v12, %v502_v15  ;;  %v507_v24 = vrot.slane %v492_v12, %v506_v16  ;;  %v511_v25 = vrot.slane %v492_v12, %v510_v17  ;;  %v515_v26 = vrot.slane %v492_v12, %v514_v18 }
  0xaf   : > { %v519_v27 = vrot.slane %v492_v12, %v518_v19  ;;  %v523_v28 = vrot.slane %v492_v12, %v522_v20  ;;  %v527_v29 = vrot.slane %v492_v12, %v526_v21  ;;  %541 = vst [vmem:[#allocation3 + $0x40] sm:$0xff] %v499_v22 }
  0xb0   : > { %542 = vst [vmem:[#allocation3 + $0x8] sm:$0xff] %v503_v23  ;;  %543 = vst [vmem:[#allocation3 + $0x38] sm:$0xff] %v507_v24 }
  0xb1   : > { %544 = vst [vmem:[#allocation3 + $0x30] sm:$0xff] %v511_v25  ;;  %545 = vst [vmem:[#allocation3] sm:$0xff] %v515_v26 }
  0xb2   : > { %546 = vst [vmem:[#allocation3 + $0x28] sm:$0xff] %v519_v27  ;;  %547 = vst [vmem:[#allocation3 + $0x10] sm:$0xff] %v523_v28 }
  0xb3   : > { %548 = vst [vmem:[#allocation3 + $0x20] sm:$0xff] %v527_v29 }
  0xb4 PF: > { %v821_v30 = vld [vmem:[#allocation14 + $0x5a8] sm:$0xff]  ;;  %v820_v31 = vld [vmem:[#allocation14 + $0x5a0] sm:$0xff]  ;;  %v3980_v34 = vmov 0.0   ;;  %v555_v25 = vld [vmem:[#allocation2 + $0x18] sm:$0xff]  ;;  %s2390_s20 = sadd.s32 1, %s4062_s17 }
  0xb5   : > { %v809_v32 = vld [vmem:[#allocation14 + $0x548] sm:$0xff]  ;;  %1280 = vmatprep.subr.mxu0 %v821_v30  ;;  %v808_v33 = vld [vmem:[#allocation14 + $0x540] sm:$0xff]  ;;  %1415 = vmatprep.mubr.f32.mxu1 %v3980_v34  ;;  %p3333_p2 = scmp.ge.s32.totalorder %s2390_s20, 5 }
  0xb6   : > { %1281 = vmatpush1.msra.mxu0 %v820_v31  ;;  %v797_v35 = vld [vmem:[#allocation14 + $0x4e8] sm:$0xff]  ;;  %v796_v36 = vld [vmem:[#allocation14 + $0x4e0] sm:$0xff] }
  0xb7   : > { %1282 = vmatprep.subr.mxu0 %v809_v32  ;;  %v785_v37 = vld [vmem:[#allocation14 + $0x488] sm:$0xff]  ;;  %v784_v38 = vld [vmem:[#allocation14 + $0x480] sm:$0xff] }
  0xb8   : > { %1283 = vmatpush1.msra.mxu0 %v808_v33  ;;  %v773_v39 = vld [vmem:[#allocation14 + $0x428] sm:$0xff]  ;;  %v772_v40 = vld [vmem:[#allocation14 + $0x420] sm:$0xff] }
  0xb9   : > { %1284 = vmatprep.subr.mxu0 %v797_v35  ;;  %v761_v41 = vld [vmem:[#allocation14 + $0x3c8] sm:$0xff]  ;;  %v1204_v43 = vld [vmem:[#allocation14 + $0x11a0] sm:$0xff] }
  0xba   : > { %1285 = vmatpush1.msra.mxu0 %v796_v36  ;;  %v1205_v42 = vld [vmem:[#allocation14 + $0x11a8] sm:$0xff]  ;;  %v760_v44 = vld [vmem:[#allocation14 + $0x3c0] sm:$0xff] }
  0xbb   : > { %1286 = vmatprep.subr.mxu0 %v785_v37  ;;  %1351 = vmatprep.subr.mxu1 %v1205_v42  ;;  %v1193_v45 = vld [vmem:[#allocation14 + $0x1148] sm:$0xff]  ;;  %v1192_v47 = vld [vmem:[#allocation14 + $0x1140] sm:$0xff] }
  0xbc   : > { %1287 = vmatpush1.msra.mxu0 %v784_v38  ;;  %v749_v46 = vld [vmem:[#allocation14 + $0x368] sm:$0xff]  ;;  %1352 = vmatpush1.msra.mxu1 %v1204_v43  ;;  %v748_v49 = vld [vmem:[#allocation14 + $0x360] sm:$0xff] }
  0xbd   : > { %1288 = vmatprep.subr.mxu0 %v773_v39  ;;  %v1181_v48 = vld [vmem:[#allocation14 + $0x10e8] sm:$0xff]  ;;  %1353 = vmatprep.subr.mxu1 %v1193_v45  ;;  %v1180_v50 = vld [vmem:[#allocation14 + $0x10e0] sm:$0xff] }
  0xbe   : > { %1289 = vmatpush1.msra.mxu0 %v772_v40  ;;  %v737_v51 = vld [vmem:[#allocation14 + $0x308] sm:$0xff]  ;;  %1354 = vmatpush1.msra.mxu1 %v1192_v47  ;;  %v736_v53 = vld [vmem:[#allocation14 + $0x300] sm:$0xff] }
  0xbf   : > { %1290 = vmatprep.subr.mxu0 %v761_v41  ;;  %v1169_v52 = vld [vmem:[#allocation14 + $0x1088] sm:$0xff]  ;;  %1355 = vmatprep.subr.mxu1 %v1181_v48  ;;  %v1168_v54 = vld [vmem:[#allocation14 + $0x1080] sm:$0xff] }
  0xc0   : > { %1291 = vmatpush1.msra.mxu0 %v760_v44  ;;  %v725_v55 = vld [vmem:[#allocation14 + $0x2a8] sm:$0xff]  ;;  %1356 = vmatpush1.msra.mxu1 %v1180_v50  ;;  %v724_v57 = vld [vmem:[#allocation14 + $0x2a0] sm:$0xff] }
  0xc1   : > { %1292 = vmatprep.subr.mxu0 %v749_v46  ;;  %v1157_v56 = vld [vmem:[#allocation14 + $0x1028] sm:$0xff]  ;;  %1357 = vmatprep.subr.mxu1 %v1169_v52  ;;  %v1156_v58 = vld [vmem:[#allocation14 + $0x1020] sm:$0xff] }
  0xc2   : > { %1293 = vmatpush1.msra.mxu0 %v748_v49  ;;  %v713_v59 = vld [vmem:[#allocation14 + $0x248] sm:$0xff]  ;;  %1358 = vmatpush1.msra.mxu1 %v1168_v54  ;;  %v712_v61 = vld [vmem:[#allocation14 + $0x240] sm:$0xff]  ;;  %v823_v49 = vld [vmem:[#allocation14 + $0x5b8] sm:$0xff] }
  0xc3   : > { %1294 = vmatprep.subr.mxu0 %v737_v51  ;;  %v1145_v60 = vld [vmem:[#allocation14 + $0xfc8] sm:$0xff]  ;;  %1359 = vmatprep.subr.mxu1 %v1157_v56  ;;  %v1144_v62 = vld [vmem:[#allocation14 + $0xfc0] sm:$0xff] }
  0xc4   : > { %1295 = vmatpush1.msra.mxu0 %v736_v53  ;;  %v701_v63 = vld [vmem:[#allocation14 + $0x1e8] sm:$0xff]  ;;  %1360 = vmatpush1.msra.mxu1 %v1156_v58  ;;  %v700_v1 = vld [vmem:[#allocation14 + $0x1e0] sm:$0xff] }
  0xc5   : > { %1296 = vmatprep.subr.mxu0 %v725_v55  ;;  %v1133_v0 = vld [vmem:[#allocation14 + $0xf68] sm:$0xff]  ;;  %1361 = vmatprep.subr.mxu1 %v1145_v60  ;;  %v1132_v2 = vld [vmem:[#allocation14 + $0xf60] sm:$0xff] }
  0xc6   : > { %1297 = vmatpush1.msra.mxu0 %v724_v57  ;;  %v689_v3 = vld [vmem:[#allocation14 + $0x188] sm:$0xff]  ;;  %1362 = vmatpush1.msra.mxu1 %v1144_v62  ;;  %v688_v5 = vld [vmem:[#allocation14 + $0x180] sm:$0xff] }
  0xc7   : > { %1298 = vmatprep.subr.mxu0 %v713_v59  ;;  %v1121_v4 = vld [vmem:[#allocation14 + $0xf08] sm:$0xff]  ;;  %1363 = vmatprep.subr.mxu1 %v1133_v0  ;;  %v1120_v6 = vld [vmem:[#allocation14 + $0xf00] sm:$0xff] }
  0xc8   : > { %1299 = vmatpush1.msra.mxu0 %v712_v61  ;;  %v677_v7 = vld [vmem:[#allocation14 + $0x128] sm:$0xff]  ;;  %1364 = vmatpush1.msra.mxu1 %v1132_v2  ;;  %v676_v9 = vld [vmem:[#allocation14 + $0x120] sm:$0xff]  ;;  %v565_v2 = vld [vmem:[#allocation3 + $0x30] sm:$0xff] }
  0xc9   : > { %1300 = vmatprep.subr.mxu0 %v701_v63  ;;  %v1109_v8 = vld [vmem:[#allocation14 + $0xea8] sm:$0xff]  ;;  %1365 = vmatprep.subr.mxu1 %v1121_v4  ;;  %v1108_v10 = vld [vmem:[#allocation14 + $0xea0] sm:$0xff] }
  0xca   : > { %1301 = vmatpush1.msra.mxu0 %v700_v1  ;;  %v665_v11 = vld [vmem:[#allocation14 + $0xc8] sm:$0xff]  ;;  %1366 = vmatpush1.msra.mxu1 %v1120_v6  ;;  %v664_v13 = vld [vmem:[#allocation14 + $0xc0] sm:$0xff] }
  0xcb   : > { %1302 = vmatprep.subr.mxu0 %v689_v3  ;;  %v1097_v12 = vld [vmem:[#allocation14 + $0xe48] sm:$0xff]  ;;  %1367 = vmatprep.subr.mxu1 %v1109_v8  ;;  %v1096_v14 = vld [vmem:[#allocation14 + $0xe40] sm:$0xff] }
  0xcc   : > { %1303 = vmatpush1.msra.mxu0 %v688_v5  ;;  %v653_v15 = vld [vmem:[#allocation14 + $0x68] sm:$0xff]  ;;  %1368 = vmatpush1.msra.mxu1 %v1108_v10  ;;  %v652_v17 = vld [vmem:[#allocation14 + $0x60] sm:$0xff] }
  0xcd   : > { %1304 = vmatprep.subr.mxu0 %v677_v7  ;;  %v1085_v16 = vld [vmem:[#allocation14 + $0xde8] sm:$0xff]  ;;  %1369 = vmatprep.subr.mxu1 %v1097_v12  ;;  %v1084_v18 = vld [vmem:[#allocation14 + $0xde0] sm:$0xff] }
  0xce   : > { %1305 = vmatpush1.msra.mxu0 %v676_v9  ;;  %v641_v19 = vld [vmem:[#allocation14 + $0x8] sm:$0xff]  ;;  %1370 = vmatpush1.msra.mxu1 %v1096_v14  ;;  %v640_v21 = vld [vmem:[#allocation14] sm:$0xff] }
  0xcf   : > { %1306 = vmatprep.subr.mxu0 %v665_v11  ;;  %v1073_v20 = vld [vmem:[#allocation14 + $0xd88] sm:$0xff]  ;;  %1371 = vmatprep.subr.mxu1 %v1085_v16  ;;  %v1072_v22 = vld [vmem:[#allocation14 + $0xd80] sm:$0xff] }
  0xd0   : > { %1307 = vmatpush1.msra.mxu0 %v664_v13  ;;  %v1013_v23 = vld [vmem:[#allocation14 + $0xba8] sm:$0xff]  ;;  %1372 = vmatpush1.msra.mxu1 %v1084_v18  ;;  %v1012_v26 = vld [vmem:[#allocation14 + $0xba0] sm:$0xff] }
  0xd1   : > { %1308 = vmatprep.subr.mxu0 %v653_v15  ;;  %v1061_v24 = vld [vmem:[#allocation14 + $0xd28] sm:$0xff]  ;;  %1373 = vmatprep.subr.mxu1 %v1073_v20  ;;  %v1060_v27 = vld [vmem:[#allocation14 + $0xd20] sm:$0xff] }
  0xd2   : > { %1309 = vmatpush1.msra.mxu0 %v652_v17  ;;  %v564_v28 = vld [vmem:[#allocation3 + $0x38] sm:$0xff]  ;;  %v1001_v29 = vld [vmem:[#allocation14 + $0xb48] sm:$0xff]  ;;  %1374 = vmatpush1.msra.mxu1 %v1072_v22 }
  0xd3   : > { %1310 = vmatprep.subr.mxu0 %v641_v19  ;;  %v1000_v30 = vld [vmem:[#allocation14 + $0xb40] sm:$0xff]  ;;  %v1049_v31 = vld [vmem:[#allocation14 + $0xcc8] sm:$0xff]  ;;  %v576_v32 = vadd.f32 %v564_v28, %v555_v25  ;;  %1375 = vmatprep.subr.mxu1 %v1061_v24 }
  0xd4   : > { %1311 = vmatpush1.msra.mxu0 %v640_v21  ;;  %v1048_v33 = vld [vmem:[#allocation14 + $0xcc0] sm:$0xff]  ;;  %v567_v36 = vld [vmem:[#allocation3 + $0x28] sm:$0xff]  ;;  %1376 = vmatpush1.msra.mxu1 %v1060_v27 }
  0xd5   : > { %1312 = vmatprep.subr.mxu0 %v1013_v23  ;;  %v558_v35 = vld [vmem:[#allocation2 + $0x28] sm:$0xff]  ;;  %v3329_v39 = vmul.f32 -1.442695, %v576_v32  ;;  %1377 = vmatprep.subr.mxu1 %v1049_v31  ;;  %v554_v47 = vld [vmem:[#allocation2] sm:$0xff]  ;;  %v563_v50 = vld [vmem:[#allocation3 + $0x8] sm:$0xff] }
  0xd6   : > { %1313 = vmatpush2.msra.mxu0 %v1012_v26  ;;  %v989_v37 = vld [vmem:[#allocation14 + $0xae8] sm:$0xff]  ;;  %v988_v40 = vld [vmem:[#allocation14 + $0xae0] sm:$0xff]  ;;  %1378 = vmatpush1.msra.mxu1 %v1048_v33  ;;  %v597_v44 = vadd.f32 %v567_v36, %v558_v35  ;;  %v575_v53 = vadd.f32 %v563_v50, %v554_v47  ;;  %v1207_v33 = vld [vmem:[#allocation14 + $0x11b8] sm:$0xff] }
  0xd7   : > { %v1037_v38 = vld [vmem:[#allocation14 + $0xc68] sm:$0xff]  ;;  %1314 = vmatprep.subr.mxu0 %v1001_v29  ;;  %v1036_v41 = vld [vmem:[#allocation14 + $0xc60] sm:$0xff]  ;;  %3583 = vpow2.f32 %v3329_v39 }
  0xd8   : > { %1315 = vmatpush2.msra.mxu0 %v1000_v30  ;;  %v977_v42 = vld [vmem:[#allocation14 + $0xa88] sm:$0xff]  ;;  %v976_v45 = vld [vmem:[#allocation14 + $0xa80] sm:$0xff]  ;;  %1379 = vmatprep.subr.mxu1 %v1037_v38  ;;  %v3332_v54 = vmul.f32 -1.442695, %v597_v44  ;;  %v3328_v59 = vmul.f32 -1.442695, %v575_v53 }
  0xd9   : > { %v1025_v43 = vld [vmem:[#allocation14 + $0xc08] sm:$0xff]  ;;  %1316 = vmatprep.subr.mxu0 %v989_v37  ;;  %v1024_v46 = vld [vmem:[#allocation14 + $0xc00] sm:$0xff]  ;;  %1380 = vmatpush1.msra.mxu1 %v1036_v41 }
  0xda   : > { %1317 = vmatpush2.msra.mxu0 %v988_v40  ;;  %v965_v48 = vld [vmem:[#allocation14 + $0xa28] sm:$0xff]  ;;  %v964_v51 = vld [vmem:[#allocation14 + $0xa20] sm:$0xff]  ;;  %1381 = vmatprep.subr.mxu1 %v1025_v43  ;;  %3585 = vpow2.f32 %v3328_v59 }
  0xdb   : > { %1318 = vmatprep.subr.mxu0 %v977_v42  ;;  %v953_v52 = vld [vmem:[#allocation14 + $0x9c8] sm:$0xff]  ;;  %1382 = vmatpush1.msra.mxu1 %v1024_v46  ;;  %v557_v55 = vld [vmem:[#allocation2 + $0x20] sm:$0xff]  ;;  %3587 = vpow2.f32 %v3332_v54  ;;  %v560_v46 = vld [vmem:[#allocation2 + $0x38] sm:$0xff] }
  0xdc   : > { %1319 = vmatpush2.msra.mxu0 %v976_v45  ;;  %v566_v56 = vld [vmem:[#allocation3] sm:$0xff]  ;;  %v553_v57 = vld [vmem:[#allocation2 + $0x30] sm:$0xff]  ;;  %1422 = vmatprep.subr.mxu1 %v823_v49  ;;  %v570_v35 = vld [vmem:[#allocation3 + $0x18] sm:$0xff] }
  0xdd   : > { %1320 = vmatprep.subr.mxu0 %v965_v48  ;;  %v952_v58 = vld [vmem:[#allocation14 + $0x9c0] sm:$0xff]  ;;  %v941_v61 = vld [vmem:[#allocation14 + $0x968] sm:$0xff]  ;;  %v596_v0 = vadd.f32 %v566_v56, %v557_v55  ;;  %v568_v48 = vld [vmem:[#allocation3 + $0x10] sm:$0xff] }
  0xde   : > { %v562_v60 = vld [vmem:[#allocation3 + $0x40] sm:$0xff]  ;;  %1321 = vmatpush2.msra.mxu0 %v964_v51  ;;  %v556_v1 = vld [vmem:[#allocation2 + $0x10] sm:$0xff]  ;;  %v559_v51 = vld [vmem:[#allocation2 + $0x40] sm:$0xff] }
  0xdf   : > { %v574_v62 = vadd.f32 %v562_v60, %v553_v57  ;;  %1322 = vmatprep.subr.mxu0 %v953_v52  ;;  %v940_v63 = vld [vmem:[#allocation14 + $0x960] sm:$0xff]  ;;  %v929_v3 = vld [vmem:[#allocation14 + $0x908] sm:$0xff]  ;;  %v595_v7 = vadd.f32 %v565_v2, %v556_v1  ;;  %v3331_v9 = vmul.f32 -1.442695, %v596_v0  ;;  %v811_v1 = vld [vmem:[#allocation14 + $0x558] sm:$0xff] }
  0xe0   : > { %1323 = vmatpush2.msra.mxu0 %v952_v58  ;;  %v928_v5 = vld [vmem:[#allocation14 + $0x900] sm:$0xff]  ;;  %v917_v6 = vld [vmem:[#allocation14 + $0x8a8] sm:$0xff] }
  0xe1   : > { %v3327_v4 = vmul.f32 -1.442695, %v574_v62  ;;  %1324 = vmatprep.subr.mxu0 %v941_v61  ;;  %v916_v8 = vld [vmem:[#allocation14 + $0x8a0] sm:$0xff]  ;;  %v905_v10 = vld [vmem:[#allocation14 + $0x848] sm:$0xff]  ;;  %v3330_v15 = vmul.f32 -1.442695, %v595_v7 }
  0xe2   : > { %1325 = vmatpush2.msra.mxu0 %v940_v63  ;;  %v904_v12 = vld [vmem:[#allocation14 + $0x840] sm:$0xff]  ;;  %v893_v13 = vld [vmem:[#allocation14 + $0x7e8] sm:$0xff]  ;;  %v822_v62 = vld [vmem:[#allocation14 + $0x5b0] sm:$0xff] }
  0xe3   : > { %3589 = vpow2.f32 %v3327_v4  ;;  %1326 = vmatprep.subr.mxu0 %v929_v3  ;;  %v892_v16 = vld [vmem:[#allocation14 + $0x7e0] sm:$0xff]  ;;  %v881_v17 = vld [vmem:[#allocation14 + $0x788] sm:$0xff]  ;;  %v810_v3 = vld [vmem:[#allocation14 + $0x550] sm:$0xff] }
  0xe4   : > { %1327 = vmatpush2.msra.mxu0 %v928_v5  ;;  %v3584_v11 = vpop.eup %3583  ;;  %3591 = vpow2.f32 %v3331_v9  ;;  %v880_v18 = vld [vmem:[#allocation14 + $0x780] sm:$0xff]  ;;  %v869_v19 = vld [vmem:[#allocation14 + $0x728] sm:$0xff]  ;;  %v799_v4 = vld [vmem:[#allocation14 + $0x4f8] sm:$0xff] }
  0xe5   : > { %1328 = vmatprep.subr.mxu0 %v917_v6  ;;  %v588_v14 = vadd.f32 1.0, %v3584_v11  ;;  %v868_v20 = vld [vmem:[#allocation14 + $0x720] sm:$0xff]  ;;  %v857_v22 = vld [vmem:[#allocation14 + $0x6c8] sm:$0xff]  ;;  %v571_v6 = vld [vmem:[#allocation4 + $0x8] sm:$0xff] }
  0xe6   : > { %1329 = vmatpush2.msra.mxu0 %v916_v8  ;;  %v856_v24 = vld [vmem:[#allocation14 + $0x6c0] sm:$0xff]  ;;  %v845_v26 = vld [vmem:[#allocation14 + $0x668] sm:$0xff]  ;;  %v798_v8 = vld [vmem:[#allocation14 + $0x4f0] sm:$0xff] }
  0xe7   : > { %1330 = vmatprep.subr.mxu0 %v905_v10  ;;  %3593 = vrcp.f32 %v588_v14  ;;  %v3586_v21 = vpop.eup %3585  ;;  %v844_v28 = vld [vmem:[#allocation14 + $0x660] sm:$0xff]  ;;  %v833_v30 = vld [vmem:[#allocation14 + $0x608] sm:$0xff]  ;;  %v787_v10 = vld [vmem:[#allocation14 + $0x498] sm:$0xff] }
  0xe8   : > { %1331 = vmatpush2.msra.mxu0 %v904_v12  ;;  %3595 = vpow2.f32 %v3330_v15  ;;  %v3588_v23 = vpop.eup %3587  ;;  %v587_v25 = vadd.f32 1.0, %v3586_v21  ;;  %v832_v32 = vld [vmem:[#allocation14 + $0x600] sm:$0xff]  ;;  %v572_v63 = vld [vmem:[#allocation4] sm:$0xff] }
  0xe9   : > { %1332 = vmatprep.subr.mxu0 %v893_v13  ;;  %v609_v29 = vadd.f32 1.0, %v3588_v23  ;;  %v561_v38 = vld [vmem:[#allocation2 + $0x8] sm:$0xff]  ;;  %v573_v55 = vld [vmem:[#allocation4 + $0x10] sm:$0xff]  ;;  %v786_v12 = vld [vmem:[#allocation14 + $0x490] sm:$0xff] }
  0xea   : > { %1333 = vmatpush2.msra.mxu0 %v892_v16  ;;  %3597 = vrcp.f32 %v587_v25  ;;  %v569_v43 = vld [vmem:[#allocation3 + $0x20] sm:$0xff]  ;;  %v775_v16 = vld [vmem:[#allocation14 + $0x438] sm:$0xff]  ;;  %v1206_v21 = vld [vmem:[#allocation14 + $0x11b0] sm:$0xff] }
  0xeb   : > { %1334 = vmatprep.subr.mxu0 %v881_v17  ;;  %v1195_v23 = vld [vmem:[#allocation14 + $0x1158] sm:$0xff]  ;;  %v1194_v25 = vld [vmem:[#allocation14 + $0x1150] sm:$0xff] }
  0xec   : > { %1335 = vmatpush2.msra.mxu0 %v880_v18  ;;  %v774_v18 = vld [vmem:[#allocation14 + $0x430] sm:$0xff] }
  0xed   : > { %1336 = vmatprep.subr.mxu0 %v869_v19  ;;  %v763_v19 = vld [vmem:[#allocation14 + $0x3d8] sm:$0xff] }
  0xee   : > { %1337 = vmatpush2.msra.mxu0 %v868_v20 }
  0xef   : > { %1338 = vmatprep.subr.mxu0 %v857_v22  ;;  %v762_v22 = vld [vmem:[#allocation14 + $0x3d0] sm:$0xff] }
  0xf0   : > { %v3590_v27 = vpop.eup %3589  ;;  %1339 = vmatpush2.msra.mxu0 %v856_v24  ;;  %v751_v24 = vld [vmem:[#allocation14 + $0x378] sm:$0xff] }
  0xf1   : > { %v586_v31 = vadd.f32 1.0, %v3590_v27  ;;  %1340 = vmatprep.subr.mxu0 %v845_v26  ;;  %v3592_v36 = vpop.eup %3591  ;;  %v750_v26 = vld [vmem:[#allocation14 + $0x370] sm:$0xff]  ;;  %v1183_v27 = vld [vmem:[#allocation14 + $0x10f8] sm:$0xff] }
  0xf2   : > { %1341 = vmatpush2.msra.mxu0 %v844_v28  ;;  %v608_v41 = vadd.f32 1.0, %v3592_v36  ;;  %v739_v28 = vld [vmem:[#allocation14 + $0x318] sm:$0xff] }
  0xf3   : > { %3599 = vrcp.f32 %v586_v31  ;;  %1342 = vmatprep.subr.mxu0 %v833_v30  ;;  %v738_v30 = vld [vmem:[#allocation14 + $0x310] sm:$0xff]  ;;  %v1171_v31 = vld [vmem:[#allocation14 + $0x1098] sm:$0xff] }
  0xf4   : > { %3601 = vrcp.f32 %v609_v29  ;;  %1343 = vmatpush2.msra.mxu0 %v832_v32  ;;  %v3594_v37 = vpop.eup %3593  ;;  %v1182_v29 = vld [vmem:[#allocation14 + $0x10f0] sm:$0xff]  ;;  %v727_v32 = vld [vmem:[#allocation14 + $0x2b8] sm:$0xff] }
  0xf5   : > { %1493 = vmatprep.subr.mxu0 %v1207_v33  ;;  %v618_v39 = vmul.f32 %v3594_v37, %v570_v35  ;;  %v3596_v40 = vpop.eup %3595  ;;  %v1170_v33 = vld [vmem:[#allocation14 + $0x1090] sm:$0xff]  ;;  %v1159_v36 = vld [vmem:[#allocation14 + $0x1038] sm:$0xff] }
  0xf6   : > { %v607_v44 = vadd.f32 1.0, %v3596_v40  ;;  %v726_v35 = vld [vmem:[#allocation14 + $0x2b0] sm:$0xff]  ;;  %v715_v37 = vld [vmem:[#allocation14 + $0x258] sm:$0xff] }
  0xf7   : > { %v621_v42 = vadd.f32 %v618_v39, %v561_v38  ;;  %v3598_v45 = vpop.eup %3597  ;;  %v1158_v38 = vld [vmem:[#allocation14 + $0x1030] sm:$0xff]  ;;  %v1147_v40 = vld [vmem:[#allocation14 + $0xfd8] sm:$0xff] }
  0xf8   : > { %v617_v47 = vmul.f32 %v3598_v45, %v569_v43  ;;  %v714_v39 = vld [vmem:[#allocation14 + $0x250] sm:$0xff]  ;;  %v691_v45 = vld [vmem:[#allocation14 + $0x198] sm:$0xff] }
  0xf9   : > { %3603 = vtanh.f32 %v621_v42  ;;  %v1146_v42 = vld [vmem:[#allocation14 + $0xfd0] sm:$0xff] }
  0xfa   : > { %3605 = vrcp.f32 %v608_v41  ;;  %v620_v50 = vadd.f32 %v617_v47, %v560_v46  ;;  %v703_v41 = vld [vmem:[#allocation14 + $0x1f8] sm:$0xff]  ;;  %v702_v43 = vld [vmem:[#allocation14 + $0x1f0] sm:$0xff] }
  0xfb   : > { %3607 = vrcp.f32 %v607_v44  ;;  %v1135_v44 = vld [vmem:[#allocation14 + $0xf78] sm:$0xff]  ;;  %v1134_v46 = vld [vmem:[#allocation14 + $0xf70] sm:$0xff] }
  0xfc   : > { %3609 = vtanh.f32 %v620_v50  ;;  %v690_v47 = vld [vmem:[#allocation14 + $0x190] sm:$0xff] }
  0xfd   : > { %v1122_v50 = vld [vmem:[#allocation14 + $0xf10] sm:$0xff] }
 0x100   : > { %v3600_v49 = vpop.eup %3599 }
 0x101   : > { %v616_v52 = vmul.f32 %v3600_v49, %v568_v48  ;;  %v3602_v53 = vpop.eup %3601  ;;  %v1123_v48 = vld [vmem:[#allocation14 + $0xf18] sm:$0xff] }
 0x102   : > { %v627_v56 = vsub.f32 1.0, %v3602_v53  ;;  %v633_v57 = vmul.f32 %v3602_v53, %v573_v55  ;;  %v679_v49 = vld [vmem:[#allocation14 + $0x138] sm:$0xff]  ;;  %v666_v55 = vld [vmem:[#allocation14 + $0xd0] sm:$0xff] }
 0x103   : > { %v619_v54 = vadd.f32 %v616_v52, %v559_v51  ;;  %v678_v51 = vld [vmem:[#allocation14 + $0x130] sm:$0xff]  ;;  %v1111_v52 = vld [vmem:[#allocation14 + $0xeb8] sm:$0xff] }
 0x104   : > { %v667_v53 = vld [vmem:[#allocation14 + $0xd8] sm:$0xff] }
 0x105   : > { %3611 = vtanh.f32 %v619_v54  ;;  %v1110_v54 = vld [vmem:[#allocation14 + $0xeb0] sm:$0xff] }
 0x106   : > { %v3604_v58 = vpop.eup %3603 }
 0x107   : > { %v3606_v59 = vpop.eup %3605  ;;  %v630_v60 = vmul.f32 %v3604_v58, %v627_v56  ;;  %v1099_v56 = vld [vmem:[#allocation14 + $0xe58] sm:$0xff]  ;;  %v1098_v58 = vld [vmem:[#allocation14 + $0xe50] sm:$0xff] }
 0x108   : > { %v3608_v0 = vpop.eup %3607  ;;  %v626_v2 = vsub.f32 1.0, %v3606_v59  ;;  %v632_v5 = vmul.f32 %v3606_v59, %v572_v63  ;;  %v654_v59 = vld [vmem:[#allocation14 + $0x70] sm:$0xff] }
 0x109   : > { %v4206_v61 = vadd.f32 %v633_v57, %v630_v60  ;;  %v3610_v7 = vpop.eup %3609  ;;  %v625_v9 = vsub.f32 1.0, %v3608_v0  ;;  %v631_v13 = vmul.f32 %v3608_v0, %v571_v6  ;;  %v655_v57 = vld [vmem:[#allocation14 + $0x78] sm:$0xff]  ;;  %v1086_v63 = vld [vmem:[#allocation14 + $0xdf0] sm:$0xff] }
 0x10a   : > { %v629_v11 = vmul.f32 %v3610_v7, %v626_v2  ;;  %v1087_v60 = vld [vmem:[#allocation14 + $0xdf8] sm:$0xff]  ;;  %v642_v0 = vld [vmem:[#allocation14 + $0x10] sm:$0xff] }
 0x10b   : > { %639 = vst [vmem:[%s4201_s28 + $0x10] sm:$0xff] %v4206_v61  ;;  %1416 = vmatmul.mubr.f32.vlgmr.msra.gmra.mxu1 %v4206_v61  ;;  %v1015_v2 = vld [vmem:[#allocation14 + $0xbb8] sm:$0xff]  ;;  %v1062_v7 = vld [vmem:[#allocation14 + $0xd30] sm:$0xff] }
 0x10c   : > { %1423 = vmatpush1.msra.mxu1 %v822_v62  ;;  %v4211_v15 = vadd.f32 %v632_v5, %v629_v11  ;;  %v643_v62 = vld [vmem:[#allocation14 + $0x18] sm:$0xff]  ;;  %v1050_v11 = vld [vmem:[#allocation14 + $0xcd0] sm:$0xff] }
 0x10d   : > { %1424 = vmatprep.subr.mxu1 %v811_v1  ;;  %v1075_v1 = vld [vmem:[#allocation14 + $0xd98] sm:$0xff] }
 0x10e   : > { %1425 = vmatpush1.msra.mxu1 %v810_v3  ;;  %638 = vst [vmem:[%s4201_s28 + $0x8] sm:$0xff] %v4211_v15  ;;  %1344 = vmatprep.mubr.f32.mxu0 %v4211_v15  ;;  %v1074_v3 = vld [vmem:[#allocation14 + $0xd90] sm:$0xff]  ;;  %v1063_v5 = vld [vmem:[#allocation14 + $0xd38] sm:$0xff] }
 0x10f   : > { %1426 = vmatprep.subr.mxu1 %v799_v4  ;;  %1486 = vmatprep.mubr.f32.mxu1 %v4211_v15  ;;  %v1014_v4 = vld [vmem:[#allocation14 + $0xbb0] sm:$0xff]  ;;  %v1003_v6 = vld [vmem:[#allocation14 + $0xb58] sm:$0xff] }
 0x110   : > { %1427 = vmatpush1.msra.mxu1 %v798_v8  ;;  %v1002_v8 = vld [vmem:[#allocation14 + $0xb50] sm:$0xff] }
 0x111   : > { %1428 = vmatprep.subr.mxu1 %v787_v10  ;;  %v991_v10 = vld [vmem:[#allocation14 + $0xaf8] sm:$0xff] }
 0x112   : > { %v3612_v14 = vpop.eup %3611  ;;  %1429 = vmatpush1.msra.mxu1 %v786_v12  ;;  %v990_v12 = vld [vmem:[#allocation14 + $0xaf0] sm:$0xff] }
 0x113   : > { %v628_v17 = vmul.f32 %v3612_v14, %v625_v9  ;;  %1430 = vmatprep.subr.mxu1 %v775_v16  ;;  %v1051_v9 = vld [vmem:[#allocation14 + $0xcd8] sm:$0xff]  ;;  %v1038_v16 = vld [vmem:[#allocation14 + $0xc70] sm:$0xff] }
 0x114   : > { %1431 = vmatpush1.msra.mxu1 %v774_v18  ;;  %v979_v14 = vld [vmem:[#allocation14 + $0xa98] sm:$0xff] }
 0x115   : > { %v4216_v20 = vadd.f32 %v631_v13, %v628_v17  ;;  %1432 = vmatprep.subr.mxu1 %v763_v19  ;;  %v1039_v13 = vld [vmem:[#allocation14 + $0xc78] sm:$0xff]  ;;  %v978_v17 = vld [vmem:[#allocation14 + $0xa90] sm:$0xff] }
 0x116   : > { %1433 = vmatpush1.msra.mxu1 %v762_v22  ;;  %v1027_v18 = vld [vmem:[#allocation14 + $0xc18] sm:$0xff]  ;;  %v966_v22 = vld [vmem:[#allocation14 + $0xa30] sm:$0xff] }
 0x117   : > { %637 = vst [vmem:[%s4201_s28] sm:$0xff] %v4216_v20  ;;  %1345 = vmatmul.mubr.f32.vlgmr.msra.gmra.mxu0 %v4216_v20  ;;  %1434 = vmatprep.subr.mxu1 %v751_v24  ;;  %v967_v19 = vld [vmem:[#allocation14 + $0xa38] sm:$0xff] }
 0x118   : > { %1494 = vmatpush1.msra.mxu0 %v1206_v21  ;;  %1435 = vmatpush1.msra.mxu1 %v750_v26  ;;  %v1026_v21 = vld [vmem:[#allocation14 + $0xc10] sm:$0xff]  ;;  %v955_v24 = vld [vmem:[#allocation14 + $0x9d8] sm:$0xff] }
 0x119   : > { %1495 = vmatprep.subr.mxu0 %v1195_v23  ;;  %1436 = vmatprep.subr.mxu1 %v739_v28  ;;  %v825_v23 = vld [vmem:[#allocation14 + $0x5c8] sm:$0xff]  ;;  %v954_v26 = vld [vmem:[#allocation14 + $0x9d0] sm:$0xff]  ;;  %v943_v28 = vld [vmem:[#allocation14 + $0x978] sm:$0xff] }
 0x11a   : > { %1496 = vmatpush1.msra.mxu0 %v1194_v25  ;;  %1437 = vmatpush1.msra.mxu1 %v738_v30  ;;  %v824_v25 = vld [vmem:[#allocation14 + $0x5c0] sm:$0xff]  ;;  %v942_v30 = vld [vmem:[#allocation14 + $0x970] sm:$0xff] }
 0x11b   : > { %1497 = vmatprep.subr.mxu0 %v1183_v27  ;;  %1438 = vmatprep.subr.mxu1 %v727_v32  ;;  %v813_v27 = vld [vmem:[#allocation14 + $0x568] sm:$0xff]  ;;  %v931_v32 = vld [vmem:[#allocation14 + $0x918] sm:$0xff] }
 0x11c   : > { %1498 = vmatpush1.msra.mxu0 %v1182_v29  ;;  %1439 = vmatpush1.msra.mxu1 %v726_v35  ;;  %v812_v29 = vld [vmem:[#allocation14 + $0x560] sm:$0xff]  ;;  %v930_v35 = vld [vmem:[#allocation14 + $0x910] sm:$0xff] }
 0x11d   : > { %1499 = vmatprep.subr.mxu0 %v1171_v31  ;;  %1440 = vmatprep.subr.mxu1 %v715_v37  ;;  %v801_v31 = vld [vmem:[#allocation14 + $0x508] sm:$0xff]  ;;  %v919_v37 = vld [vmem:[#allocation14 + $0x8b8] sm:$0xff] }
 0x11e   : > { %1500 = vmatpush1.msra.mxu0 %v1170_v33  ;;  %1441 = vmatpush1.msra.mxu1 %v714_v39  ;;  %v800_v33 = vld [vmem:[#allocation14 + $0x500] sm:$0xff]  ;;  %v918_v39 = vld [vmem:[#allocation14 + $0x8b0] sm:$0xff] }
 0x11f   : > { %1501 = vmatprep.subr.mxu0 %v1159_v36  ;;  %1442 = vmatprep.subr.mxu1 %v703_v41  ;;  %v789_v36 = vld [vmem:[#allocation14 + $0x4a8] sm:$0xff]  ;;  %v907_v41 = vld [vmem:[#allocation14 + $0x858] sm:$0xff] }
 0x120   : > { %1502 = vmatpush1.msra.mxu0 %v1158_v38  ;;  %1443 = vmatpush1.msra.mxu1 %v702_v43  ;;  %v788_v38 = vld [vmem:[#allocation14 + $0x4a0] sm:$0xff]  ;;  %v906_v43 = vld [vmem:[#allocation14 + $0x850] sm:$0xff] }
 0x121   : > { %1503 = vmatprep.subr.mxu0 %v1147_v40  ;;  %1444 = vmatprep.subr.mxu1 %v691_v45  ;;  %v777_v40 = vld [vmem:[#allocation14 + $0x448] sm:$0xff]  ;;  %v895_v45 = vld [vmem:[#allocation14 + $0x7f8] sm:$0xff] }
 0x122   : > { %1504 = vmatpush1.msra.mxu0 %v1146_v42  ;;  %1445 = vmatpush1.msra.mxu1 %v690_v47  ;;  %v776_v42 = vld [vmem:[#allocation14 + $0x440] sm:$0xff]  ;;  %v894_v47 = vld [vmem:[#allocation14 + $0x7f0] sm:$0xff] }
 0x123   : > { %1505 = vmatprep.subr.mxu0 %v1135_v44  ;;  %1446 = vmatprep.subr.mxu1 %v679_v49  ;;  %v765_v44 = vld [vmem:[#allocation14 + $0x3e8] sm:$0xff]  ;;  %v883_v49 = vld [vmem:[#allocation14 + $0x798] sm:$0xff] }
 0x124   : > { %1506 = vmatpush1.msra.mxu0 %v1134_v46  ;;  %1447 = vmatpush1.msra.mxu1 %v678_v51  ;;  %v764_v46 = vld [vmem:[#allocation14 + $0x3e0] sm:$0xff]  ;;  %v882_v51 = vld [vmem:[#allocation14 + $0x790] sm:$0xff] }
 0x125   : > { %1507 = vmatprep.subr.mxu0 %v1123_v48  ;;  %1448 = vmatprep.subr.mxu1 %v667_v53  ;;  %v753_v48 = vld [vmem:[#allocation14 + $0x388] sm:$0xff]  ;;  %v871_v53 = vld [vmem:[#allocation14 + $0x738] sm:$0xff] }
 0x126   : > { %1508 = vmatpush1.msra.mxu0 %v1122_v50  ;;  %1449 = vmatpush1.msra.mxu1 %v666_v55  ;;  %v752_v50 = vld [vmem:[#allocation14 + $0x380] sm:$0xff]  ;;  %v870_v55 = vld [vmem:[#allocation14 + $0x730] sm:$0xff] }
 0x127   : > { %1509 = vmatprep.subr.mxu0 %v1111_v52  ;;  %1450 = vmatprep.subr.mxu1 %v655_v57  ;;  %v741_v52 = vld [vmem:[#allocation14 + $0x328] sm:$0xff]  ;;  %v859_v57 = vld [vmem:[#allocation14 + $0x6d8] sm:$0xff] }
 0x128   : > { %1510 = vmatpush1.msra.mxu0 %v1110_v54  ;;  %1451 = vmatpush1.msra.mxu1 %v654_v59  ;;  %v740_v54 = vld [vmem:[#allocation14 + $0x320] sm:$0xff]  ;;  %v858_v59 = vld [vmem:[#allocation14 + $0x6d0] sm:$0xff] }
 0x129   : > { %1511 = vmatprep.subr.mxu0 %v1099_v56  ;;  %1452 = vmatprep.subr.mxu1 %v643_v62  ;;  %v729_v56 = vld [vmem:[#allocation14 + $0x2c8] sm:$0xff]  ;;  %v847_v62 = vld [vmem:[#allocation14 + $0x678] sm:$0xff] }
 0x12a   : > { %1512 = vmatpush1.msra.mxu0 %v1098_v58  ;;  %1453 = vmatpush1.msra.mxu1 %v642_v0  ;;  %v728_v58 = vld [vmem:[#allocation14 + $0x2c0] sm:$0xff]  ;;  %v846_v0 = vld [vmem:[#allocation14 + $0x670] sm:$0xff] }
 0x12b   : > { %1513 = vmatprep.subr.mxu0 %v1087_v60  ;;  %1454 = vmatprep.subr.mxu1 %v1015_v2  ;;  %v717_v60 = vld [vmem:[#allocation14 + $0x268] sm:$0xff]  ;;  %v835_v2 = vld [vmem:[#allocation14 + $0x618] sm:$0xff] }
 0x12c   : > { %1514 = vmatpush1.msra.mxu0 %v1086_v63  ;;  %1455 = vmatpush2.msra.mxu1 %v1014_v4  ;;  %v716_v63 = vld [vmem:[#allocation14 + $0x260] sm:$0xff]  ;;  %v834_v4 = vld [vmem:[#allocation14 + $0x610] sm:$0xff] }
 0x12d   : > { %1515 = vmatprep.subr.mxu0 %v1075_v1  ;;  %1456 = vmatprep.subr.mxu1 %v1003_v6  ;;  %v705_v1 = vld [vmem:[#allocation14 + $0x208] sm:$0xff]  ;;  %v692_v6 = vld [vmem:[#allocation14 + $0x1a0] sm:$0xff] }
 0x12e   : > { %1516 = vmatpush1.msra.mxu0 %v1074_v3  ;;  %1457 = vmatpush2.msra.mxu1 %v1002_v8  ;;  %v704_v3 = vld [vmem:[#allocation14 + $0x200] sm:$0xff]  ;;  %v681_v8 = vld [vmem:[#allocation14 + $0x148] sm:$0xff] }
 0x12f   : > { %1517 = vmatprep.subr.mxu0 %v1063_v5  ;;  %1458 = vmatprep.subr.mxu1 %v991_v10  ;;  %v693_v5 = vld [vmem:[#allocation14 + $0x1a8] sm:$0xff]  ;;  %v680_v10 = vld [vmem:[#allocation14 + $0x140] sm:$0xff] }
 0x130   : > { %1518 = vmatpush1.msra.mxu0 %v1062_v7  ;;  %1459 = vmatpush2.msra.mxu1 %v990_v12  ;;  %v1209_v7 = vld [vmem:[#allocation14 + $0x11c8] sm:$0xff] }
 0x131   : > { %1519 = vmatprep.subr.mxu0 %v1051_v9  ;;  %1460 = vmatprep.subr.mxu1 %v979_v14  ;;  %v1208_v9 = vld [vmem:[#allocation14 + $0x11c0] sm:$0xff]  ;;  %v669_v12 = vld [vmem:[#allocation14 + $0xe8] sm:$0xff] }
 0x132   : > { %1520 = vmatpush1.msra.mxu0 %v1050_v11  ;;  %1461 = vmatpush2.msra.mxu1 %v978_v17  ;;  %v1197_v11 = vld [vmem:[#allocation14 + $0x1168] sm:$0xff]  ;;  %v668_v14 = vld [vmem:[#allocation14 + $0xe0] sm:$0xff] }
 0x133   : > { %1521 = vmatprep.subr.mxu0 %v1039_v13  ;;  %1462 = vmatprep.subr.mxu1 %v967_v19  ;;  %v1196_v13 = vld [vmem:[#allocation14 + $0x1160] sm:$0xff]  ;;  %v657_v17 = vld [vmem:[#allocation14 + $0x88] sm:$0xff] }
 0x134   : > { %1522 = vmatpush1.msra.mxu0 %v1038_v16  ;;  %1557 = vmatprep.mubr.f32.mxu0 %v3980_v34  ;;  %v1185_v16 = vld [vmem:[#allocation14 + $0x1108] sm:$0xff]  ;;  %v656_v19 = vld [vmem:[#allocation14 + $0x80] sm:$0xff] }
 0x135   : > { %1523 = vmatprep.subr.mxu0 %v1027_v18  ;;  %1463 = vmatpush2.msra.mxu1 %v966_v22  ;;  %v1184_v18 = vld [vmem:[#allocation14 + $0x1100] sm:$0xff]  ;;  %v645_v22 = vld [vmem:[#allocation14 + $0x28] sm:$0xff] }
 0x136   : > { %1524 = vmatpush1.msra.mxu0 %v1026_v21  ;;  %1464 = vmatprep.subr.mxu1 %v955_v24  ;;  %v1173_v21 = vld [vmem:[#allocation14 + $0x10a8] sm:$0xff]  ;;  %v644_v24 = vld [vmem:[#allocation14 + $0x20] sm:$0xff] }
 0x137   : > { %1558 = vmatmul.mubr.f32.vlgmr.msra.gmra.mxu0 %v4206_v61  ;;  %1564 = vmatprep.subr.mxu0 %v825_v23  ;;  %v1172_v23 = vld [vmem:[#allocation14 + $0x10a0] sm:$0xff] }
 0x138   : > { %1565 = vmatpush1.msra.mxu0 %v824_v25  ;;  %1465 = vmatpush2.msra.mxu1 %v954_v26  ;;  %v1161_v25 = vld [vmem:[#allocation14 + $0x1048] sm:$0xff] }
 0x139   : > { %1566 = vmatprep.subr.mxu0 %v813_v27  ;;  %1466 = vmatprep.subr.mxu1 %v943_v28  ;;  %v1017_v26 = vld [vmem:[#allocation14 + $0xbc8] sm:$0xff]  ;;  %v1160_v27 = vld [vmem:[#allocation14 + $0x1040] sm:$0xff] }
 0x13a   : > { %1567 = vmatpush1.msra.mxu0 %v812_v29  ;;  %1467 = vmatpush2.msra.mxu1 %v942_v30  ;;  %v1016_v28 = vld [vmem:[#allocation14 + $0xbc0] sm:$0xff]  ;;  %v1149_v29 = vld [vmem:[#allocation14 + $0xfe8] sm:$0xff] }
 0x13b   : > { %1568 = vmatprep.subr.mxu0 %v801_v31  ;;  %1468 = vmatprep.subr.mxu1 %v931_v32  ;;  %v1005_v30 = vld [vmem:[#allocation14 + $0xb68] sm:$0xff]  ;;  %v1148_v31 = vld [vmem:[#allocation14 + $0xfe0] sm:$0xff] }
 0x13c   : > { %1569 = vmatpush1.msra.mxu0 %v800_v33  ;;  %1469 = vmatpush2.msra.mxu1 %v930_v35  ;;  %v1004_v32 = vld [vmem:[#allocation14 + $0xb60] sm:$0xff]  ;;  %v1137_v33 = vld [vmem:[#allocation14 + $0xf88] sm:$0xff] }
 0x13d   : > { %1570 = vmatprep.subr.mxu0 %v789_v36  ;;  %1470 = vmatprep.subr.mxu1 %v919_v37  ;;  %v993_v35 = vld [vmem:[#allocation14 + $0xb08] sm:$0xff]  ;;  %v1136_v36 = vld [vmem:[#allocation14 + $0xf80] sm:$0xff] }
 0x13e   : > { %1571 = vmatpush1.msra.mxu0 %v788_v38  ;;  %1471 = vmatpush2.msra.mxu1 %v918_v39  ;;  %v992_v37 = vld [vmem:[#allocation14 + $0xb00] sm:$0xff]  ;;  %v1125_v38 = vld [vmem:[#allocation14 + $0xf28] sm:$0xff] }
 0x13f   : > { %1572 = vmatprep.subr.mxu0 %v777_v40  ;;  %1472 = vmatprep.subr.mxu1 %v907_v41  ;;  %v981_v39 = vld [vmem:[#allocation14 + $0xaa8] sm:$0xff]  ;;  %v1124_v40 = vld [vmem:[#allocation14 + $0xf20] sm:$0xff] }
 0x140   : > { %1573 = vmatpush1.msra.mxu0 %v776_v42  ;;  %1473 = vmatpush2.msra.mxu1 %v906_v43  ;;  %v980_v41 = vld [vmem:[#allocation14 + $0xaa0] sm:$0xff]  ;;  %v1113_v42 = vld [vmem:[#allocation14 + $0xec8] sm:$0xff] }
 0x141   : > { %1574 = vmatprep.subr.mxu0 %v765_v44  ;;  %1474 = vmatprep.subr.mxu1 %v895_v45  ;;  %v969_v43 = vld [vmem:[#allocation14 + $0xa48] sm:$0xff]  ;;  %v1112_v44 = vld [vmem:[#allocation14 + $0xec0] sm:$0xff] }
 0x142   : > { %1575 = vmatpush1.msra.mxu0 %v764_v46  ;;  %1475 = vmatpush2.msra.mxu1 %v894_v47  ;;  %v968_v45 = vld [vmem:[#allocation14 + $0xa40] sm:$0xff]  ;;  %v1101_v46 = vld [vmem:[#allocation14 + $0xe68] sm:$0xff] }
 0x143   : > { %1576 = vmatprep.subr.mxu0 %v753_v48  ;;  %1476 = vmatprep.subr.mxu1 %v883_v49  ;;  %v957_v47 = vld [vmem:[#allocation14 + $0x9e8] sm:$0xff]  ;;  %v1100_v48 = vld [vmem:[#allocation14 + $0xe60] sm:$0xff] }
 0x144   : > { %1577 = vmatpush1.msra.mxu0 %v752_v50  ;;  %1477 = vmatpush2.msra.mxu1 %v882_v51  ;;  %v956_v49 = vld [vmem:[#allocation14 + $0x9e0] sm:$0xff]  ;;  %v1089_v50 = vld [vmem:[#allocation14 + $0xe08] sm:$0xff] }
 0x145   : > { %1578 = vmatprep.subr.mxu0 %v741_v52  ;;  %1478 = vmatprep.subr.mxu1 %v871_v53  ;;  %v945_v51 = vld [vmem:[#allocation14 + $0x988] sm:$0xff]  ;;  %v1088_v52 = vld [vmem:[#allocation14 + $0xe00] sm:$0xff] }
 0x146   : > { %1579 = vmatpush1.msra.mxu0 %v740_v54  ;;  %1479 = vmatpush2.msra.mxu1 %v870_v55  ;;  %v944_v53 = vld [vmem:[#allocation14 + $0x980] sm:$0xff]  ;;  %v1077_v54 = vld [vmem:[#allocation14 + $0xda8] sm:$0xff] }
 0x147   : > { %1580 = vmatprep.subr.mxu0 %v729_v56  ;;  %1480 = vmatprep.subr.mxu1 %v859_v57  ;;  %v933_v55 = vld [vmem:[#allocation14 + $0x928] sm:$0xff]  ;;  %v1076_v56 = vld [vmem:[#allocation14 + $0xda0] sm:$0xff] }
 0x148   : > { %1581 = vmatpush1.msra.mxu0 %v728_v58  ;;  %1481 = vmatpush2.msra.mxu1 %v858_v59  ;;  %v932_v57 = vld [vmem:[#allocation14 + $0x920] sm:$0xff]  ;;  %v1065_v58 = vld [vmem:[#allocation14 + $0xd48] sm:$0xff] }
 0x149   : > { %1582 = vmatprep.subr.mxu0 %v717_v60  ;;  %1482 = vmatprep.subr.mxu1 %v847_v62  ;;  %v921_v59 = vld [vmem:[#allocation14 + $0x8c8] sm:$0xff]  ;;  %v1064_v60 = vld [vmem:[#allocation14 + $0xd40] sm:$0xff] }
 0x14a   : > { %1583 = vmatpush1.msra.mxu0 %v716_v63  ;;  %1483 = vmatpush2.msra.mxu1 %v846_v0  ;;  %v920_v62 = vld [vmem:[#allocation14 + $0x8c0] sm:$0xff]  ;;  %v1053_v63 = vld [vmem:[#allocation14 + $0xce8] sm:$0xff] }
 0x14b   : > { %1584 = vmatprep.subr.mxu0 %v705_v1  ;;  %1484 = vmatprep.subr.mxu1 %v835_v2  ;;  %v909_v0 = vld [vmem:[#allocation14 + $0x868] sm:$0xff]  ;;  %v1052_v1 = vld [vmem:[#allocation14 + $0xce0] sm:$0xff] }
 0x14c   : > { %1585 = vmatpush1.msra.mxu0 %v704_v3  ;;  %1485 = vmatpush2.msra.mxu1 %v834_v4  ;;  %v908_v2 = vld [vmem:[#allocation14 + $0x860] sm:$0xff]  ;;  %v1041_v3 = vld [vmem:[#allocation14 + $0xc88] sm:$0xff] }
 0x14d   : > { %1586 = vmatprep.subr.mxu0 %v693_v5  ;;  %1487 = vmatmul.mubr.f32.vlgmr.msra.gmra.mxu1 %v4216_v20  ;;  %v897_v4 = vld [vmem:[#allocation14 + $0x808] sm:$0xff]  ;;  %v1040_v5 = vld [vmem:[#allocation14 + $0xc80] sm:$0xff] }
 0x14e   : > { %1587 = vmatpush1.msra.mxu0 %v692_v6  ;;  %1635 = vmatprep.subr.mxu1 %v1209_v7  ;;  %v896_v6 = vld [vmem:[#allocation14 + $0x800] sm:$0xff]  ;;  %v1029_v7 = vld [vmem:[#allocation14 + $0xc28] sm:$0xff] }
 0x14f   : > { %1588 = vmatprep.subr.mxu0 %v681_v8  ;;  %1636 = vmatpush1.msra.mxu1 %v1208_v9  ;;  %v885_v8 = vld [vmem:[#allocation14 + $0x7a8] sm:$0xff]  ;;  %v1028_v9 = vld [vmem:[#allocation14 + $0xc20] sm:$0xff] }
 0x150   : > { %1589 = vmatpush1.msra.mxu0 %v680_v10  ;;  %1637 = vmatprep.subr.mxu1 %v1197_v11  ;;  %v884_v10 = vld [vmem:[#allocation14 + $0x7a0] sm:$0xff]  ;;  %v827_v11 = vld [vmem:[#allocation14 + $0x5d8] sm:$0xff] }
 0x151   : > { %1590 = vmatprep.subr.mxu0 %v669_v12  ;;  %1638 = vmatpush1.msra.mxu1 %v1196_v13  ;;  %v873_v12 = vld [vmem:[#allocation14 + $0x748] sm:$0xff]  ;;  %v872_v13 = vld [vmem:[#allocation14 + $0x740] sm:$0xff] }
 0x152   : > { %1591 = vmatpush1.msra.mxu0 %v668_v14  ;;  %1639 = vmatprep.subr.mxu1 %v1185_v16  ;;  %v826_v14 = vld [vmem:[#allocation14 + $0x5d0] sm:$0xff]  ;;  %v861_v16 = vld [vmem:[#allocation14 + $0x6e8] sm:$0xff] }
 0x153   : > { %1592 = vmatprep.subr.mxu0 %v657_v17  ;;  %1640 = vmatpush1.msra.mxu1 %v1184_v18  ;;  %v815_v17 = vld [vmem:[#allocation14 + $0x578] sm:$0xff]  ;;  %v860_v18 = vld [vmem:[#allocation14 + $0x6e0] sm:$0xff] }
 0x154   : > { %1593 = vmatpush1.msra.mxu0 %v656_v19  ;;  %1641 = vmatprep.subr.mxu1 %v1173_v21  ;;  %v814_v19 = vld [vmem:[#allocation14 + $0x570] sm:$0xff]  ;;  %v849_v21 = vld [vmem:[#allocation14 + $0x688] sm:$0xff] }
 0x155   : > { %1594 = vmatprep.subr.mxu0 %v645_v22  ;;  %1642 = vmatpush1.msra.mxu1 %v1172_v23  ;;  %v803_v22 = vld [vmem:[#allocation14 + $0x518] sm:$0xff]  ;;  %v848_v23 = vld [vmem:[#allocation14 + $0x680] sm:$0xff] }
 0x156   : > { %1595 = vmatpush1.msra.mxu0 %v644_v24  ;;  %1643 = vmatprep.subr.mxu1 %v1161_v25  ;;  %v802_v24 = vld [vmem:[#allocation14 + $0x510] sm:$0xff]  ;;  %v837_v25 = vld [vmem:[#allocation14 + $0x628] sm:$0xff] }
 0x157   : > { %1596 = vmatprep.subr.mxu0 %v1017_v26  ;;  %1644 = vmatpush1.msra.mxu1 %v1160_v27  ;;  %v791_v26 = vld [vmem:[#allocation14 + $0x4b8] sm:$0xff]  ;;  %v836_v27 = vld [vmem:[#allocation14 + $0x620] sm:$0xff] }
 0x158   : > { %1597 = vmatpush2.msra.mxu0 %v1016_v28  ;;  %1645 = vmatprep.subr.mxu1 %v1149_v29  ;;  %v790_v28 = vld [vmem:[#allocation14 + $0x4b0] sm:$0xff]  ;;  %v779_v29 = vld [vmem:[#allocation14 + $0x458] sm:$0xff] }
 0x159   : > { %1598 = vmatprep.subr.mxu0 %v1005_v30  ;;  %1646 = vmatpush1.msra.mxu1 %v1148_v31  ;;  %v778_v30 = vld [vmem:[#allocation14 + $0x450] sm:$0xff]  ;;  %v1211_v31 = vld [vmem:[#allocation14 + $0x11d8] sm:$0xff] }
 0x15a   : > { %1599 = vmatpush2.msra.mxu0 %v1004_v32  ;;  %1647 = vmatprep.subr.mxu1 %v1137_v33  ;;  %v767_v32 = vld [vmem:[#allocation14 + $0x3f8] sm:$0xff]  ;;  %v1210_v33 = vld [vmem:[#allocation14 + $0x11d0] sm:$0xff] }
 0x15b   : > { %1600 = vmatprep.subr.mxu0 %v993_v35  ;;  %1648 = vmatpush1.msra.mxu1 %v1136_v36  ;;  %v766_v35 = vld [vmem:[#allocation14 + $0x3f0] sm:$0xff]  ;;  %v1199_v36 = vld [vmem:[#allocation14 + $0x1178] sm:$0xff] }
 0x15c   : > { %1601 = vmatpush2.msra.mxu0 %v992_v37  ;;  %1649 = vmatprep.subr.mxu1 %v1125_v38  ;;  %v755_v37 = vld [vmem:[#allocation14 + $0x398] sm:$0xff]  ;;  %v1198_v38 = vld [vmem:[#allocation14 + $0x1170] sm:$0xff] }
 0x15d   : > { %1602 = vmatprep.subr.mxu0 %v981_v39  ;;  %1650 = vmatpush1.msra.mxu1 %v1124_v40  ;;  %v754_v39 = vld [vmem:[#allocation14 + $0x390] sm:$0xff]  ;;  %v1187_v40 = vld [vmem:[#allocation14 + $0x1118] sm:$0xff] }
 0x15e   : > { %1603 = vmatpush2.msra.mxu0 %v980_v41  ;;  %1651 = vmatprep.subr.mxu1 %v1113_v42  ;;  %v743_v41 = vld [vmem:[#allocation14 + $0x338] sm:$0xff]  ;;  %v1186_v42 = vld [vmem:[#allocation14 + $0x1110] sm:$0xff] }
 0x15f   : > { %1604 = vmatprep.subr.mxu0 %v969_v43  ;;  %1652 = vmatpush1.msra.mxu1 %v1112_v44  ;;  %v742_v43 = vld [vmem:[#allocation14 + $0x330] sm:$0xff]  ;;  %v1175_v44 = vld [vmem:[#allocation14 + $0x10b8] sm:$0xff] }
 0x160   : > { %1605 = vmatpush2.msra.mxu0 %v968_v45  ;;  %1653 = vmatprep.subr.mxu1 %v1101_v46  ;;  %v731_v45 = vld [vmem:[#allocation14 + $0x2d8] sm:$0xff]  ;;  %v1174_v46 = vld [vmem:[#allocation14 + $0x10b0] sm:$0xff] }
 0x161   : > { %1606 = vmatprep.subr.mxu0 %v957_v47  ;;  %1654 = vmatpush1.msra.mxu1 %v1100_v48  ;;  %v730_v47 = vld [vmem:[#allocation14 + $0x2d0] sm:$0xff]  ;;  %v1163_v48 = vld [vmem:[#allocation14 + $0x1058] sm:$0xff] }
 0x162   : > { %1607 = vmatpush2.msra.mxu0 %v956_v49  ;;  %1655 = vmatprep.subr.mxu1 %v1089_v50  ;;  %v719_v49 = vld [vmem:[#allocation14 + $0x278] sm:$0xff]  ;;  %v1162_v50 = vld [vmem:[#allocation14 + $0x1050] sm:$0xff] }
 0x163   : > { %1608 = vmatprep.subr.mxu0 %v945_v51  ;;  %1656 = vmatpush1.msra.mxu1 %v1088_v52  ;;  %v718_v51 = vld [vmem:[#allocation14 + $0x270] sm:$0xff]  ;;  %v1151_v52 = vld [vmem:[#allocation14 + $0xff8] sm:$0xff] }
 0x164   : > { %1609 = vmatpush2.msra.mxu0 %v944_v53  ;;  %1657 = vmatprep.subr.mxu1 %v1077_v54  ;;  %v707_v53 = vld [vmem:[#allocation14 + $0x218] sm:$0xff]  ;;  %v1150_v54 = vld [vmem:[#allocation14 + $0xff0] sm:$0xff] }
 0x165   : > { %1610 = vmatprep.subr.mxu0 %v933_v55  ;;  %1658 = vmatpush1.msra.mxu1 %v1076_v56  ;;  %v706_v55 = vld [vmem:[#allocation14 + $0x210] sm:$0xff]  ;;  %v1139_v56 = vld [vmem:[#allocation14 + $0xf98] sm:$0xff] }
 0x166   : > { %1611 = vmatpush2.msra.mxu0 %v932_v57  ;;  %1659 = vmatprep.subr.mxu1 %v1065_v58  ;;  %v695_v57 = vld [vmem:[#allocation14 + $0x1b8] sm:$0xff]  ;;  %v1138_v58 = vld [vmem:[#allocation14 + $0xf90] sm:$0xff] }
 0x167   : > { %1612 = vmatprep.subr.mxu0 %v921_v59  ;;  %1660 = vmatpush1.msra.mxu1 %v1064_v60  ;;  %v694_v59 = vld [vmem:[#allocation14 + $0x1b0] sm:$0xff]  ;;  %v1127_v60 = vld [vmem:[#allocation14 + $0xf38] sm:$0xff] }
 0x168   : > { %1613 = vmatpush2.msra.mxu0 %v920_v62  ;;  %1661 = vmatprep.subr.mxu1 %v1053_v63  ;;  %v683_v62 = vld [vmem:[#allocation14 + $0x158] sm:$0xff]  ;;  %v1126_v63 = vld [vmem:[#allocation14 + $0xf30] sm:$0xff] }
 0x169   : > { %1614 = vmatprep.subr.mxu0 %v909_v0  ;;  %1662 = vmatpush1.msra.mxu1 %v1052_v1  ;;  %v682_v0 = vld [vmem:[#allocation14 + $0x150] sm:$0xff]  ;;  %v1115_v1 = vld [vmem:[#allocation14 + $0xed8] sm:$0xff] }
 0x16a   : > { %1615 = vmatpush2.msra.mxu0 %v908_v2  ;;  %1663 = vmatprep.subr.mxu1 %v1041_v3  ;;  %v671_v2 = vld [vmem:[#allocation14 + $0xf8] sm:$0xff]  ;;  %v1114_v3 = vld [vmem:[#allocation14 + $0xed0] sm:$0xff] }
 0x16b   : > { %1616 = vmatprep.subr.mxu0 %v897_v4  ;;  %1664 = vmatpush1.msra.mxu1 %v1040_v5  ;;  %v670_v4 = vld [vmem:[#allocation14 + $0xf0] sm:$0xff]  ;;  %v1103_v5 = vld [vmem:[#allocation14 + $0xe78] sm:$0xff] }
 0x16c   : > { %1617 = vmatpush2.msra.mxu0 %v896_v6  ;;  %1665 = vmatprep.subr.mxu1 %v1029_v7  ;;  %v659_v6 = vld [vmem:[#allocation14 + $0x98] sm:$0xff]  ;;  %v1102_v7 = vld [vmem:[#allocation14 + $0xe70] sm:$0xff] }
 0x16d   : > { %1618 = vmatprep.subr.mxu0 %v885_v8  ;;  %1666 = vmatpush1.msra.mxu1 %v1028_v9  ;;  %v658_v8 = vld [vmem:[#allocation14 + $0x90] sm:$0xff]  ;;  %v1091_v9 = vld [vmem:[#allocation14 + $0xe18] sm:$0xff] }
 0x16e   : > { %1619 = vmatpush2.msra.mxu0 %v884_v10  ;;  %1699 = vmatprep.mubr.f32.mxu1 %v3980_v34  ;;  %v647_v10 = vld [vmem:[#allocation14 + $0x38] sm:$0xff] }
 0x16f   : > { %1706 = vmatprep.subr.mxu1 %v827_v11  ;;  %1620 = vmatprep.subr.mxu0 %v873_v12  ;;  %v1090_v11 = vld [vmem:[#allocation14 + $0xe10] sm:$0xff] }
 0x170   : > { %1700 = vmatmul.mubr.f32.vlgmr.msra.gmra.mxu1 %v4206_v61  ;;  %1621 = vmatpush2.msra.mxu0 %v872_v13  ;;  %v646_v12 = vld [vmem:[#allocation14 + $0x30] sm:$0xff]  ;;  %v1079_v13 = vld [vmem:[#allocation14 + $0xdb8] sm:$0xff] }
 0x171   : > { %1707 = vmatpush1.msra.mxu1 %v826_v14  ;;  %1622 = vmatprep.subr.mxu0 %v861_v16  ;;  %v1019_v14 = vld [vmem:[#allocation14 + $0xbd8] sm:$0xff]  ;;  %v1078_v16 = vld [vmem:[#allocation14 + $0xdb0] sm:$0xff] }
 0x172   : > { %1708 = vmatprep.subr.mxu1 %v815_v17  ;;  %1623 = vmatpush2.msra.mxu0 %v860_v18  ;;  %v1018_v17 = vld [vmem:[#allocation14 + $0xbd0] sm:$0xff]  ;;  %v1067_v18 = vld [vmem:[#allocation14 + $0xd58] sm:$0xff] }
 0x173   : > { %1709 = vmatpush1.msra.mxu1 %v814_v19  ;;  %1624 = vmatprep.subr.mxu0 %v849_v21  ;;  %v1007_v19 = vld [vmem:[#allocation14 + $0xb78] sm:$0xff]  ;;  %v1066_v21 = vld [vmem:[#allocation14 + $0xd50] sm:$0xff] }
 0x174   : > { %1710 = vmatprep.subr.mxu1 %v803_v22  ;;  %1625 = vmatpush2.msra.mxu0 %v848_v23  ;;  %v1006_v22 = vld [vmem:[#allocation14 + $0xb70] sm:$0xff]  ;;  %v1055_v23 = vld [vmem:[#allocation14 + $0xcf8] sm:$0xff] }
 0x175   : > { %1711 = vmatpush1.msra.mxu1 %v802_v24  ;;  %1626 = vmatprep.subr.mxu0 %v837_v25  ;;  %v995_v24 = vld [vmem:[#allocation14 + $0xb18] sm:$0xff]  ;;  %v1054_v25 = vld [vmem:[#allocation14 + $0xcf0] sm:$0xff] }
 0x176   : > { %1712 = vmatprep.subr.mxu1 %v791_v26  ;;  %1627 = vmatpush2.msra.mxu0 %v836_v27  ;;  %v994_v26 = vld [vmem:[#allocation14 + $0xb10] sm:$0xff]  ;;  %v1043_v27 = vld [vmem:[#allocation14 + $0xc98] sm:$0xff] }
 0x177   : > { %1713 = vmatpush1.msra.mxu1 %v790_v28  ;;  %1628 = vmatprep.mubr.f32.mxu0 %v4211_v15  ;;  %v983_v28 = vld [vmem:[#allocation14 + $0xab8] sm:$0xff] }
 0x178   : > { %1714 = vmatprep.subr.mxu1 %v779_v29  ;;  %1629 = vmatmul.mubr.f32.vlgmr.msra.gmra.mxu0 %v4216_v20  ;;  %v1042_v29 = vld [vmem:[#allocation14 + $0xc90] sm:$0xff] }
 0x179   : > { %1715 = vmatpush1.msra.mxu1 %v778_v30  ;;  %1777 = vmatprep.subr.mxu0 %v1211_v31  ;;  %v982_v30 = vld [vmem:[#allocation14 + $0xab0] sm:$0xff]  ;;  %v1031_v31 = vld [vmem:[#allocation14 + $0xc38] sm:$0xff] }
 0x17a   : > { %1716 = vmatprep.subr.mxu1 %v767_v32  ;;  %1778 = vmatpush1.msra.mxu0 %v1210_v33  ;;  %v971_v32 = vld [vmem:[#allocation14 + $0xa58] sm:$0xff]  ;;  %v1030_v33 = vld [vmem:[#allocation14 + $0xc30] sm:$0xff] }
 0x17b   : > { %1717 = vmatpush1.msra.mxu1 %v766_v35  ;;  %1779 = vmatprep.subr.mxu0 %v1199_v36  ;;  %v970_v35 = vld [vmem:[#allocation14 + $0xa50] sm:$0xff]  ;;  %v829_v36 = vld [vmem:[#allocation14 + $0x5e8] sm:$0xff] }
 0x17c   : > { %1718 = vmatprep.subr.mxu1 %v755_v37  ;;  %1780 = vmatpush1.msra.mxu0 %v1198_v38  ;;  %v959_v37 = vld [vmem:[#allocation14 + $0x9f8] sm:$0xff]  ;;  %v828_v38 = vld [vmem:[#allocation14 + $0x5e0] sm:$0xff] }
 0x17d   : > { %1719 = vmatpush1.msra.mxu1 %v754_v39  ;;  %1781 = vmatprep.subr.mxu0 %v1187_v40  ;;  %v958_v39 = vld [vmem:[#allocation14 + $0x9f0] sm:$0xff]  ;;  %v817_v40 = vld [vmem:[#allocation14 + $0x588] sm:$0xff] }
 0x17e   : > { %1720 = vmatprep.subr.mxu1 %v743_v41  ;;  %1782 = vmatpush1.msra.mxu0 %v1186_v42  ;;  %v4231_v41 = vld [vmem:[%s4201_s28 + $0x10] sm:$0xff] }
 0x17f   : > { %1721 = vmatpush1.msra.mxu1 %v742_v43  ;;  %1783 = vmatprep.subr.mxu0 %v1175_v44  ;;  %v947_v42 = vld [vmem:[#allocation14 + $0x998] sm:$0xff]  ;;  %v816_v43 = vld [vmem:[#allocation14 + $0x580] sm:$0xff]  ;;  %v946_v44 = vld [vmem:[#allocation14 + $0x990] sm:$0xff] }
 0x180   : > { %1722 = vmatprep.subr.mxu1 %v731_v45  ;;  %1784 = vmatpush1.msra.mxu0 %v1174_v46  ;;  %v805_v45 = vld [vmem:[#allocation14 + $0x528] sm:$0xff]  ;;  %v935_v46 = vld [vmem:[#allocation14 + $0x938] sm:$0xff] }
 0x181   : > { %1723 = vmatpush1.msra.mxu1 %v730_v47  ;;  %1785 = vmatprep.subr.mxu0 %v1163_v48  ;;  %v804_v47 = vld [vmem:[#allocation14 + $0x520] sm:$0xff]  ;;  %v934_v48 = vld [vmem:[#allocation14 + $0x930] sm:$0xff] }
 0x182   : > { %1724 = vmatprep.subr.mxu1 %v719_v49  ;;  %1786 = vmatpush1.msra.mxu0 %v1162_v50  ;;  %v793_v49 = vld [vmem:[#allocation14 + $0x4c8] sm:$0xff]  ;;  %v923_v50 = vld [vmem:[#allocation14 + $0x8d8] sm:$0xff] }
 0x183   : > { %1725 = vmatpush1.msra.mxu1 %v718_v51  ;;  %1787 = vmatprep.subr.mxu0 %v1151_v52  ;;  %v792_v51 = vld [vmem:[#allocation14 + $0x4c0] sm:$0xff]  ;;  %v922_v52 = vld [vmem:[#allocation14 + $0x8d0] sm:$0xff] }
 0x184   : > { %1726 = vmatprep.subr.mxu1 %v707_v53  ;;  %1788 = vmatpush1.msra.mxu0 %v1150_v54  ;;  %v781_v53 = vld [vmem:[#allocation14 + $0x468] sm:$0xff]  ;;  %v911_v54 = vld [vmem:[#allocation14 + $0x878] sm:$0xff] }
 0x185   : > { %1727 = vmatpush1.msra.mxu1 %v706_v55  ;;  %1789 = vmatprep.subr.mxu0 %v1139_v56  ;;  %v780_v55 = vld [vmem:[#allocation14 + $0x460] sm:$0xff]  ;;  %v910_v56 = vld [vmem:[#allocation14 + $0x870] sm:$0xff] }
 0x186   : > { %1728 = vmatprep.subr.mxu1 %v695_v57  ;;  %1790 = vmatpush1.msra.mxu0 %v1138_v58  ;;  %v769_v57 = vld [vmem:[#allocation14 + $0x408] sm:$0xff]  ;;  %v899_v58 = vld [vmem:[#allocation14 + $0x818] sm:$0xff] }
 0x187   : > { %1729 = vmatpush1.msra.mxu1 %v694_v59  ;;  %1791 = vmatprep.subr.mxu0 %v1127_v60  ;;  %v768_v59 = vld [vmem:[#allocation14 + $0x400] sm:$0xff]  ;;  %v898_v60 = vld [vmem:[#allocation14 + $0x810] sm:$0xff] }
 0x188   : > { %1730 = vmatprep.subr.mxu1 %v683_v62  ;;  %1792 = vmatpush1.msra.mxu0 %v1126_v63  ;;  %v757_v62 = vld [vmem:[#allocation14 + $0x3a8] sm:$0xff]  ;;  %v887_v63 = vld [vmem:[#allocation14 + $0x7b8] sm:$0xff] }
 0x189   : > { %1731 = vmatpush1.msra.mxu1 %v682_v0  ;;  %1793 = vmatprep.subr.mxu0 %v1115_v1  ;;  %v756_v0 = vld [vmem:[#allocation14 + $0x3a0] sm:$0xff]  ;;  %v886_v1 = vld [vmem:[#allocation14 + $0x7b0] sm:$0xff] }
 0x18a   : > { %1732 = vmatprep.subr.mxu1 %v671_v2  ;;  %1794 = vmatpush1.msra.mxu0 %v1114_v3  ;;  %v745_v2 = vld [vmem:[#allocation14 + $0x348] sm:$0xff]  ;;  %v875_v3 = vld [vmem:[#allocation14 + $0x758] sm:$0xff] }
 0x18b   : > { %1733 = vmatpush1.msra.mxu1 %v670_v4  ;;  %1795 = vmatprep.subr.mxu0 %v1103_v5  ;;  %v744_v4 = vld [vmem:[#allocation14 + $0x340] sm:$0xff]  ;;  %v874_v5 = vld [vmem:[#allocation14 + $0x750] sm:$0xff] }
 0x18c   : > { %1734 = vmatprep.subr.mxu1 %v659_v6  ;;  %1796 = vmatpush1.msra.mxu0 %v1102_v7  ;;  %v733_v6 = vld [vmem:[#allocation14 + $0x2e8] sm:$0xff]  ;;  %v863_v7 = vld [vmem:[#allocation14 + $0x6f8] sm:$0xff] }
 0x18d   : > { %1735 = vmatpush1.msra.mxu1 %v658_v8  ;;  %1797 = vmatprep.subr.mxu0 %v1091_v9  ;;  %v732_v8 = vld [vmem:[#allocation14 + $0x2e0] sm:$0xff]  ;;  %v862_v9 = vld [vmem:[#allocation14 + $0x6f0] sm:$0xff] }
 0x18e   : > { %1736 = vmatprep.subr.mxu1 %v647_v10  ;;  %1798 = vmatpush1.msra.mxu0 %v1090_v11  ;;  %v721_v10 = vld [vmem:[#allocation14 + $0x288] sm:$0xff]  ;;  %v851_v11 = vld [vmem:[#allocation14 + $0x698] sm:$0xff] }
 0x18f   : > { %1737 = vmatpush1.msra.mxu1 %v646_v12  ;;  %1799 = vmatprep.subr.mxu0 %v1079_v13  ;;  %v720_v12 = vld [vmem:[#allocation14 + $0x280] sm:$0xff]  ;;  %v850_v13 = vld [vmem:[#allocation14 + $0x690] sm:$0xff] }
 0x190   : > { %1738 = vmatprep.subr.mxu1 %v1019_v14  ;;  %1800 = vmatpush1.msra.mxu0 %v1078_v16  ;;  %v709_v14 = vld [vmem:[#allocation14 + $0x228] sm:$0xff]  ;;  %v839_v16 = vld [vmem:[#allocation14 + $0x638] sm:$0xff] }
 0x191   : > { %1739 = vmatpush2.msra.mxu1 %v1018_v17  ;;  %1801 = vmatprep.subr.mxu0 %v1067_v18  ;;  %v708_v17 = vld [vmem:[#allocation14 + $0x220] sm:$0xff]  ;;  %v838_v18 = vld [vmem:[#allocation14 + $0x630] sm:$0xff] }
 0x192   : > { %1740 = vmatprep.subr.mxu1 %v1007_v19  ;;  %1802 = vmatpush1.msra.mxu0 %v1066_v21  ;;  %v697_v19 = vld [vmem:[#allocation14 + $0x1c8] sm:$0xff]  ;;  %v696_v21 = vld [vmem:[#allocation14 + $0x1c0] sm:$0xff] }
 0x193   : > { %1741 = vmatpush2.msra.mxu1 %v1006_v22  ;;  %1803 = vmatprep.subr.mxu0 %v1055_v23  ;;  %v1213_v22 = vld [vmem:[#allocation14 + $0x11e8] sm:$0xff] }
 0x194   : > { %1742 = vmatprep.subr.mxu1 %v995_v24  ;;  %1804 = vmatpush1.msra.mxu0 %v1054_v25  ;;  %v4235_v23 = vld [vmem:[%s4201_s28 + $0x8] sm:$0xff]  ;;  %v1212_v25 = vld [vmem:[#allocation14 + $0x11e0] sm:$0xff] }
 0x195   : > { %1743 = vmatpush2.msra.mxu1 %v994_v26  ;;  %1805 = vmatprep.subr.mxu0 %v1043_v27  ;;  %v685_v24 = vld [vmem:[#allocation14 + $0x168] sm:$0xff]  ;;  %v684_v27 = vld [vmem:[#allocation14 + $0x160] sm:$0xff] }
 0x196   : > { %1744 = vmatprep.subr.mxu1 %v983_v28  ;;  %1806 = vmatpush1.msra.mxu0 %v1042_v29  ;;  %v4239_v26 = vld [vmem:[%s4201_s28] sm:$0xff] }
 0x197   : > { %1745 = vmatpush2.msra.mxu1 %v982_v30  ;;  %1807 = vmatprep.subr.mxu0 %v1031_v31  ;;  %v1201_v28 = vld [vmem:[#allocation14 + $0x1188] sm:$0xff]  ;;  %v1200_v30 = vld [vmem:[#allocation14 + $0x1180] sm:$0xff] }
 0x198   : > { %1746 = vmatprep.subr.mxu1 %v971_v32  ;;  %1808 = vmatpush1.msra.mxu0 %v1030_v33  ;;  %v673_v29 = vld [vmem:[#allocation14 + $0x108] sm:$0xff]  ;;  %v672_v31 = vld [vmem:[#allocation14 + $0x100] sm:$0xff] }
 0x199   : > { %1841 = vmatprep.mubr.f32.mxu0 %v3980_v34  ;;  %1747 = vmatpush2.msra.mxu1 %v970_v35  ;;  %v1189_v32 = vld [vmem:[#allocation14 + $0x1128] sm:$0xff]  ;;  %v1188_v35 = vld [vmem:[#allocation14 + $0x1120] sm:$0xff] }
 0x19a   : > { %1842 = vmatmul.mubr.f32.vlgmr.msra.gmra.mxu0 %v4231_v41  ;;  %1848 = vmatprep.subr.mxu0 %v829_v36  ;;  %v661_v33 = vld [vmem:[#allocation14 + $0xa8] sm:$0xff]  ;;  %v660_v36 = vld [vmem:[#allocation14 + $0xa0] sm:$0xff] }
 0x19b   : > { %1748 = vmatprep.subr.mxu1 %v959_v37  ;;  %1849 = vmatpush1.msra.mxu0 %v828_v38  ;;  %v1177_v37 = vld [vmem:[#allocation14 + $0x10c8] sm:$0xff] }
 0x19c   : > { %1749 = vmatpush2.msra.mxu1 %v958_v39  ;;  %1850 = vmatprep.subr.mxu0 %v817_v40  ;;  %v649_v38 = vld [vmem:[#allocation14 + $0x48] sm:$0xff]  ;;  %v1176_v39 = vld [vmem:[#allocation14 + $0x10c0] sm:$0xff] }
 0x19d   : > { %1750 = vmatprep.subr.mxu1 %v947_v42  ;;  %1851 = vmatpush1.msra.mxu0 %v816_v43  ;;  %v648_v40 = vld [vmem:[#allocation14 + $0x40] sm:$0xff]  ;;  %v1165_v42 = vld [vmem:[#allocation14 + $0x1068] sm:$0xff] }
 0x19e   : > { %1751 = vmatpush2.msra.mxu1 %v946_v44  ;;  %1852 = vmatprep.subr.mxu0 %v805_v45  ;;  %v1021_v43 = vld [vmem:[#allocation14 + $0xbe8] sm:$0xff]  ;;  %v1164_v44 = vld [vmem:[#allocation14 + $0x1060] sm:$0xff] }
 0x19f   : > { %1752 = vmatprep.subr.mxu1 %v935_v46  ;;  %1853 = vmatpush1.msra.mxu0 %v804_v47  ;;  %v1020_v45 = vld [vmem:[#allocation14 + $0xbe0] sm:$0xff]  ;;  %v1153_v46 = vld [vmem:[#allocation14 + $0x1008] sm:$0xff] }
 0x1a0   : > { %1753 = vmatpush2.msra.mxu1 %v934_v48  ;;  %1854 = vmatprep.subr.mxu0 %v793_v49  ;;  %v1009_v47 = vld [vmem:[#allocation14 + $0xb88] sm:$0xff]  ;;  %v1152_v48 = vld [vmem:[#allocation14 + $0x1000] sm:$0xff] }
 0x1a1   : > { %1754 = vmatprep.subr.mxu1 %v923_v50  ;;  %1855 = vmatpush1.msra.mxu0 %v792_v51  ;;  %v1008_v49 = vld [vmem:[#allocation14 + $0xb80] sm:$0xff]  ;;  %v1141_v50 = vld [vmem:[#allocation14 + $0xfa8] sm:$0xff] }
 0x1a2   : > { %1755 = vmatpush2.msra.mxu1 %v922_v52  ;;  %1856 = vmatprep.subr.mxu0 %v781_v53  ;;  %v997_v51 = vld [vmem:[#allocation14 + $0xb28] sm:$0xff]  ;;  %v1140_v52 = vld [vmem:[#allocation14 + $0xfa0] sm:$0xff] }
 0x1a3   : > { %1756 = vmatprep.subr.mxu1 %v911_v54  ;;  %1857 = vmatpush1.msra.mxu0 %v780_v55  ;;  %v996_v53 = vld [vmem:[#allocation14 + $0xb20] sm:$0xff]  ;;  %v1129_v54 = vld [vmem:[#allocation14 + $0xf48] sm:$0xff] }
 0x1a4   : > { %1757 = vmatpush2.msra.mxu1 %v910_v56  ;;  %1858 = vmatprep.subr.mxu0 %v769_v57  ;;  %v985_v55 = vld [vmem:[#allocation14 + $0xac8] sm:$0xff]  ;;  %v1128_v56 = vld [vmem:[#allocation14 + $0xf40] sm:$0xff] }
 0x1a5   : > { %1758 = vmatprep.subr.mxu1 %v899_v58  ;;  %1859 = vmatpush1.msra.mxu0 %v768_v59  ;;  %v984_v57 = vld [vmem:[#allocation14 + $0xac0] sm:$0xff]  ;;  %v1117_v58 = vld [vmem:[#allocation14 + $0xee8] sm:$0xff] }
 0x1a6   : > { %1759 = vmatpush2.msra.mxu1 %v898_v60  ;;  %1860 = vmatprep.subr.mxu0 %v757_v62  ;;  %v973_v59 = vld [vmem:[#allocation14 + $0xa68] sm:$0xff]  ;;  %v1116_v60 = vld [vmem:[#allocation14 + $0xee0] sm:$0xff] }
 0x1a7   : > { %1760 = vmatprep.subr.mxu1 %v887_v63  ;;  %1861 = vmatpush1.msra.mxu0 %v756_v0  ;;  %v972_v62 = vld [vmem:[#allocation14 + $0xa60] sm:$0xff]  ;;  %v1105_v63 = vld [vmem:[#allocation14 + $0xe88] sm:$0xff] }
 0x1a8   : > { %1761 = vmatpush2.msra.mxu1 %v886_v1  ;;  %1862 = vmatprep.subr.mxu0 %v745_v2  ;;  %v961_v0 = vld [vmem:[#allocation14 + $0xa08] sm:$0xff]  ;;  %v1104_v1 = vld [vmem:[#allocation14 + $0xe80] sm:$0xff] }
 0x1a9   : > { %1762 = vmatprep.subr.mxu1 %v875_v3  ;;  %1863 = vmatpush1.msra.mxu0 %v744_v4  ;;  %v960_v2 = vld [vmem:[#allocation14 + $0xa00] sm:$0xff]  ;;  %v1093_v3 = vld [vmem:[#allocation14 + $0xe28] sm:$0xff] }
 0x1aa   : > { %1763 = vmatpush2.msra.mxu1 %v874_v5  ;;  %1864 = vmatprep.subr.mxu0 %v733_v6  ;;  %v949_v4 = vld [vmem:[#allocation14 + $0x9a8] sm:$0xff]  ;;  %v1092_v5 = vld [vmem:[#allocation14 + $0xe20] sm:$0xff] }
 0x1ab   : > { %1764 = vmatprep.subr.mxu1 %v863_v7  ;;  %1865 = vmatpush1.msra.mxu0 %v732_v8  ;;  %v948_v6 = vld [vmem:[#allocation14 + $0x9a0] sm:$0xff]  ;;  %v1081_v7 = vld [vmem:[#allocation14 + $0xdc8] sm:$0xff] }
 0x1ac   : > { %1765 = vmatpush2.msra.mxu1 %v862_v9  ;;  %1866 = vmatprep.subr.mxu0 %v721_v10  ;;  %v937_v8 = vld [vmem:[#allocation14 + $0x948] sm:$0xff]  ;;  %v1080_v9 = vld [vmem:[#allocation14 + $0xdc0] sm:$0xff] }
 0x1ad   : > { %1766 = vmatprep.subr.mxu1 %v851_v11  ;;  %1867 = vmatpush1.msra.mxu0 %v720_v12  ;;  %v936_v10 = vld [vmem:[#allocation14 + $0x940] sm:$0xff]  ;;  %v1069_v11 = vld [vmem:[#allocation14 + $0xd68] sm:$0xff]  ;;  %v1220_v12 = vlaneseq }
 0x1ae   : > { %1767 = vmatpush2.msra.mxu1 %v850_v13  ;;  %1868 = vmatprep.subr.mxu0 %v709_v14  ;;  %v925_v13 = vld [vmem:[#allocation14 + $0x8e8] sm:$0xff]  ;;  %v1068_v14 = vld [vmem:[#allocation14 + $0xd60] sm:$0xff] }
 0x1af   : > { %1768 = vmatprep.subr.mxu1 %v839_v16  ;;  %1869 = vmatpush1.msra.mxu0 %v708_v17  ;;  %v924_v16 = vld [vmem:[#allocation14 + $0x8e0] sm:$0xff]  ;;  %v1057_v17 = vld [vmem:[#allocation14 + $0xd08] sm:$0xff] }
 0x1b0   : > { %1769 = vmatpush2.msra.mxu1 %v838_v18  ;;  %1770 = vmatprep.mubr.f32.mxu1 %v4235_v23  ;;  %v913_v18 = vld [vmem:[#allocation14 + $0x888] sm:$0xff] }
 0x1b1   : > { %1870 = vmatprep.subr.mxu0 %v697_v19  ;;  %1771 = vmatmul.mubr.f32.vlgmr.msra.gmra.mxu1 %v4239_v26  ;;  %v1056_v19 = vld [vmem:[#allocation14 + $0xd00] sm:$0xff] }
 0x1b2   : > { %1871 = vmatpush1.msra.mxu0 %v696_v21  ;;  %1919 = vmatprep.subr.mxu1 %v1213_v22  ;;  %v912_v21 = vld [vmem:[#allocation14 + $0x880] sm:$0xff]  ;;  %v1045_v22 = vld [vmem:[#allocation14 + $0xca8] sm:$0xff] }
 0x1b3   : > { %1872 = vmatprep.subr.mxu0 %v685_v24  ;;  %1920 = vmatpush1.msra.mxu1 %v1212_v25  ;;  %v4243_v24 = vshrl.u32 %v1220_v12, 7  ;;  %v901_v25 = vld [vmem:[#allocation14 + $0x828] sm:$0xff] }
 0x1b4   : > { %1873 = vmatpush1.msra.mxu0 %v684_v27  ;;  %1921 = vmatprep.subr.mxu1 %v1201_v28  ;;  %v1044_v27 = vld [vmem:[#allocation14 + $0xca0] sm:$0xff] }
 0x1b5   : > { %1874 = vmatprep.subr.mxu0 %v673_v29  ;;  %1922 = vmatpush1.msra.mxu1 %v1200_v30  ;;  %v900_v28 = vld [vmem:[#allocation14 + $0x820] sm:$0xff]  ;;  %v1033_v29 = vld [vmem:[#allocation14 + $0xc48] sm:$0xff] }
 0x1b6   : > { %1875 = vmatpush1.msra.mxu0 %v672_v31  ;;  %1923 = vmatprep.subr.mxu1 %v1189_v32  ;;  %v889_v30 = vld [vmem:[#allocation14 + $0x7c8] sm:$0xff]  ;;  %v1032_v31 = vld [vmem:[#allocation14 + $0xc40] sm:$0xff] }
 0x1b7   : > { %1876 = vmatprep.subr.mxu0 %v661_v33  ;;  %1924 = vmatpush1.msra.mxu1 %v1188_v35  ;;  %v888_v32 = vld [vmem:[#allocation14 + $0x7c0] sm:$0xff]  ;;  %v4246_v33 = vsub.s32 0, %v4243_v24  ;;  %v831_v35 = vld [vmem:[#allocation14 + $0x5f8] sm:$0xff] }
 0x1b8   : > { %1877 = vmatpush1.msra.mxu0 %v660_v36  ;;  %1925 = vmatprep.subr.mxu1 %v1177_v37  ;;  %v877_v36 = vld [vmem:[#allocation14 + $0x768] sm:$0xff]  ;;  %v4248_v37 = vld [vmem:[#allocation16] sm:$0xff] }
 0x1b9   : > { %1878 = vmatprep.subr.mxu0 %v649_v38  ;;  %1926 = vmatpush1.msra.mxu1 %v1176_v39  ;;  %v876_v38 = vld [vmem:[#allocation14 + $0x760] sm:$0xff]  ;;  %v830_v39 = vld [vmem:[#allocation14 + $0x5f0] sm:$0xff] }
 0x1ba   : > { %1879 = vmatpush1.msra.mxu0 %v648_v40  ;;  %1927 = vmatprep.subr.mxu1 %v1165_v42  ;;  %v865_v40 = vld [vmem:[#allocation14 + $0x708] sm:$0xff]  ;;  %v819_v42 = vld [vmem:[#allocation14 + $0x598] sm:$0xff] }
 0x1bb   : > { %1880 = vmatprep.subr.mxu0 %v1021_v43  ;;  %1928 = vmatpush1.msra.mxu1 %v1164_v44  ;;  %v864_v43 = vld [vmem:[#allocation14 + $0x700] sm:$0xff]  ;;  %v1223_v44 = vrot.slane %v4248_v37, %v4246_v33 }
 0x1bc   : > { %1881 = vmatpush2.msra.mxu0 %v1020_v45  ;;  %1929 = vmatprep.subr.mxu1 %v1153_v46  ;;  %v818_v45 = vld [vmem:[#allocation14 + $0x590] sm:$0xff]  ;;  %v853_v46 = vld [vmem:[#allocation14 + $0x6a8] sm:$0xff] }
 0x1bd   : > { %1882 = vmatprep.subr.mxu0 %v1009_v47  ;;  %1930 = vmatpush1.msra.mxu1 %v1152_v48  ;;  %v807_v47 = vld [vmem:[#allocation14 + $0x538] sm:$0xff]  ;;  %v852_v48 = vld [vmem:[#allocation14 + $0x6a0] sm:$0xff] }
 0x1be   : > { %1883 = vmatpush2.msra.mxu0 %v1008_v49  ;;  %1931 = vmatprep.subr.mxu1 %v1141_v50  ;;  %v806_v49 = vld [vmem:[#allocation14 + $0x530] sm:$0xff]  ;;  %v841_v50 = vld [vmem:[#allocation14 + $0x648] sm:$0xff] }
 0x1bf   : > { %1884 = vmatprep.subr.mxu0 %v997_v51  ;;  %1932 = vmatpush1.msra.mxu1 %v1140_v52 }
 0x1c0   : > { %1885 = vmatpush2.msra.mxu0 %v996_v53  ;;  %1933 = vmatprep.subr.mxu1 %v1129_v54  ;;  %v795_v53 = vld [vmem:[#allocation14 + $0x4d8] sm:$0xff]  ;;  %v840_v54 = vld [vmem:[#allocation14 + $0x640] sm:$0xff] }
 0x1c1   : > { %1886 = vmatprep.subr.mxu0 %v985_v55  ;;  %1934 = vmatpush1.msra.mxu1 %v1128_v56  ;;  %v794_v56 = vld [vmem:[#allocation14 + $0x4d0] sm:$0xff] }
 0x1c2   : > { %1887 = vmatpush2.msra.mxu0 %v984_v57  ;;  %1935 = vmatprep.subr.mxu1 %v1117_v58  ;;  %v783_v57 = vld [vmem:[#allocation14 + $0x478] sm:$0xff] }
 0x1c3   : > { %1888 = vmatprep.subr.mxu0 %v973_v59  ;;  %1936 = vmatpush1.msra.mxu1 %v1116_v60  ;;  %v782_v59 = vld [vmem:[#allocation14 + $0x470] sm:$0xff]  ;;  %v1215_v60 = vld [vmem:[#allocation14 + $0x11f8] sm:$0xff] }
 0x1c4   : > { %1889 = vmatpush2.msra.mxu0 %v972_v62  ;;  %1937 = vmatprep.subr.mxu1 %v1105_v63  ;;  %v771_v62 = vld [vmem:[#allocation14 + $0x418] sm:$0xff]  ;;  %v1214_v63 = vld [vmem:[#allocation14 + $0x11f0] sm:$0xff] }
 0x1c5   : > { %1890 = vmatprep.subr.mxu0 %v961_v0  ;;  %1938 = vmatpush1.msra.mxu1 %v1104_v1  ;;  %v770_v0 = vld [vmem:[#allocation14 + $0x410] sm:$0xff]  ;;  %v1203_v1 = vld [vmem:[#allocation14 + $0x1198] sm:$0xff] }
 0x1c6   : > { %1891 = vmatpush2.msra.mxu0 %v960_v2  ;;  %1939 = vmatprep.subr.mxu1 %v1093_v3  ;;  %v759_v2 = vld [vmem:[#allocation14 + $0x3b8] sm:$0xff]  ;;  %v1202_v3 = vld [vmem:[#allocation14 + $0x1190] sm:$0xff] }
 0x1c7   : > { %1892 = vmatprep.subr.mxu0 %v949_v4  ;;  %1940 = vmatpush1.msra.mxu1 %v1092_v5  ;;  %v758_v4 = vld [vmem:[#allocation14 + $0x3b0] sm:$0xff]  ;;  %v1191_v5 = vld [vmem:[#allocation14 + $0x1138] sm:$0xff] }
 0x1c8   : > { %1893 = vmatpush2.msra.mxu0 %v948_v6  ;;  %1941 = vmatprep.subr.mxu1 %v1081_v7  ;;  %v747_v6 = vld [vmem:[#allocation14 + $0x358] sm:$0xff]  ;;  %v1190_v7 = vld [vmem:[#allocation14 + $0x1130] sm:$0xff] }
 0x1c9   : > { %1894 = vmatprep.subr.mxu0 %v937_v8  ;;  %1942 = vmatpush1.msra.mxu1 %v1080_v9  ;;  %v746_v8 = vld [vmem:[#allocation14 + $0x350] sm:$0xff]  ;;  %v1179_v9 = vld [vmem:[#allocation14 + $0x10d8] sm:$0xff] }
 0x1ca   : > { %1895 = vmatpush2.msra.mxu0 %v936_v10  ;;  %1943 = vmatprep.subr.mxu1 %v1069_v11  ;;  %v735_v10 = vld [vmem:[#allocation14 + $0x2f8] sm:$0xff]  ;;  %v1178_v11 = vld [vmem:[#allocation14 + $0x10d0] sm:$0xff] }
 0x1cb   : > { %1896 = vmatprep.subr.mxu0 %v925_v13  ;;  %1944 = vmatpush1.msra.mxu1 %v1068_v14  ;;  %v1417_v52 = vpop.f32.mrf.mxu1  ;;  %v734_v13 = vld [vmem:[#allocation14 + $0x2f0] sm:$0xff]  ;;  %v1167_v14 = vld [vmem:[#allocation14 + $0x1078] sm:$0xff] }
 0x1cc   : > { %1897 = vmatpush2.msra.mxu0 %v924_v16  ;;  %1945 = vmatprep.subr.mxu1 %v1057_v17  ;;  %v723_v16 = vld [vmem:[#allocation14 + $0x298] sm:$0xff]  ;;  %v1166_v17 = vld [vmem:[#allocation14 + $0x1070] sm:$0xff] }
 0x1cd   : > { %1898 = vmatprep.subr.mxu0 %v913_v18  ;;  %1946 = vmatpush1.msra.mxu1 %v1056_v19  ;;  %v722_v18 = vld [vmem:[#allocation14 + $0x290] sm:$0xff]  ;;  %v1155_v19 = vld [vmem:[#allocation14 + $0x1018] sm:$0xff] }
 0x1ce   : > { %1899 = vmatpush2.msra.mxu0 %v912_v21  ;;  %1947 = vmatprep.subr.mxu1 %v1045_v22  ;;  %v711_v21 = vld [vmem:[#allocation14 + $0x238] sm:$0xff]  ;;  %v1154_v22 = vld [vmem:[#allocation14 + $0x1010] sm:$0xff] }
 0x1cf   : > { %1900 = vmatprep.subr.mxu0 %v901_v25  ;;  %1948 = vmatpush1.msra.mxu1 %v1044_v27  ;;  %v710_v25 = vld [vmem:[#allocation14 + $0x230] sm:$0xff]  ;;  %v1143_v27 = vld [vmem:[#allocation14 + $0xfb8] sm:$0xff] }
 0x1d0   : > { %1901 = vmatpush2.msra.mxu0 %v900_v28  ;;  %1949 = vmatprep.subr.mxu1 %v1033_v29  ;;  %v699_v28 = vld [vmem:[#allocation14 + $0x1d8] sm:$0xff]  ;;  %v1142_v29 = vld [vmem:[#allocation14 + $0xfb0] sm:$0xff] }
 0x1d1   : > { %1902 = vmatprep.subr.mxu0 %v889_v30  ;;  %1950 = vmatpush1.msra.mxu1 %v1032_v31  ;;  %v698_v30 = vld [vmem:[#allocation14 + $0x1d0] sm:$0xff]  ;;  %v1131_v31 = vld [vmem:[#allocation14 + $0xf58] sm:$0xff] }
 0x1d2   : > { %1903 = vmatpush2.msra.mxu0 %v888_v32  ;;  %1983 = vmatprep.mubr.f32.mxu1 %v3980_v34  ;;  %v687_v32 = vld [vmem:[#allocation14 + $0x178] sm:$0xff] }
 0x1d3   : > { %1990 = vmatprep.subr.mxu1 %v831_v35  ;;  %1904 = vmatprep.subr.mxu0 %v877_v36  ;;  %v1130_v35 = vld [vmem:[#allocation14 + $0xf50] sm:$0xff]  ;;  %v4259_v36 = vsub.s32 1, %v4243_v24 }
 0x1d4   : > { %1984 = vmatmul.mubr.f32.vlgmr.msra.gmra.mxu1 %v4231_v41  ;;  %1905 = vmatpush2.msra.mxu0 %v876_v38  ;;  %v686_v38 = vld [vmem:[#allocation14 + $0x170] sm:$0xff] }
 0x1d5   : > { %1991 = vmatpush1.msra.mxu1 %v830_v39  ;;  %1906 = vmatprep.subr.mxu0 %v865_v40  ;;  %v1119_v39 = vld [vmem:[#allocation14 + $0xef8] sm:$0xff] }
 0x1d6   : > { %1992 = vmatprep.subr.mxu1 %v819_v42  ;;  %1907 = vmatpush2.msra.mxu0 %v864_v43  ;;  %v675_v40 = vld [vmem:[#allocation14 + $0x118] sm:$0xff]  ;;  %v1118_v42 = vld [vmem:[#allocation14 + $0xef0] sm:$0xff] }
 0x1d7   : > { %v1346_v51 = vpop.f32.mrf.mxu0  ;;  %1993 = vmatpush1.msra.mxu1 %v818_v45  ;;  %1908 = vmatprep.subr.mxu0 %v853_v46  ;;  %v674_v43 = vld [vmem:[#allocation14 + $0x110] sm:$0xff]  ;;  %v663_v45 = vld [vmem:[#allocation14 + $0xb8] sm:$0xff] }
 0x1d8   : > { %v1347_v55 = vadd.f32 %v1346_v51, %v1223_v44  ;;  %1994 = vmatprep.subr.mxu1 %v807_v47  ;;  %1909 = vmatpush2.msra.mxu0 %v852_v48  ;;  %v1107_v44 = vld [vmem:[#allocation14 + $0xe98] sm:$0xff]  ;;  %v1106_v46 = vld [vmem:[#allocation14 + $0xe90] sm:$0xff]  ;;  %v1227_v47 = vrot.slane %v4248_v37, %v4259_v36 }
 0x1d9   : > { %1995 = vmatpush1.msra.mxu1 %v806_v49  ;;  %1910 = vmatprep.subr.mxu0 %v841_v50  ;;  %v662_v48 = vld [vmem:[#allocation14 + $0xb0] sm:$0xff]  ;;  %v1095_v49 = vld [vmem:[#allocation14 + $0xe38] sm:$0xff]  ;;  %v1348_v50 = vpop.f32.mrf.mxu0 }
 0x1da   : > { %v4254_v58 = vadd.f32 %v1417_v52, %v1347_v55  ;;  %1996 = vmatprep.subr.mxu1 %v795_v53  ;;  %1911 = vmatpush2.msra.mxu0 %v840_v54  ;;  %v651_v51 = vld [vmem:[#allocation14 + $0x58] sm:$0xff]  ;;  %v1094_v52 = vld [vmem:[#allocation14 + $0xe30] sm:$0xff] }
 0x1db   : > { %1997 = vmatpush1.msra.mxu1 %v794_v56  ;;  %1912 = vmatprep.mubr.f32.mxu0 %v4235_v23  ;;  %v650_v53 = vld [vmem:[#allocation14 + $0x50] sm:$0xff]  ;;  %v1083_v54 = vld [vmem:[#allocation14 + $0xdd8] sm:$0xff] }
 0x1dc   : > { %1998 = vmatprep.subr.mxu1 %v783_v57  ;;  %1913 = vmatmul.mubr.f32.vlgmr.msra.gmra.mxu0 %v4239_v26  ;;  %v1023_v55 = vld [vmem:[#allocation14 + $0xbf8] sm:$0xff]  ;;  %v1082_v56 = vld [vmem:[#allocation14 + $0xdd0] sm:$0xff]  ;;  %v1349_v57 = vadd.f32 %v1348_v50, %v1227_v47 }
 0x1dd   : > { %1999 = vmatpush1.msra.mxu1 %v782_v59  ;;  %2061 = vmatprep.subr.mxu0 %v1215_v60  ;;  %v1022_v59 = vld [vmem:[#allocation14 + $0xbf0] sm:$0xff]  ;;  %v1071_v60 = vld [vmem:[#allocation14 + $0xd78] sm:$0xff] }
 0x1de   : > { %2000 = vmatprep.subr.mxu1 %v771_v62  ;;  %2062 = vmatpush1.msra.mxu0 %v1214_v63  ;;  %v1419_v62 = vpop.f32.mrf.mxu1  ;;  %v1011_v63 = vld [vmem:[#allocation14 + $0xb98] sm:$0xff]  ;;  %v902_v50 = vld [vmem:[#allocation14 + $0x830] sm:$0xff] }
 0x1df   : > { %2001 = vmatpush1.msra.mxu1 %v770_v0  ;;  %2063 = vmatprep.subr.mxu0 %v1203_v1  ;;  %v1070_v0 = vld [vmem:[#allocation14 + $0xd70] sm:$0xff] }
 0x1e0   : > { %2002 = vmatprep.subr.mxu1 %v759_v2  ;;  %2064 = vmatpush1.msra.mxu0 %v1202_v3  ;;  %v1010_v1 = vld [vmem:[#allocation14 + $0xb90] sm:$0xff]  ;;  %v1059_v2 = vld [vmem:[#allocation14 + $0xd18] sm:$0xff] }
 0x1e1   : > { %2003 = vmatpush1.msra.mxu1 %v758_v4  ;;  %2065 = vmatprep.subr.mxu0 %v1191_v5  ;;  %v999_v3 = vld [vmem:[#allocation14 + $0xb38] sm:$0xff]  ;;  %v1058_v4 = vld [vmem:[#allocation14 + $0xd10] sm:$0xff]  ;;  %v1420_v5 = vadd.f32 %v1419_v62, %v1349_v57  ;;  %v2153_v62 = vld [vmem:[#allocation17 + $0x78] sm:$0xff] }
 0x1e2   : > { %2004 = vmatprep.subr.mxu1 %v747_v6  ;;  %2066 = vmatpush1.msra.mxu0 %v1190_v7  ;;  %v998_v6 = vld [vmem:[#allocation14 + $0xb30] sm:$0xff]  ;;  %v1047_v7 = vld [vmem:[#allocation14 + $0xcb8] sm:$0xff] }
 0x1e3   : > { %2005 = vmatpush1.msra.mxu1 %v746_v8  ;;  %2067 = vmatprep.subr.mxu0 %v1179_v9  ;;  %v987_v8 = vld [vmem:[#allocation14 + $0xad8] sm:$0xff]  ;;  %v1046_v9 = vld [vmem:[#allocation14 + $0xcb0] sm:$0xff] }
 0x1e4   : > { %2006 = vmatprep.subr.mxu1 %v735_v10  ;;  %2068 = vmatpush1.msra.mxu0 %v1178_v11  ;;  %v986_v10 = vld [vmem:[#allocation14 + $0xad0] sm:$0xff]  ;;  %v1035_v11 = vld [vmem:[#allocation14 + $0xc58] sm:$0xff] }
 0x1e5   : > { %2007 = vmatpush1.msra.mxu1 %v734_v13  ;;  %2069 = vmatprep.subr.mxu0 %v1167_v14  ;;  %v975_v13 = vld [vmem:[#allocation14 + $0xa78] sm:$0xff]  ;;  %v1034_v14 = vld [vmem:[#allocation14 + $0xc50] sm:$0xff] }
 0x1e6   : > { %2008 = vmatprep.subr.mxu1 %v723_v16  ;;  %2070 = vmatpush1.msra.mxu0 %v1166_v17  ;;  %v2133_v16 = vmul.f32 0.01, %v1420_v5  ;;  %v974_v17 = vld [vmem:[#allocation14 + $0xa70] sm:$0xff]  ;;  %v879_v57 = vld [vmem:[#allocation14 + $0x778] sm:$0xff] }
 0x1e7   : > { %2009 = vmatpush1.msra.mxu1 %v722_v18  ;;  %2071 = vmatprep.subr.mxu0 %v1155_v19  ;;  %v2169_v18 = vld [vmem:[#allocation17 + $0xf8] sm:$0xff]  ;;  %v963_v19 = vld [vmem:[#allocation14 + $0xa18] sm:$0xff] }
 0x1e8   : > { %2010 = vmatprep.subr.mxu1 %v711_v21  ;;  %2072 = vmatpush1.msra.mxu0 %v1154_v22  ;;  %v2168_v21 = vld [vmem:[#allocation17 + $0xf0] sm:$0xff]  ;;  %v962_v22 = vld [vmem:[#allocation14 + $0xa10] sm:$0xff] }
 0x1e9   : > { %2011 = vmatpush1.msra.mxu1 %v710_v25  ;;  %2073 = vmatprep.subr.mxu0 %v1143_v27  ;;  %v2136_v25 = vmax.f32 %v1420_v5, %v2133_v16  ;;  %v2167_v27 = vld [vmem:[#allocation17 + $0xe8] sm:$0xff]  ;;  %v2148_v16 = vld [vmem:[#allocation17 + $0x50] sm:$0xff] }
 0x1ea   : > { %2012 = vmatprep.subr.mxu1 %v699_v28  ;;  %2074 = vmatpush1.msra.mxu0 %v1142_v29  ;;  %v951_v28 = vld [vmem:[#allocation14 + $0x9b8] sm:$0xff]  ;;  %v2166_v29 = vld [vmem:[#allocation17 + $0xe0] sm:$0xff] }
 0x1eb   : > { %2013 = vmatpush1.msra.mxu1 %v698_v30  ;;  %2075 = vmatprep.subr.mxu0 %v1131_v31  ;;  %v950_v30 = vld [vmem:[#allocation14 + $0x9b0] sm:$0xff]  ;;  %v2165_v31 = vld [vmem:[#allocation17 + $0xd8] sm:$0xff] }
 0x1ec   : > { %2014 = vmatprep.subr.mxu1 %v687_v32  ;;  %2076 = vmatpush1.msra.mxu0 %v1130_v35  ;;  %v939_v32 = vld [vmem:[#allocation14 + $0x958] sm:$0xff] }
 0x1ed   : > { %2015 = vmatpush1.msra.mxu1 %v686_v38  ;;  %2077 = vmatprep.subr.mxu0 %v1119_v39  ;;  %v2164_v35 = vld [vmem:[#allocation17 + $0xd0] sm:$0xff]  ;;  %v938_v38 = vld [vmem:[#allocation14 + $0x950] sm:$0xff] }
 0x1ee   : > { %2016 = vmatprep.subr.mxu1 %v675_v40  ;;  %2078 = vmatpush1.msra.mxu0 %v1118_v42  ;;  %v2163_v39 = vld [vmem:[#allocation17 + $0xc8] sm:$0xff] }
 0x1ef   : > { %2017 = vmatpush1.msra.mxu1 %v674_v43  ;;  %2079 = vmatprep.subr.mxu0 %v1107_v44  ;;  %v927_v40 = vld [vmem:[#allocation14 + $0x8f8] sm:$0xff]  ;;  %v926_v42 = vld [vmem:[#allocation14 + $0x8f0] sm:$0xff]  ;;  %v2161_v43 = vld [vmem:[#allocation17 + $0xb8] sm:$0xff] }
 0x1f0   : > { %2018 = vmatprep.subr.mxu1 %v663_v45  ;;  %2080 = vmatpush1.msra.mxu0 %v1106_v46  ;;  %v915_v44 = vld [vmem:[#allocation14 + $0x898] sm:$0xff]  ;;  %v914_v46 = vld [vmem:[#allocation14 + $0x890] sm:$0xff] }
 0x1f1   : > { %2019 = vmatpush1.msra.mxu1 %v662_v48  ;;  %2081 = vmatprep.subr.mxu0 %v1095_v49  ;;  %v2160_v45 = vld [vmem:[#allocation17 + $0xb0] sm:$0xff]  ;;  %v2159_v47 = vld [vmem:[#allocation17 + $0xa8] sm:$0xff]  ;;  %v2158_v49 = vld [vmem:[#allocation17 + $0xa0] sm:$0xff] }
 0x1f2   : > { %2020 = vmatprep.subr.mxu1 %v651_v51  ;;  %2082 = vmatpush1.msra.mxu0 %v1094_v52  ;;  %v903_v48 = vld [vmem:[#allocation14 + $0x838] sm:$0xff]  ;;  %v2157_v51 = vld [vmem:[#allocation17 + $0x98] sm:$0xff] }
 0x1f3   : > { %2021 = vmatpush1.msra.mxu1 %v650_v53  ;;  %2083 = vmatprep.subr.mxu0 %v1083_v54  ;;  %v891_v52 = vld [vmem:[#allocation14 + $0x7d8] sm:$0xff]  ;;  %v4266_v53 = vsub.s32 3, %v4243_v24 }
 0x1f4   : > { %2022 = vmatprep.subr.mxu1 %v1023_v55  ;;  %2084 = vmatpush1.msra.mxu0 %v1082_v56  ;;  %v2156_v54 = vld [vmem:[#allocation17 + $0x90] sm:$0xff]  ;;  %v890_v55 = vld [vmem:[#allocation14 + $0x7d0] sm:$0xff] }
 0x1f5   : > { %2023 = vmatpush2.msra.mxu1 %v1022_v59  ;;  %2085 = vmatprep.subr.mxu0 %v1071_v60  ;;  %v2155_v56 = vld [vmem:[#allocation17 + $0x88] sm:$0xff]  ;;  %v2154_v59 = vld [vmem:[#allocation17 + $0x80] sm:$0xff] }
 0x1f6   : > { %2024 = vmatprep.subr.mxu1 %v1011_v63  ;;  %2086 = vmatpush1.msra.mxu0 %v1070_v0  ;;  %v878_v60 = vld [vmem:[#allocation14 + $0x770] sm:$0xff]  ;;  %v867_v63 = vld [vmem:[#allocation14 + $0x718] sm:$0xff]  ;;  %v1235_v0 = vrot.slane %v4248_v37, %v4266_v53 }
 0x1f7   : > { %2025 = vmatpush2.msra.mxu1 %v1010_v1  ;;  %2087 = vmatprep.subr.mxu0 %v1059_v2  ;;  %v4270_v1 = vpop.f32.mrf.mxu0  ;;  %v2152_v2 = vld [vmem:[#allocation17 + $0x70] sm:$0xff]  ;;  %v2151_v5 = vld [vmem:[#allocation17 + $0x68] sm:$0xff] }
 0x1f8   : > { %2026 = vmatprep.subr.mxu1 %v999_v3  ;;  %2088 = vmatpush1.msra.mxu0 %v1058_v4  ;;  %v866_v3 = vld [vmem:[#allocation14 + $0x710] sm:$0xff] }
 0x1f9   : > { %2027 = vmatpush2.msra.mxu1 %v998_v6  ;;  %2089 = vmatprep.subr.mxu0 %v1047_v7  ;;  %v855_v6 = vld [vmem:[#allocation14 + $0x6b8] sm:$0xff]  ;;  %v2150_v7 = vld [vmem:[#allocation17 + $0x60] sm:$0xff] }
 0x1fa   : > { %2028 = vmatprep.subr.mxu1 %v987_v8  ;;  %2090 = vmatpush1.msra.mxu0 %v1046_v9  ;;  %v854_v8 = vld [vmem:[#allocation14 + $0x6b0] sm:$0xff] }
 0x1fb   : > { %2029 = vmatpush2.msra.mxu1 %v986_v10  ;;  %2091 = vmatprep.subr.mxu0 %v1035_v11  ;;  %v2149_v10 = vld [vmem:[#allocation17 + $0x58] sm:$0xff]  ;;  %v843_v11 = vld [vmem:[#allocation14 + $0x658] sm:$0xff] }
 0x1fc   : > { %2030 = vmatprep.subr.mxu1 %v975_v13  ;;  %2092 = vmatpush1.msra.mxu0 %v1034_v14  ;;  %v1561_v14 = vpop.f32.mrf.mxu0 }
 0x1fd   : > { %2125 = vmatprep.mubr.f32.mxu0 %v3980_v34  ;;  %2031 = vmatpush2.msra.mxu1 %v974_v17  ;;  %v842_v17 = vld [vmem:[#allocation14 + $0x650] sm:$0xff] }
 0x1fe   : > { %2126 = vmatmul.mubr.f32.vlgmr.msra.gmra.mxu0 %v4231_v41  ;;  %2246 = vmatprep.subr.mxu0 %v2169_v18  ;;  %v2162_v41 = vld [vmem:[#allocation17 + $0xc0] sm:$0xff]  ;;  %v2147_v18 = vld [vmem:[#allocation17 + $0x48] sm:$0xff] }
 0x1ff   : > { %2032 = vmatprep.subr.mxu1 %v963_v19  ;;  %2247 = vmatpush1.msra.mxu0 %v2168_v21  ;;  %v2146_v21 = vld [vmem:[#allocation17 + $0x40] sm:$0xff] }
 0x200   : > { %2310 = vmatprep.mubr.f32.mxu0 %v2136_v25  ;;  %2033 = vmatpush2.msra.mxu1 %v962_v22  ;;  %v2233_v22 = vld [vmem:[#allocation17 + $0x2f8] sm:$0xff] }
 0x201   : > { %2248 = vmatprep.subr.mxu0 %v2167_v27  ;;  %2034 = vmatprep.subr.mxu1 %v951_v28  ;;  %v2145_v25 = vld [vmem:[#allocation17 + $0x38] sm:$0xff]  ;;  %v2232_v27 = vld [vmem:[#allocation17 + $0x2f0] sm:$0xff] }
 0x202   : > { %2249 = vmatpush1.msra.mxu0 %v2166_v29  ;;  %2035 = vmatpush2.msra.mxu1 %v950_v30  ;;  %v2144_v28 = vld [vmem:[#allocation17 + $0x30] sm:$0xff]  ;;  %v2231_v29 = vld [vmem:[#allocation17 + $0x2e8] sm:$0xff] }
 0x203   : > { %2250 = vmatprep.subr.mxu0 %v2165_v31  ;;  %2036 = vmatprep.subr.mxu1 %v939_v32  ;;  %v2143_v30 = vld [vmem:[#allocation17 + $0x28] sm:$0xff]  ;;  %v2230_v31 = vld [vmem:[#allocation17 + $0x2e0] sm:$0xff] }
 0x204   : > { %2251 = vmatpush1.msra.mxu0 %v2164_v35  ;;  %2037 = vmatpush2.msra.mxu1 %v938_v38  ;;  %v2142_v32 = vld [vmem:[#allocation17 + $0x20] sm:$0xff]  ;;  %v2229_v35 = vld [vmem:[#allocation17 + $0x2d8] sm:$0xff] }
 0x205   : > { %2252 = vmatprep.subr.mxu0 %v2163_v39  ;;  %2038 = vmatprep.subr.mxu1 %v927_v40  ;;  %v2141_v38 = vld [vmem:[#allocation17 + $0x18] sm:$0xff]  ;;  %v2228_v39 = vld [vmem:[#allocation17 + $0x2d0] sm:$0xff]  ;;  %v2227_v40 = vld [vmem:[#allocation17 + $0x2c8] sm:$0xff] }
 0x206   : > { %2253 = vmatpush1.msra.mxu0 %v2162_v41  ;;  %2039 = vmatpush2.msra.mxu1 %v926_v42  ;;  %v2139_v41 = vld [vmem:[#allocation17 + $0x8] sm:$0xff]  ;;  %v2138_v42 = vld [vmem:[#allocation17] sm:$0xff] }
 0x207   : > { %2254 = vmatprep.subr.mxu0 %v2161_v43  ;;  %2040 = vmatprep.subr.mxu1 %v915_v44  ;;  %v2225_v43 = vld [vmem:[#allocation17 + $0x2b8] sm:$0xff] }
 0x208   : > { %2255 = vmatpush1.msra.mxu0 %v2160_v45  ;;  %2041 = vmatpush2.msra.mxu1 %v914_v46  ;;  %v2201_v44 = vld [vmem:[#allocation17 + $0x1f8] sm:$0xff]  ;;  %v2224_v45 = vld [vmem:[#allocation17 + $0x2b0] sm:$0xff] }
 0x209   : > { %2256 = vmatprep.subr.mxu0 %v2159_v47  ;;  %2042 = vmatprep.subr.mxu1 %v903_v48  ;;  %v2200_v46 = vld [vmem:[#allocation17 + $0x1f0] sm:$0xff]  ;;  %v2223_v47 = vld [vmem:[#allocation17 + $0x2a8] sm:$0xff] }
 0x20a   : > { %2257 = vmatpush1.msra.mxu0 %v2158_v49  ;;  %2043 = vmatpush2.msra.mxu1 %v902_v50  ;;  %v2199_v48 = vld [vmem:[#allocation17 + $0x1e8] sm:$0xff]  ;;  %v2222_v49 = vld [vmem:[#allocation17 + $0x2a0] sm:$0xff] }
 0x20b   : > { %2258 = vmatprep.subr.mxu0 %v2157_v51  ;;  %2044 = vmatprep.subr.mxu1 %v891_v52  ;;  %v2198_v50 = vld [vmem:[#allocation17 + $0x1e0] sm:$0xff]  ;;  %v2221_v51 = vld [vmem:[#allocation17 + $0x298] sm:$0xff] }
 0x20c   : > { %2259 = vmatpush1.msra.mxu0 %v2156_v54  ;;  %2045 = vmatpush2.msra.mxu1 %v890_v55  ;;  %v2197_v52 = vld [vmem:[#allocation17 + $0x1d8] sm:$0xff]  ;;  %v4279_v54 = vsub.s32 2, %v4243_v24  ;;  %v2220_v55 = vld [vmem:[#allocation17 + $0x290] sm:$0xff] }
 0x20d   : > { %2260 = vmatprep.subr.mxu0 %v2155_v56  ;;  %2046 = vmatprep.subr.mxu1 %v879_v57  ;;  %v4272_v4 = vpop.f32.mrf.mxu1  ;;  %v2196_v56 = vld [vmem:[#allocation17 + $0x1d0] sm:$0xff]  ;;  %v2219_v57 = vld [vmem:[#allocation17 + $0x288] sm:$0xff] }
 0x20e   : > { %2261 = vmatpush1.msra.mxu0 %v2154_v59  ;;  %2047 = vmatpush2.msra.mxu1 %v878_v60  ;;  %v2195_v59 = vld [vmem:[#allocation17 + $0x1c8] sm:$0xff]  ;;  %v2218_v60 = vld [vmem:[#allocation17 + $0x280] sm:$0xff] }
 0x20f   : > { %2262 = vmatprep.subr.mxu0 %v2153_v62  ;;  %2048 = vmatprep.subr.mxu1 %v867_v63  ;;  %v1490_v9 = vpop.f32.mrf.mxu1  ;;  %v2194_v62 = vld [vmem:[#allocation17 + $0x1c0] sm:$0xff]  ;;  %v2217_v63 = vld [vmem:[#allocation17 + $0x278] sm:$0xff] }
 0x210   : > { %2263 = vmatpush1.msra.mxu0 %v2152_v2  ;;  %2049 = vmatpush2.msra.mxu1 %v866_v3  ;;  %v1491_v13 = vadd.f32 %v1490_v9, %v1235_v0  ;;  %v2193_v0 = vld [vmem:[#allocation17 + $0x1b8] sm:$0xff]  ;;  %v1231_v2 = vrot.slane %v4248_v37, %v4279_v54  ;;  %v2216_v3 = vld [vmem:[#allocation17 + $0x270] sm:$0xff]  ;;  %v2190_v9 = vld [vmem:[#allocation17 + $0x1a0] sm:$0xff] }
 0x211   : > { %2264 = vmatprep.subr.mxu0 %v2151_v5  ;;  %2050 = vmatprep.subr.mxu1 %v855_v6  ;;  %v2192_v5 = vld [vmem:[#allocation17 + $0x1b0] sm:$0xff]  ;;  %v2215_v6 = vld [vmem:[#allocation17 + $0x268] sm:$0xff] }
 0x212   : > { %2265 = vmatpush1.msra.mxu0 %v2150_v7  ;;  %2051 = vmatpush2.msra.mxu1 %v854_v8  ;;  %v4274_v19 = vadd.f32 %v1561_v14, %v1491_v13  ;;  %v2191_v7 = vld [vmem:[#allocation17 + $0x1a8] sm:$0xff]  ;;  %v2214_v8 = vld [vmem:[#allocation17 + $0x260] sm:$0xff]  ;;  %v1489_v13 = vadd.f32 %v4272_v4, %v1231_v2  ;;  %v2212_v14 = vld [vmem:[#allocation17 + $0x250] sm:$0xff] }
 0x213   : > { %2266 = vmatprep.subr.mxu0 %v2149_v10  ;;  %2052 = vmatprep.subr.mxu1 %v843_v11  ;;  %v2213_v10 = vld [vmem:[#allocation17 + $0x258] sm:$0xff]  ;;  %v2208_v4 = vld [vmem:[#allocation17 + $0x230] sm:$0xff] }
 0x214   : > { %2267 = vmatpush1.msra.mxu0 %v2148_v16  ;;  %2053 = vmatpush2.msra.mxu1 %v842_v17  ;;  %v2189_v11 = vld [vmem:[#allocation17 + $0x198] sm:$0xff]  ;;  %v2188_v16 = vld [vmem:[#allocation17 + $0x190] sm:$0xff]  ;;  %v2211_v17 = vld [vmem:[#allocation17 + $0x248] sm:$0xff] }
 0x215   : > { %2054 = vmatprep.mubr.f32.mxu1 %v4235_v23  ;;  %2268 = vmatprep.subr.mxu0 %v2147_v18  ;;  %v2140_v23 = vld [vmem:[#allocation17 + $0x10] sm:$0xff]  ;;  %v2187_v18 = vld [vmem:[#allocation17 + $0x188] sm:$0xff] }
 0x216   : > { %2055 = vmatmul.mubr.f32.vlgmr.msra.gmra.mxu1 %v4239_v26  ;;  %2269 = vmatpush1.msra.mxu0 %v2146_v21  ;;  %v2226_v26 = vld [vmem:[#allocation17 + $0x2c0] sm:$0xff] }
 0x217   : > { %2317 = vmatprep.subr.mxu1 %v2233_v22  ;;  %2270 = vmatprep.subr.mxu0 %v2145_v25  ;;  %v2210_v21 = vld [vmem:[#allocation17 + $0x240] sm:$0xff]  ;;  %v2209_v25 = vld [vmem:[#allocation17 + $0x238] sm:$0xff] }
 0x218   : > { %2318 = vmatpush1.msra.mxu1 %v2232_v27  ;;  %2271 = vmatpush1.msra.mxu0 %v2144_v28  ;;  %v2186_v22 = vld [vmem:[#allocation17 + $0x180] sm:$0xff]  ;;  %v2185_v27 = vld [vmem:[#allocation17 + $0x178] sm:$0xff]  ;;  %v1560_v28 = vadd.f32 %v4270_v1, %v1489_v13  ;;  %v2204_v1 = vld [vmem:[#allocation17 + $0x210] sm:$0xff] }
 0x219   : > { %2319 = vmatprep.subr.mxu1 %v2231_v29  ;;  %2272 = vmatprep.subr.mxu0 %v2143_v30  ;;  %v2184_v29 = vld [vmem:[#allocation17 + $0x170] sm:$0xff]  ;;  %v2207_v30 = vld [vmem:[#allocation17 + $0x228] sm:$0xff] }
 0x21a   : > { %2320 = vmatpush1.msra.mxu1 %v2230_v31  ;;  %2273 = vmatpush1.msra.mxu0 %v2142_v32  ;;  %v2183_v31 = vld [vmem:[#allocation17 + $0x168] sm:$0xff]  ;;  %v2206_v32 = vld [vmem:[#allocation17 + $0x220] sm:$0xff] }
 0x21b   : > { %2321 = vmatprep.subr.mxu1 %v2229_v35  ;;  %2274 = vmatprep.subr.mxu0 %v2141_v38  ;;  %v2182_v35 = vld [vmem:[#allocation17 + $0x160] sm:$0xff]  ;;  %v2205_v38 = vld [vmem:[#allocation17 + $0x218] sm:$0xff] }
 0x21c   : > { %2322 = vmatpush1.msra.mxu1 %v2228_v39  ;;  %2275 = vmatpush1.msra.mxu0 %v2140_v23  ;;  %v2181_v39 = vld [vmem:[#allocation17 + $0x158] sm:$0xff]  ;;  %v2134_v23 = vmul.f32 0.01, %v1560_v28 }
 0x21d   : > { %2323 = vmatprep.subr.mxu1 %v2227_v40  ;;  %2276 = vmatprep.subr.mxu0 %v2139_v41  ;;  %v2180_v40 = vld [vmem:[#allocation17 + $0x150] sm:$0xff]  ;;  %v1238_v41 = vsub.s32 4, %v4243_v24 }
 0x21e   : > { %2324 = vmatpush1.msra.mxu1 %v2226_v26  ;;  %2277 = vmatpush1.msra.mxu0 %v2138_v42  ;;  %v2203_v26 = vld [vmem:[#allocation17 + $0x208] sm:$0xff] }
 0x21f   : > { %2325 = vmatprep.subr.mxu1 %v2225_v43  ;;  %2278 = vmatprep.subr.mxu0 %v2201_v44  ;;  %v2179_v42 = vld [vmem:[#allocation17 + $0x148] sm:$0xff]  ;;  %v2202_v43 = vld [vmem:[#allocation17 + $0x200] sm:$0xff]  ;;  %v1242_v44 = vsub.s32 5, %v4243_v24 }
 0x220   : > { %2326 = vmatpush1.msra.mxu1 %v2224_v45  ;;  %2279 = vmatpush2.msra.mxu0 %v2200_v46  ;;  %v2178_v45 = vld [vmem:[#allocation17 + $0x140] sm:$0xff]  ;;  %v2137_v46 = vmax.f32 %v1560_v28, %v2134_v23 }
 0x221   : > { %2327 = vmatprep.subr.mxu1 %v2223_v47  ;;  %2280 = vmatprep.subr.mxu0 %v2199_v48  ;;  %v2177_v47 = vld [vmem:[#allocation17 + $0x138] sm:$0xff]  ;;  %v1239_v48 = vrot.slane %v4248_v37, %v1238_v41 }
 0x222   : > { %2328 = vmatpush1.msra.mxu1 %v2222_v49  ;;  %2281 = vmatpush2.msra.mxu0 %v2198_v50  ;;  %v2176_v49 = vld [vmem:[#allocation17 + $0x130] sm:$0xff] }
 0x223   : > { %2329 = vmatprep.subr.mxu1 %v2221_v51  ;;  %2282 = vmatprep.subr.mxu0 %v2197_v52  ;;  %v2175_v51 = vld [vmem:[#allocation17 + $0x128] sm:$0xff]  ;;  %v1243_v52 = vrot.slane %v4248_v37, %v1242_v44 }
 0x224   : > { %2330 = vmatpush1.msra.mxu1 %v2220_v55  ;;  %2283 = vmatpush2.msra.mxu0 %v2196_v56  ;;  %v2174_v55 = vld [vmem:[#allocation17 + $0x120] sm:$0xff] }
 0x225   : > { %2331 = vmatprep.subr.mxu1 %v2219_v57  ;;  %2284 = vmatprep.subr.mxu0 %v2195_v59  ;;  %v2173_v57 = vld [vmem:[#allocation17 + $0x118] sm:$0xff] }
 0x226   : > { %2332 = vmatpush1.msra.mxu1 %v2218_v60  ;;  %2285 = vmatpush2.msra.mxu0 %v2194_v62  ;;  %v2132_v60 = vmul.f32 0.01, %v4254_v58  ;;  %v2172_v62 = vld [vmem:[#allocation17 + $0x110] sm:$0xff] }
 0x227   : > { %2333 = vmatprep.subr.mxu1 %v2217_v63  ;;  %2286 = vmatprep.subr.mxu0 %v2193_v0  ;;  %v2171_v0 = vld [vmem:[#allocation17 + $0x108] sm:$0xff] }
 0x228   : > { %2334 = vmatpush1.msra.mxu1 %v2216_v3  ;;  %2287 = vmatpush2.msra.mxu0 %v2192_v5  ;;  %v2170_v5 = vld [vmem:[#allocation17 + $0x100] sm:$0xff] }
 0x229   : > { %2335 = vmatprep.subr.mxu1 %v2215_v6  ;;  %2288 = vmatprep.subr.mxu0 %v2191_v7  ;;  %v2135_v7 = vmax.f32 %v4254_v58, %v2132_v60 }
 0x22a   : > { %2336 = vmatpush1.msra.mxu1 %v2214_v8  ;;  %2289 = vmatpush2.msra.mxu0 %v2190_v9  ;;  %v1246_v8 = vsub.s32 6, %v4243_v24  ;;  %v1250_v9 = vsub.s32 7, %v4243_v24 }
 0x22b   : > { %2337 = vmatprep.subr.mxu1 %v2213_v10  ;;  %2290 = vmatprep.subr.mxu0 %v2189_v11 }
 0x22c   : > { %2338 = vmatpush1.msra.mxu1 %v2212_v14  ;;  %2291 = vmatpush2.msra.mxu0 %v2188_v16  ;;  %v1247_v10 = vrot.slane %v4248_v37, %v1246_v8  ;;  %v1251_v11 = vrot.slane %v4248_v37, %v1250_v9 }
 0x22d   : > { %2339 = vmatprep.subr.mxu1 %v2211_v17  ;;  %2292 = vmatprep.subr.mxu0 %v2187_v18 }
 0x22e   : > { %2340 = vmatpush1.msra.mxu1 %v2210_v21  ;;  %2293 = vmatpush2.msra.mxu0 %v2186_v22 }
 0x22f   : > { %2341 = vmatprep.subr.mxu1 %v2209_v25  ;;  %2294 = vmatprep.subr.mxu0 %v2185_v27  ;;  %v1217_v25 = vld [vmem:[#allocation16 + $0x8] sm:$0xf] }
 0x230   : > { %2342 = vmatpush1.msra.mxu1 %v2208_v4  ;;  %2295 = vmatpush2.msra.mxu0 %v2184_v29  ;;  %v1701_v50 = vpop.f32.mrf.mxu1  ;;  %v1255_v27 = vrot.slane %v1217_v25, %v4246_v33  ;;  %v1259_v4 = vrot.slane %v1217_v25, %v4259_v36  ;;  %v1267_v23 = vrot.slane %v1217_v25, %v4266_v53 }
 0x231   : > { %2343 = vmatprep.subr.mxu1 %v2207_v30  ;;  %2296 = vmatprep.subr.mxu0 %v2183_v31 }
 0x232   : > { %2344 = vmatpush1.msra.mxu1 %v2206_v32  ;;  %2297 = vmatpush2.msra.mxu0 %v2182_v35  ;;  %v1703_v63 = vpop.f32.mrf.mxu1 }
 0x233   : > { %2345 = vmatprep.subr.mxu1 %v2205_v38  ;;  %2298 = vmatprep.subr.mxu0 %v2181_v39  ;;  %v1263_v39 = vrot.slane %v1217_v25, %v4279_v54 }
 0x234   : > { %2346 = vmatpush1.msra.mxu1 %v2204_v1  ;;  %2299 = vmatpush2.msra.mxu0 %v2180_v40 }
 0x235   : > { %2347 = vmatprep.subr.mxu1 %v2203_v26  ;;  %2300 = vmatprep.subr.mxu0 %v2179_v42 }
 0x236   : > { %2348 = vmatpush1.msra.mxu1 %v2202_v43  ;;  %2381 = vmatprep.mubr.f32.mxu1 %v3980_v34 }
 0x237   : > { %2301 = vmatpush2.msra.mxu0 %v2178_v45  ;;  %2382 = vmatmul.mubr.f32.vlgmr.msra.gmra.mxu1 %v2137_v46 }
 0x238   : > { %2302 = vmatprep.subr.mxu0 %v2177_v47  ;;  %v1630_v56 = vpop.f32.mrf.mxu0 }
 0x239   : > { %2303 = vmatpush2.msra.mxu0 %v2176_v49  ;;  %v1631_v59 = vadd.f32 %v1630_v56, %v1239_v48  ;;  %v2234_v48 = vld [vmem:[#allocation19] sm:$0x3] }
 0x23a   : > { %2304 = vmatprep.subr.mxu0 %v2175_v51  ;;  %v1632_v34 = vpop.f32.mrf.mxu0  ;;  %v2239_v49 = vrot.slane %v2234_v48, %v4246_v33 }
 0x23b   : > { %2305 = vmatpush2.msra.mxu0 %v2174_v55  ;;  %v1702_v2 = vadd.f32 %v1701_v50, %v1631_v59  ;;  %v1633_v3 = vadd.f32 %v1632_v34, %v1243_v52  ;;  %v2243_v50 = vrot.slane %v2234_v48, %v4259_v36 }
 0x23c   : > { %2306 = vmatprep.subr.mxu0 %v2173_v57 }
 0x23d   : > { %2307 = vmatpush2.msra.mxu0 %v2172_v62  ;;  %v1704_v6 = vadd.f32 %v1703_v63, %v1633_v3 }
 0x23e   : > { %2308 = vmatprep.subr.mxu0 %v2171_v0 }
 0x23f   : > { %2309 = vmatpush2.msra.mxu0 %v2170_v5 }
 0x240   : > { %2311 = vmatmul.mubr.f32.vlgmr.msra.gmra.mxu0 %v2135_v7 }
 0x25a   : > { %v1843_v13 = vpop.f32.mrf.mxu0 }
 0x25c   : > { %v1845_v21 = vpop.f32.mrf.mxu0 }
 0x271   : > { %v1772_v14 = vpop.f32.mrf.mxu1 }
 0x272   : > { %v1773_v16 = vadd.f32 %v1772_v14, %v1247_v10 }
 0x273   : > { %v1774_v58 = vpop.f32.mrf.mxu1 }
 0x274   : > { %v1844_v17 = vadd.f32 %v1843_v13, %v1773_v16  ;;  %v1775_v18 = vadd.f32 %v1774_v58, %v1251_v11 }
 0x276   : > { %v1846_v22 = vadd.f32 %v1845_v21, %v1775_v18 }
 0x294   : > { %v1985_v28 = vpop.f32.mrf.mxu1 }
 0x296   : > { %v1987_v32 = vpop.f32.mrf.mxu1 }
 0x29c   : > { %v1914_v29 = vpop.f32.mrf.mxu0 }
 0x29d   : > { %v1915_v30 = vadd.f32 %v1914_v29, %v1255_v27 }
 0x29e   : > { %v1916_v31 = vpop.f32.mrf.mxu0 }
 0x29f   : > { %v1986_v37 = vadd.f32 %v1985_v28, %v1915_v30  ;;  %v1917_v35 = vadd.f32 %v1916_v31, %v1259_v4 }
 0x2a1   : > { %v1988_v38 = vadd.f32 %v1987_v32, %v1917_v35 }
 0x2be   : > { %v2127_v1 = vpop.f32.mrf.mxu0 }
 0x2c0   : > { %v2129_v46 = vpop.f32.mrf.mxu0 }
 0x2d6   : > { %v2056_v40 = vpop.f32.mrf.mxu1 }
 0x2d7   : > { %v2057_v26 = vadd.f32 %v2056_v40, %v1263_v39 }
 0x2d8   : > { %v2058_v42 = vpop.f32.mrf.mxu1 }
 0x2d9   : > { %v2128_v43 = vadd.f32 %v2127_v1, %v2057_v26  ;;  %v2059_v45 = vadd.f32 %v2058_v42, %v1267_v23 }
 0x2db   : > { %v2130_v47 = vadd.f32 %v2129_v46, %v2059_v45 }
 0x2f7   : > { %v2383_v51 = vpop.f32.mrf.mxu1 }
 0x2f9   : > { %v2385_v60 = vpop.f32.mrf.mxu1 }
 0x300   : > { %v2312_v52 = vpop.f32.mrf.mxu0 }
 0x301   : > { %v2313_v55 = vadd.f32 %v2312_v52, %v2239_v49 }
 0x302   : > { %v2314_v56 = vpop.f32.mrf.mxu0 }
 0x303   : > { %v2384_v57 = vadd.f32 %v2383_v51, %v2313_v55  ;;  %v2315_v59 = vadd.f32 %v2314_v56, %v2243_v50  ;;  %2394 = sbr.rel (%p3333_p2) target bundleno = 1675 (0x68b), region = 100 }
 0x305   : > { %2388 = vst [vmem:[%s4199_s29] sm:$0xff] %v2384_v57  ;;  %v2386_v62 = vadd.f32 %v2385_v60, %v2315_v59 }
 0x307   : > { %2389 = vst [vmem:[%s4199_s29 + $0x8] sm:$0xff] %v2386_v62 }
 0x308   : > { %v2395_v34 = vmax.f32 %v2384_v57, %v2386_v62  ;;  %3090 = vst [vmem:[#allocation3 + $0x40] sm:$0xff] %v4274_v19  ;;  %3091 = vst [vmem:[#allocation3 + $0x8] sm:$0xff] %v1702_v2  ;;  %v4320_v63 = vand.u32 127, %v1220_v12  ;;  %v2459_v7 = vld [vmem:[#allocation10 + $0xf0] sm:$0xff]  ;;  %v2458_v10 = vld [vmem:[#allocation10 + $0xe8] sm:$0xff]  ;;  %vm3983_vm6 = vmmov 0  }
 0x309   : > { %3092 = vst [vmem:[#allocation3 + $0x38] sm:$0xff] %v1704_v6  ;;  %3093 = vst [vmem:[#allocation3 + $0x30] sm:$0xff] %v1844_v17  ;;  %v2444_v6 = vld [vmem:[#allocation10 + $0x78] sm:$0xff]  ;;  %v2443_v12 = vld [vmem:[#allocation10 + $0x70] sm:$0xff] }
 0x30a   : > { %3094 = vst [vmem:[#allocation3] sm:$0xff] %v1846_v22  ;;  %3095 = vst [vmem:[#allocation3 + $0x28] sm:$0xff] %v1986_v37  ;;  %2396 = vmax.xlane.f32.xlu0 %v2395_v34  ;;  %v4323_v19 = vadd.s32 128, %v4320_v63  ;;  %v2442_v11 = vld [vmem:[#allocation10 + $0x68] sm:$0xff]  ;;  %v2457_v13 = vld [vmem:[#allocation10 + $0xe0] sm:$0xff] }
 0x30b   : > { %3096 = vst [vmem:[#allocation3 + $0x10] sm:$0xff] %v1988_v38  ;;  %3097 = vst [vmem:[#allocation3 + $0x20] sm:$0xff] %v2128_v43  ;;  %v2441_v14 = vld [vmem:[#allocation10 + $0x60] sm:$0xff]  ;;  %v2456_v16 = vld [vmem:[#allocation10 + $0xd8] sm:$0xff] }
 0x30c   : > { %3098 = vst [vmem:[#allocation3 + $0x18] sm:$0xff] %v2130_v47  ;;  %3099 = vst [vmem:[#allocation4 + $0x8] sm:$0xff] %v4216_v20  ;;  %v2440_v58 = vld [vmem:[#allocation10 + $0x58] sm:$0xff]  ;;  %v2455_v17 = vld [vmem:[#allocation10 + $0xd0] sm:$0xff] }
 0x30d   : > { %3100 = vst [vmem:[#allocation4] sm:$0xff] %v4211_v15  ;;  %3101 = vst [vmem:[#allocation4 + $0x10] sm:$0xff] %v4206_v61  ;;  %v2460_v61 = vld [vmem:[#allocation10 + $0xf8] sm:$0xff]  ;;  %v2439_v18 = vld [vmem:[#allocation10 + $0x50] sm:$0xff] }
 0x30e   : > { %3346 = vmatprep.subr.mxu0 %v2460_v61  ;;  %v2454_v21 = vld [vmem:[#allocation10 + $0xc8] sm:$0xff]  ;;  %v2453_v25 = vld [vmem:[#allocation10 + $0xc0] sm:$0xff]  ;;  %v2452_v28 = vld [vmem:[#allocation10 + $0xb8] sm:$0xff] }
 0x30f   : > { %3347 = vmatpush3.msra.mxu0 %v2444_v6  ;;  %v2438_v22 = vld [vmem:[#allocation10 + $0x48] sm:$0xff]  ;;  %v2437_v27 = vld [vmem:[#allocation10 + $0x40] sm:$0xff]  ;;  %v2436_v4 = vld [vmem:[#allocation10 + $0x38] sm:$0xff] }
 0x310   : > { %3348 = vmatprep.subr.mxu0 %v2459_v7  ;;  %v2451_v29 = vld [vmem:[#allocation10 + $0xb0] sm:$0xff]  ;;  %v2450_v31 = vld [vmem:[#allocation10 + $0xa8] sm:$0xff]  ;;  %v2449_v37 = vld [vmem:[#allocation10 + $0xa0] sm:$0xff] }
 0x311   : > { %3349 = vmatpush3.msra.mxu0 %v2443_v12  ;;  %v2435_v30 = vld [vmem:[#allocation10 + $0x30] sm:$0xff]  ;;  %v2434_v32 = vld [vmem:[#allocation10 + $0x28] sm:$0xff]  ;;  %v2433_v35 = vld [vmem:[#allocation10 + $0x20] sm:$0xff] }
 0x312   : > { %3350 = vmatprep.subr.mxu0 %v2458_v10  ;;  %v2448_v40 = vld [vmem:[#allocation10 + $0x98] sm:$0xff]  ;;  %v2447_v42 = vld [vmem:[#allocation10 + $0x90] sm:$0xff]  ;;  %v2446_v45 = vld [vmem:[#allocation10 + $0x88] sm:$0xff] }
 0x313   : > { %3351 = vmatpush3.msra.mxu0 %v2442_v11  ;;  %v2432_v26 = vld [vmem:[#allocation10 + $0x18] sm:$0xff]  ;;  %v2431_v43 = vld [vmem:[#allocation10 + $0x10] sm:$0xff]  ;;  %v2430_v46 = vld [vmem:[#allocation10 + $0x8] sm:$0xff] }
 0x314   : > { %3352 = vmatprep.subr.mxu0 %v2457_v13  ;;  %v2445_v47 = vld [vmem:[#allocation10 + $0x80] sm:$0xff]  ;;  %v2672_v50 = vld [vmem:[#allocation11 + $0x450] sm:$0xff]  ;;  %v2669_v51 = vld [vmem:[#allocation11 + $0x438] sm:$0xff] }
 0x315   : > { %3353 = vmatpush3.msra.mxu0 %v2441_v14  ;;  %v2429_v48 = vld [vmem:[#allocation10] sm:$0xff]  ;;  %v2661_v52 = vld [vmem:[#allocation11 + $0x3f8] sm:$0xff]  ;;  %v2660_v55 = vld [vmem:[#allocation11 + $0x3f0] sm:$0xff] }
 0x316   : > { %3354 = vmatprep.subr.mxu0 %v2456_v16  ;;  %v2670_v49 = vld [vmem:[#allocation11 + $0x440] sm:$0xff]  ;;  %v2652_v56 = vld [vmem:[#allocation11 + $0x3b0] sm:$0xff]  ;;  %v2643_v59 = vld [vmem:[#allocation11 + $0x368] sm:$0xff] }
 0x317   : > { %3355 = vmatpush3.msra.mxu0 %v2440_v58  ;;  %2727 = vmatprep.subr.mxu1 %v2670_v49  ;;  %v2642_v60 = vld [vmem:[#allocation11 + $0x360] sm:$0xff]  ;;  %v2633_v34 = vld [vmem:[#allocation11 + $0x318] sm:$0xff]  ;;  %v2588_v12 = vld [vmem:[#allocation11 + $0x1b0] sm:$0xff] }
 0x318   : > { %3356 = vmatprep.subr.mxu0 %v2455_v17  ;;  %2728 = vmatpush1.msra.mxu1 %v2669_v51  ;;  %v2598_v61 = vld [vmem:[#allocation11 + $0x200] sm:$0xff]  ;;  %v2597_v6 = vld [vmem:[#allocation11 + $0x1f8] sm:$0xff]  ;;  %v2580_v10 = vld [vmem:[#allocation11 + $0x170] sm:$0xff] }
 0x319   : > { %3357 = vmatpush3.msra.mxu0 %v2439_v18  ;;  %2729 = vmatprep.subr.mxu1 %v2661_v52  ;;  %v2589_v7 = vld [vmem:[#allocation11 + $0x1b8] sm:$0xff]  ;;  %v2579_v11 = vld [vmem:[#allocation11 + $0x168] sm:$0xff]  ;;  %v2562_v49 = vld [vmem:[#allocation11 + $0xe0] sm:$0xff] }
 0x31a   : > { %3358 = vmatprep.subr.mxu0 %v2454_v21  ;;  %2730 = vmatpush1.msra.mxu1 %v2660_v55  ;;  %v2671_v21 = vld [vmem:[#allocation11 + $0x448] sm:$0xff]  ;;  %v2561_v51 = vld [vmem:[#allocation11 + $0xd8] sm:$0xff] }
 0x31b   : > { %3359 = vmatpush3.msra.mxu0 %v2438_v22  ;;  %2731 = vmatprep.subr.mxu1 %v2652_v56  ;;  %v3981_v22 = vmov 1.0   ;;  %v2563_v52 = vld [vmem:[#allocation11 + $0xe8] sm:$0xff]  ;;  %v2553_v55 = vld [vmem:[#allocation11 + $0x98] sm:$0xff] }
 0x31c   : > { %3360 = vmatprep.subr.mxu0 %v2453_v25  ;;  %v2663_v25 = vld [vmem:[#allocation11 + $0x408] sm:$0xff] }
 0x31d   : > { %3361 = vmatpush3.msra.mxu0 %v2437_v27  ;;  %v2662_v27 = vld [vmem:[#allocation11 + $0x400] sm:$0xff]  ;;  %v2555_v56 = vld [vmem:[#allocation11 + $0xa8] sm:$0xff] }
 0x31e   : > { %3362 = vmatprep.subr.mxu0 %v2452_v28  ;;  %v2654_v28 = vld [vmem:[#allocation11 + $0x3c0] sm:$0xff] }
 0x31f   : > { %3363 = vmatpush3.msra.mxu0 %v2436_v4  ;;  %v2653_v4 = vld [vmem:[#allocation11 + $0x3b8] sm:$0xff] }
 0x320   : > { %3364 = vmatprep.subr.mxu0 %v2451_v29  ;;  %v2645_v29 = vld [vmem:[#allocation11 + $0x378] sm:$0xff] }
 0x321   : > { %3365 = vmatpush3.msra.mxu0 %v2435_v30  ;;  %v2644_v30 = vld [vmem:[#allocation11 + $0x370] sm:$0xff] }
 0x322   : > { %3366 = vmatprep.subr.mxu0 %v2450_v31  ;;  %v2636_v31 = vld [vmem:[#allocation11 + $0x330] sm:$0xff] }
 0x323   : > { %3367 = vmatpush3.msra.mxu0 %v2434_v32  ;;  %v2626_v32 = vld [vmem:[#allocation11 + $0x2e0] sm:$0xff] }
 0x324   : > { %3368 = vmatprep.subr.mxu0 %v2449_v37  ;;  %v2618_v37 = vld [vmem:[#allocation11 + $0x2a0] sm:$0xff] }
 0x325   : > { %3369 = vmatpush3.msra.mxu0 %v2433_v35  ;;  %v2617_v35 = vld [vmem:[#allocation11 + $0x298] sm:$0xff] }
 0x326   : > { %3370 = vmatprep.subr.mxu0 %v2448_v40  ;;  %v2591_v40 = vld [vmem:[#allocation11 + $0x1c8] sm:$0xff] }
 0x327   : > { %3371 = vmatpush3.msra.mxu0 %v2432_v26  ;;  %v2590_v26 = vld [vmem:[#allocation11 + $0x1c0] sm:$0xff] }
 0x328   : > { %3372 = vmatprep.subr.mxu0 %v2447_v42  ;;  %v2582_v42 = vld [vmem:[#allocation11 + $0x180] sm:$0xff] }
 0x329   : > { %3373 = vmatpush3.msra.mxu0 %v2431_v43  ;;  %v2581_v43 = vld [vmem:[#allocation11 + $0x178] sm:$0xff] }
 0x32a   : > { %3374 = vmatprep.subr.mxu0 %v2446_v45  ;;  %v2571_v45 = vld [vmem:[#allocation11 + $0x128] sm:$0xff] }
 0x32b   : > { %3375 = vmatpush3.msra.mxu0 %v2430_v46  ;;  %v2573_v46 = vld [vmem:[#allocation11 + $0x138] sm:$0xff] }
 0x32c   : > { %3376 = vmatprep.subr.mxu0 %v2445_v47  ;;  %v2570_v47 = vld [vmem:[#allocation11 + $0x120] sm:$0xff] }
 0x32d   : > { %3377 = vmatpush3.msra.mxu0 %v2429_v48  ;;  %v2572_v48 = vld [vmem:[#allocation11 + $0x130] sm:$0xff] }
 0x32e   : > { %2798 = vmatprep.subr.mxu0 %v2672_v50  ;;  %v2564_v50 = vld [vmem:[#allocation11 + $0xf0] sm:$0xff] }
 0x393   : > { %v2397_v0 = vpop.xlane.xlu0 %2396 }
 0x394   : > { %vm2401_vm0 = vcmp.eq.f32.partialorder %v2384_v57, %v2397_v0  ;;  %vm2402_vm1 = vcmp.eq.f32.partialorder %v2386_v62, %v2397_v0  ;;  %v2651_v57 = vld [vmem:[#allocation11 + $0x3a8] sm:$0xff]  ;;  %v2634_v62 = vld [vmem:[#allocation11 + $0x320] sm:$0xff]  ;;  %v2625_v0 = vld [vmem:[#allocation11 + $0x2d8] sm:$0xff] }
 0x395   : > { %v2403_v2 = vsel %vm2401_vm0, %v4320_v63, 256  ;;  %v2404_v3 = vsel %vm2402_vm1, %v4323_v19, 256  ;;  %2732 = vmatpush1.msra.mxu1 %v2651_v57  ;;  %v2552_v57 = vld [vmem:[#allocation11 + $0x90] sm:$0xff] }
 0x396   : > { %vm2405_vm2 = vcmp.lt.s32.totalorder %v2403_v2, %v2404_v3  ;;  %2733 = vmatprep.subr.mxu1 %v2643_v59  ;;  %v2554_v59 = vld [vmem:[#allocation11 + $0xa0] sm:$0xff] }
 0x397   : > { %v2406_v20 = vsel %vm2405_vm2, %v2403_v2, %v2404_v3  ;;  %2734 = vmatpush1.msra.mxu1 %v2642_v60  ;;  %v2624_v2 = vld [vmem:[#allocation11 + $0x2d0] sm:$0xff] }
 0x398   : > { %v2408_v5 = vshra.s32 %v2406_v20, 16  ;;  %v2407_v38 = vand.u32 65535, %v2406_v20  ;;  %2735 = vmatprep.subr.mxu1 %v2634_v62  ;;  %v2616_v3 = vld [vmem:[#allocation11 + $0x290] sm:$0xff]  ;;  %v2615_v20 = vld [vmem:[#allocation11 + $0x288] sm:$0xff]  ;;  %v2546_v62 = vld [vmem:[#allocation11 + $0x60] sm:$0xff] }
 0x399   : > { %2736 = vmatpush1.msra.mxu1 %v2633_v34  ;;  %v2544_v60 = vld [vmem:[#allocation11 + $0x50] sm:$0xff]  ;;  %v2543_v34 = vld [vmem:[#allocation11 + $0x48] sm:$0xff] }
 0x39a   : > { %v2410_v15 = vcvt.s32.f32 %v2408_v5  ;;  %v2409_v23 = vcvt.s32.f32 %v2407_v38  ;;  %2737 = vmatprep.subr.mxu1 %v2625_v0  ;;  %v2607_v5 = vld [vmem:[#allocation11 + $0x248] sm:$0xff]  ;;  %v2609_v38 = vld [vmem:[#allocation11 + $0x258] sm:$0xff] }
 0x39b   : > { %2738 = vmatpush1.msra.mxu1 %v2624_v2  ;;  %v2545_v0 = vld [vmem:[#allocation11 + $0x58] sm:$0xff]  ;;  %v2535_v2 = vld [vmem:[#allocation11 + $0x8] sm:$0xff] }
 0x39c   : > { %2411 = vmin.xlane.f32.xlu0 %v2410_v15  ;;  %2739 = vmatprep.subr.mxu1 %v2616_v3  ;;  %v2537_v3 = vld [vmem:[#allocation11 + $0x18] sm:$0xff] }
 0x39d   : > { %2740 = vmatpush1.msra.mxu1 %v2615_v20  ;;  %v2534_v20 = vld [vmem:[#allocation11] sm:$0xff] }
 0x39e   : > { %2741 = vmatprep.subr.mxu1 %v2607_v5  ;;  %v2536_v5 = vld [vmem:[#allocation11 + $0x10] sm:$0xff] }
 0x425   : > { %v4327_v39 = vpop.xlane.xlu0 %2411 }
 0x426   : > { %vm2413_vm3 = vcmp.eq.f32.partialorder %v2410_v15, %v4327_v39  ;;  %v2606_v15 = vld [vmem:[#allocation11 + $0x240] sm:$0xff]  ;;  %v2418_v13 = vcvt.f32.s32 %v4327_v39  ;;  %v2608_v39 = vld [vmem:[#allocation11 + $0x250] sm:$0xff] }
 0x427   : > { %v2414_v1 = vsel %vm2413_vm3, %v2409_v23, inf  ;;  %2742 = vmatpush1.msra.mxu1 %v2606_v15  ;;  %v2600_v23 = vld [vmem:[#allocation11 + $0x210] sm:$0xff]  ;;  %v2674_v15 = vld [vmem:[#allocation11 + $0x460] sm:$0xff] }
 0x428   : > { %2415 = vmin.xlane.f32.xlu1 %v2414_v1  ;;  %2743 = vmatprep.subr.mxu1 %v2598_v61  ;;  %v2419_v16 = vshll.u32 %v2418_v13, 16  ;;  %v2599_v1 = vld [vmem:[#allocation11 + $0x208] sm:$0xff]  ;;  %v2676_v61 = vld [vmem:[#allocation11 + $0x470] sm:$0xff] }
 0x429   : > { %2744 = vmatpush1.msra.mxu1 %v2597_v6  ;;  %v3982_v6 = vmov 0.0  }
 0x42a   : > { %2745 = vmatprep.subr.mxu1 %v2589_v7  ;;  %2791 = vmatprep.mubr.f32.mxu1 %v3982_v6 }
 0x42b   : > { %2746 = vmatpush1.msra.mxu1 %v2588_v12  ;;  %v2428_v12 = vld [vmem:[#allocation5] sm:$0xff] }
 0x42c   : > { %2747 = vmatprep.subr.mxu1 %v2580_v10 }
 0x42d   : > { %2748 = vmatpush1.msra.mxu1 %v2579_v11 }
 0x42e   : > { %2749 = vmatprep.subr.mxu1 %v2571_v45  ;;  %v2621_v45 = vld [vmem:[#allocation11 + $0x2b8] sm:$0xff] }
 0x42f   : > { %2750 = vmatpush1.msra.mxu1 %v2570_v47  ;;  %v2613_v47 = vld [vmem:[#allocation11 + $0x278] sm:$0xff] }
 0x430   : > { %2751 = vmatprep.subr.mxu1 %v2562_v49  ;;  %v2612_v49 = vld [vmem:[#allocation11 + $0x270] sm:$0xff] }
 0x431   : > { %2752 = vmatpush1.msra.mxu1 %v2561_v51  ;;  %v2604_v51 = vld [vmem:[#allocation11 + $0x230] sm:$0xff] }
 0x432   : > { %2753 = vmatprep.subr.mxu1 %v2553_v55  ;;  %v2603_v55 = vld [vmem:[#allocation11 + $0x228] sm:$0xff] }
 0x433   : > { %2754 = vmatpush1.msra.mxu1 %v2552_v57  ;;  %v2595_v57 = vld [vmem:[#allocation11 + $0x1e8] sm:$0xff] }
 0x434   : > { %2755 = vmatprep.subr.mxu1 %v2544_v60  ;;  %v2594_v60 = vld [vmem:[#allocation11 + $0x1e0] sm:$0xff] }
 0x435   : > { %2756 = vmatpush1.msra.mxu1 %v2543_v34  ;;  %v2586_v34 = vld [vmem:[#allocation11 + $0x1a0] sm:$0xff] }
 0x436   : > { %2757 = vmatprep.subr.mxu1 %v2535_v2  ;;  %v2585_v2 = vld [vmem:[#allocation11 + $0x198] sm:$0xff] }
 0x437   : > { %2758 = vmatpush1.msra.mxu1 %v2534_v20  ;;  %v2577_v20 = vld [vmem:[#allocation11 + $0x158] sm:$0xff] }
 0x438   : > { %2869 = vmatprep.subr.mxu1 %v2674_v15  ;;  %v2576_v15 = vld [vmem:[#allocation11 + $0x150] sm:$0xff] }
 0x4b1   : > { %v2416_v14 = vpop.xlane.xlu1 %2415 }
 0x4b2   : > { %v2417_v58 = vcvt.f32.s32 %v2416_v14 }
 0x4b4   : > { %v2420_v17 = vadd.s32 %v2419_v16, %v2417_v58  ;;  %v2673_v58 = vld [vmem:[#allocation11 + $0x458] sm:$0xff] }
 0x4b6   : > { %v2421_v18 = vadd.s32 1, %v2420_v17  ;;  %v2675_v17 = vld [vmem:[#allocation11 + $0x468] sm:$0xff] }
 0x4b8   : > { %vm2423_vm4 = vcmp.eq.s32.totalorder %v4323_v19, %v2421_v18  ;;  %vm2422_vm5 = vcmp.eq.s32.totalorder %v4320_v63, %v2421_v18  ;;  %v2635_v19 = vld [vmem:[#allocation11 + $0x328] sm:$0xff]  ;;  %v2665_v18 = vld [vmem:[#allocation11 + $0x418] sm:$0xff] }
 0x4b9   : > { %3336 = vmatprep.mubr.msk.f32.mxu0 %vm2423_vm4, %v3981_v22  ;;  %v2627_v63 = vld [vmem:[#allocation11 + $0x2e8] sm:$0xff] }
 0x4ba   : > { %3337 = vmatmul.mubr.msk.f32.vlgmr.msra.gmra.mxu0 %vm2422_vm5, %v3981_v22  ;;  %v2664_v22 = vld [vmem:[#allocation11 + $0x410] sm:$0xff] }
 0x4bb   : > { %2799 = vmatpush1.msra.mxu0 %v2671_v21  ;;  %2862 = vmatprep.mubr.f32.mxu0 %v3982_v6  ;;  %v2667_v21 = vld [vmem:[#allocation11 + $0x428] sm:$0xff] }
 0x4bc   : > { %2800 = vmatprep.subr.mxu0 %v2663_v25  ;;  %v2666_v25 = vld [vmem:[#allocation11 + $0x420] sm:$0xff] }
 0x4bd   : > { %2801 = vmatpush1.msra.mxu0 %v2662_v27  ;;  %v2656_v27 = vld [vmem:[#allocation11 + $0x3d0] sm:$0xff] }
 0x4be   : > { %2802 = vmatprep.subr.mxu0 %v2654_v28  ;;  %v2658_v28 = vld [vmem:[#allocation11 + $0x3e0] sm:$0xff] }
 0x4bf   : > { %2803 = vmatpush1.msra.mxu0 %v2653_v4  ;;  %v2655_v4 = vld [vmem:[#allocation11 + $0x3c8] sm:$0xff] }
 0x4c0   : > { %2804 = vmatprep.subr.mxu0 %v2645_v29  ;;  %v2657_v29 = vld [vmem:[#allocation11 + $0x3d8] sm:$0xff] }
 0x4c1   : > { %2805 = vmatpush1.msra.mxu0 %v2644_v30  ;;  %v2647_v30 = vld [vmem:[#allocation11 + $0x388] sm:$0xff] }
 0x4c2   : > { %2806 = vmatprep.subr.mxu0 %v2636_v31  ;;  %v2649_v31 = vld [vmem:[#allocation11 + $0x398] sm:$0xff] }
 0x4c3   : > { %2807 = vmatpush1.msra.mxu0 %v2635_v19  ;;  %v2646_v19 = vld [vmem:[#allocation11 + $0x380] sm:$0xff] }
 0x4c4   : > { %2808 = vmatprep.subr.mxu0 %v2627_v63  ;;  %v2648_v63 = vld [vmem:[#allocation11 + $0x390] sm:$0xff] }
 0x4c5   : > { %2809 = vmatpush1.msra.mxu0 %v2626_v32  ;;  %v2638_v32 = vld [vmem:[#allocation11 + $0x340] sm:$0xff] }
 0x4c6   : > { %2810 = vmatprep.subr.mxu0 %v2618_v37  ;;  %v2640_v37 = vld [vmem:[#allocation11 + $0x350] sm:$0xff] }
 0x4c7   : > { %2811 = vmatpush1.msra.mxu0 %v2617_v35  ;;  %v2637_v35 = vld [vmem:[#allocation11 + $0x338] sm:$0xff] }
 0x4c8   : > { %2812 = vmatprep.subr.mxu0 %v2609_v38  ;;  %v2639_v38 = vld [vmem:[#allocation11 + $0x348] sm:$0xff] }
 0x4c9   : > { %2813 = vmatpush1.msra.mxu0 %v2608_v39  ;;  %v2629_v39 = vld [vmem:[#allocation11 + $0x2f8] sm:$0xff] }
 0x4ca   : > { %2814 = vmatprep.subr.mxu0 %v2600_v23  ;;  %v2631_v23 = vld [vmem:[#allocation11 + $0x308] sm:$0xff] }
 0x4cb   : > { %2815 = vmatpush1.msra.mxu0 %v2599_v1  ;;  %v2628_v1 = vld [vmem:[#allocation11 + $0x2f0] sm:$0xff] }
 0x4cc   : > { %2816 = vmatprep.subr.mxu0 %v2591_v40  ;;  %v2630_v40 = vld [vmem:[#allocation11 + $0x300] sm:$0xff] }
 0x4cd   : > { %2817 = vmatpush1.msra.mxu0 %v2590_v26  ;;  %v2620_v26 = vld [vmem:[#allocation11 + $0x2b0] sm:$0xff] }
 0x4ce   : > { %2818 = vmatprep.subr.mxu0 %v2582_v42  ;;  %v2622_v42 = vld [vmem:[#allocation11 + $0x2c0] sm:$0xff] }
 0x4cf   : > { %2819 = vmatpush1.msra.mxu0 %v2581_v43  ;;  %v2619_v43 = vld [vmem:[#allocation11 + $0x2a8] sm:$0xff] }
 0x4d0   : > { %2820 = vmatprep.subr.mxu0 %v2573_v46  ;;  %v2611_v46 = vld [vmem:[#allocation11 + $0x268] sm:$0xff] }
 0x4d1   : > { %2821 = vmatpush1.msra.mxu0 %v2572_v48  ;;  %v2610_v48 = vld [vmem:[#allocation11 + $0x260] sm:$0xff] }
 0x4d2   : > { %2822 = vmatprep.subr.mxu0 %v2564_v50  ;;  %v2602_v50 = vld [vmem:[#allocation11 + $0x220] sm:$0xff] }
 0x4d3   : > { %2823 = vmatpush1.msra.mxu0 %v2563_v52  ;;  %v2601_v52 = vld [vmem:[#allocation11 + $0x218] sm:$0xff] }
 0x4d4   : > { %2824 = vmatprep.subr.mxu0 %v2555_v56  ;;  %v2593_v56 = vld [vmem:[#allocation11 + $0x1d8] sm:$0xff] }
 0x4d5   : > { %2825 = vmatpush1.msra.mxu0 %v2554_v59  ;;  %v2592_v59 = vld [vmem:[#allocation11 + $0x1d0] sm:$0xff] }
 0x4d6   : > { %2826 = vmatprep.subr.mxu0 %v2546_v62  ;;  %v2584_v62 = vld [vmem:[#allocation11 + $0x190] sm:$0xff] }
 0x4d7   : > { %2827 = vmatpush1.msra.mxu0 %v2545_v0  ;;  %v2583_v0 = vld [vmem:[#allocation11 + $0x188] sm:$0xff] }
 0x4d8   : > { %2828 = vmatprep.subr.mxu0 %v2537_v3  ;;  %v2575_v3 = vld [vmem:[#allocation11 + $0x148] sm:$0xff] }
 0x4d9   : > { %2829 = vmatpush1.msra.mxu0 %v2536_v5  ;;  %v2574_v5 = vld [vmem:[#allocation11 + $0x140] sm:$0xff] }
 0x4da   : > { %2940 = vmatprep.subr.mxu0 %v2676_v61  ;;  %v2566_v61 = vld [vmem:[#allocation11 + $0x100] sm:$0xff] }
 0x57a   : > { %v3378_v7 = vpop.f32.mrf.mxu0 }
 0x57c   : > { %v3379_v10 = vpop.f32.mrf.mxu0 }
 0x57d   : > { %v3380_v11 = vadd.f32 %v3379_v10, %v3378_v7  ;;  %v2568_v7 = vld [vmem:[#allocation11 + $0x110] sm:$0xff]  ;;  %v2567_v10 = vld [vmem:[#allocation11 + $0x108] sm:$0xff] }
 0x57f   : > { %v2531_v13 = vadd.f32 %v3380_v11, %v2428_v12  ;;  %v2565_v12 = vld [vmem:[#allocation11 + $0xf8] sm:$0xff] }
 0x580   : > { %v2557_v11 = vld [vmem:[#allocation11 + $0xb8] sm:$0xff] }
 0x581   : > { %v2532_v14 = vmul.f32 0.01, %v2531_v13 }
 0x583   : > { %v4335_v16 = vmax.f32 %v2531_v13, %v2532_v14  ;;  %v2559_v13 = vld [vmem:[#allocation11 + $0xc8] sm:$0xff]  ;;  %v2556_v14 = vld [vmem:[#allocation11 + $0xb0] sm:$0xff] }
 0x585   : > { %2792 = vmatmul.mubr.f32.vlgmr.msra.gmra.mxu1 %v4335_v16  ;;  %2863 = vmatmul.mubr.f32.vlgmr.msra.gmra.mxu0 %v4335_v16 }
 0x586   : > { %2870 = vmatpush1.msra.mxu1 %v2673_v58  ;;  %2941 = vmatpush1.msra.mxu0 %v2675_v17  ;;  %v2558_v58 = vld [vmem:[#allocation11 + $0xc0] sm:$0xff]  ;;  %v2548_v17 = vld [vmem:[#allocation11 + $0x70] sm:$0xff] }
 0x587   : > { %2871 = vmatprep.subr.mxu1 %v2665_v18  ;;  %2942 = vmatprep.subr.mxu0 %v2667_v21  ;;  %v2550_v18 = vld [vmem:[#allocation11 + $0x80] sm:$0xff]  ;;  %v2547_v21 = vld [vmem:[#allocation11 + $0x68] sm:$0xff] }
 0x588   : > { %2872 = vmatpush1.msra.mxu1 %v2664_v22  ;;  %2943 = vmatpush1.msra.mxu0 %v2666_v25  ;;  %v2549_v22 = vld [vmem:[#allocation11 + $0x78] sm:$0xff]  ;;  %v2539_v25 = vld [vmem:[#allocation11 + $0x28] sm:$0xff] }
 0x589   : > { %2873 = vmatprep.subr.mxu1 %v2656_v27  ;;  %2944 = vmatprep.subr.mxu0 %v2658_v28  ;;  %v2541_v27 = vld [vmem:[#allocation11 + $0x38] sm:$0xff]  ;;  %v2538_v28 = vld [vmem:[#allocation11 + $0x20] sm:$0xff] }
 0x58a   : > { %2874 = vmatpush1.msra.mxu1 %v2655_v4  ;;  %2945 = vmatpush1.msra.mxu0 %v2657_v29  ;;  %v2540_v4 = vld [vmem:[#allocation11 + $0x30] sm:$0xff]  ;;  %v2677_v29 = vld [vmem:[#allocation11 + $0x478] sm:$0xff] }
 0x58b   : > { %2875 = vmatprep.subr.mxu1 %v2647_v30  ;;  %2946 = vmatprep.subr.mxu0 %v2649_v31  ;;  %v2668_v30 = vld [vmem:[#allocation11 + $0x430] sm:$0xff]  ;;  %v2659_v31 = vld [vmem:[#allocation11 + $0x3e8] sm:$0xff] }
 0x58c   : > { %2876 = vmatpush1.msra.mxu1 %v2646_v19  ;;  %2947 = vmatpush1.msra.mxu0 %v2648_v63  ;;  %v2650_v19 = vld [vmem:[#allocation11 + $0x3a0] sm:$0xff]  ;;  %v2641_v63 = vld [vmem:[#allocation11 + $0x358] sm:$0xff] }
 0x58d   : > { %2877 = vmatprep.subr.mxu1 %v2638_v32  ;;  %2948 = vmatprep.subr.mxu0 %v2640_v37  ;;  %v2632_v32 = vld [vmem:[#allocation11 + $0x310] sm:$0xff]  ;;  %v2623_v37 = vld [vmem:[#allocation11 + $0x2c8] sm:$0xff] }
 0x58e   : > { %2878 = vmatpush1.msra.mxu1 %v2637_v35  ;;  %2949 = vmatpush1.msra.mxu0 %v2639_v38  ;;  %v2614_v35 = vld [vmem:[#allocation11 + $0x280] sm:$0xff]  ;;  %v2605_v38 = vld [vmem:[#allocation11 + $0x238] sm:$0xff] }
 0x58f   : > { %2879 = vmatprep.subr.mxu1 %v2629_v39  ;;  %2950 = vmatprep.subr.mxu0 %v2631_v23  ;;  %v2596_v39 = vld [vmem:[#allocation11 + $0x1f0] sm:$0xff]  ;;  %v2587_v23 = vld [vmem:[#allocation11 + $0x1a8] sm:$0xff] }
 0x590   : > { %2880 = vmatpush1.msra.mxu1 %v2628_v1  ;;  %2951 = vmatpush1.msra.mxu0 %v2630_v40  ;;  %v2578_v1 = vld [vmem:[#allocation11 + $0x160] sm:$0xff]  ;;  %v2569_v40 = vld [vmem:[#allocation11 + $0x118] sm:$0xff] }
 0x591   : > { %2881 = vmatprep.subr.mxu1 %v2620_v26  ;;  %2952 = vmatprep.subr.mxu0 %v2622_v42  ;;  %v2560_v26 = vld [vmem:[#allocation11 + $0xd0] sm:$0xff]  ;;  %v2551_v42 = vld [vmem:[#allocation11 + $0x88] sm:$0xff] }
 0x592   : > { %2882 = vmatpush1.msra.mxu1 %v2619_v43  ;;  %2953 = vmatpush1.msra.mxu0 %v2621_v45  ;;  %v2542_v43 = vld [vmem:[#allocation11 + $0x40] sm:$0xff] }
 0x593   : > { %2883 = vmatprep.subr.mxu1 %v2611_v46  ;;  %2954 = vmatprep.subr.mxu0 %v2613_v47  ;;  %v2678_v45 = vld [vmem:[#allocation13] sm:$0xff] }
 0x594   : > { %2884 = vmatpush1.msra.mxu1 %v2610_v48  ;;  %2955 = vmatpush1.msra.mxu0 %v2612_v49  ;;  %v2685_v46 = vrot.slane %v2678_v45, %v4246_v33  ;;  %v2693_v47 = vrot.slane %v2678_v45, %v4279_v54  ;;  %v2689_v48 = vrot.slane %v2678_v45, %v4259_v36 }
 0x595   : > { %2885 = vmatprep.subr.mxu1 %v2602_v50  ;;  %2956 = vmatprep.subr.mxu0 %v2604_v51  ;;  %v2697_v49 = vrot.slane %v2678_v45, %v4266_v53  ;;  %v2701_v33 = vrot.slane %v2678_v45, %v1238_v41  ;;  %v2709_v36 = vrot.slane %v2678_v45, %v1246_v8  ;;  %v3338_v41 = vld [vmem:[#allocation13 + $0x8] ss:$0 sm:$0xff] }
 0x596   : > { %2886 = vmatpush1.msra.mxu1 %v2601_v52  ;;  %2957 = vmatpush1.msra.mxu0 %v2603_v55  ;;  %v2705_v53 = vrot.slane %v2678_v45, %v1242_v44  ;;  %v2713_v54 = vrot.slane %v2678_v45, %v1250_v9 }
 0x597   : > { %2887 = vmatprep.subr.mxu1 %v2593_v56  ;;  %2958 = vmatprep.subr.mxu0 %v2595_v57 }
 0x598   : > { %2888 = vmatpush1.msra.mxu1 %v2592_v59  ;;  %2959 = vmatpush1.msra.mxu0 %v2594_v60 }
 0x599   : > { %2889 = vmatprep.subr.mxu1 %v2584_v62  ;;  %2960 = vmatprep.subr.mxu0 %v2586_v34 }
 0x59a   : > { %2890 = vmatpush1.msra.mxu1 %v2583_v0  ;;  %2961 = vmatpush1.msra.mxu0 %v2585_v2 }
 0x59b   : > { %2891 = vmatprep.subr.mxu1 %v2575_v3  ;;  %2962 = vmatprep.subr.mxu0 %v2577_v20 }
 0x59c   : > { %2892 = vmatpush1.msra.mxu1 %v2574_v5  ;;  %2963 = vmatpush1.msra.mxu0 %v2576_v15 }
 0x59d   : > { %2893 = vmatprep.subr.mxu1 %v2566_v61  ;;  %2964 = vmatprep.subr.mxu0 %v2568_v7 }
 0x59e   : > { %2894 = vmatpush1.msra.mxu1 %v2565_v12  ;;  %2965 = vmatpush1.msra.mxu0 %v2567_v10 }
 0x59f   : > { %2895 = vmatprep.subr.mxu1 %v2557_v11  ;;  %2966 = vmatprep.subr.mxu0 %v2559_v13 }
 0x5a0   : > { %2896 = vmatpush1.msra.mxu1 %v2556_v14  ;;  %2967 = vmatpush1.msra.mxu0 %v2558_v58 }
 0x5a1   : > { %2897 = vmatprep.subr.mxu1 %v2548_v17  ;;  %2968 = vmatprep.subr.mxu0 %v2550_v18 }
 0x5a2   : > { %2898 = vmatpush1.msra.mxu1 %v2547_v21  ;;  %2969 = vmatpush1.msra.mxu0 %v2549_v22 }
 0x5a3   : > { %2899 = vmatprep.subr.mxu1 %v2539_v25  ;;  %2970 = vmatprep.subr.mxu0 %v2541_v27 }
 0x5a4   : > { %2900 = vmatpush1.msra.mxu1 %v2538_v28  ;;  %2933 = vmatprep.mubr.f32.mxu1 %v3982_v6 }
 0x5a5   : > { %2971 = vmatpush1.msra.mxu0 %v2540_v4  ;;  %3004 = vmatprep.mubr.f32.mxu0 %v3982_v6 }
 0x5a6   : > { %2934 = vmatmul.mubr.f32.vlgmr.msra.gmra.mxu1 %v4335_v16  ;;  %3005 = vmatmul.mubr.f32.vlgmr.msra.gmra.mxu0 %v4335_v16 }
 0x5a7   : > { %3398 = vmatprep.subr.mxu1 %v3982_v6  ;;  %3430 = vmatprep.mubr.msk.f32.mxu1 %vm3983_vm6, %v3982_v6 }
 0x5a8   : > { %3399 = vmatpush3.msra.mxu1 %v2677_v29 }
 0x5a9   : > { %3400 = vmatprep.subr.mxu1 %v3982_v6 }
 0x5aa   : > { %3401 = vmatpush3.msra.mxu1 %v2668_v30 }
 0x5ab   : > { %3402 = vmatprep.subr.mxu1 %v3982_v6 }
 0x5ac   : > { %3403 = vmatpush3.msra.mxu1 %v2659_v31 }
 0x5ad   : > { %3404 = vmatprep.subr.mxu1 %v3982_v6 }
 0x5ae   : > { %3405 = vmatpush3.msra.mxu1 %v2650_v19 }
 0x5af   : > { %3406 = vmatprep.subr.mxu1 %v3982_v6 }
 0x5b0   : > { %3407 = vmatpush3.msra.mxu1 %v2641_v63 }
 0x5b1   : > { %3408 = vmatprep.subr.mxu1 %v3982_v6 }
 0x5b2   : > { %3409 = vmatpush3.msra.mxu1 %v2632_v32 }
 0x5b3   : > { %3410 = vmatprep.subr.mxu1 %v3982_v6 }
 0x5b4   : > { %3411 = vmatpush3.msra.mxu1 %v2623_v37 }
 0x5b5   : > { %3412 = vmatprep.subr.mxu1 %v3982_v6 }
 0x5b6   : > { %3413 = vmatpush3.msra.mxu1 %v2614_v35 }
 0x5b7   : > { %3414 = vmatprep.subr.mxu1 %v3982_v6 }
 0x5b8   : > { %3415 = vmatpush3.msra.mxu1 %v2605_v38 }
 0x5b9   : > { %3416 = vmatprep.subr.mxu1 %v3982_v6 }
 0x5ba   : > { %3417 = vmatpush3.msra.mxu1 %v2596_v39 }
 0x5bb   : > { %3418 = vmatprep.subr.mxu1 %v3982_v6 }
 0x5bc   : > { %3419 = vmatpush3.msra.mxu1 %v2587_v23 }
 0x5bd   : > { %3420 = vmatprep.subr.mxu1 %v3982_v6 }
 0x5be   : > { %3421 = vmatpush3.msra.mxu1 %v2578_v1 }
 0x5bf   : > { %3422 = vmatprep.subr.mxu1 %v3982_v6 }
 0x5c0   : > { %3423 = vmatpush3.msra.mxu1 %v2569_v40 }
 0x5c1   : > { %3424 = vmatprep.subr.mxu1 %v3982_v6 }
 0x5c2   : > { %3425 = vmatpush3.msra.mxu1 %v2560_v26 }
 0x5c3   : > { %3426 = vmatprep.subr.mxu1 %v3982_v6 }
 0x5c4   : > { %3427 = vmatpush3.msra.mxu1 %v2551_v42 }
 0x5c5   : > { %3428 = vmatprep.subr.mxu1 %v3982_v6 }
 0x5c6   : > { %3429 = vmatpush3.msra.mxu1 %v2542_v43 }
 0x5c7   : > { %3431 = vmatmul.mubr.f32.vlgmr.msra.gmra.mxu1 %v4335_v16 }
 0x645   : > { %v2793_v50 = vpop.f32.mrf.mxu1  ;;  %v2864_v51 = vpop.f32.mrf.mxu0 }
 0x646   : > { %v2794_v52 = vadd.f32 %v2793_v50, %v2685_v46  ;;  %v2865_v55 = vadd.f32 %v2864_v51, %v2693_v47 }
 0x647   : > { %v2795_v56 = vpop.f32.mrf.mxu1  ;;  %v2866_v57 = vpop.f32.mrf.mxu0 }
 0x648   : > { %3081 = vst [vmem:[#allocation2 + $0x30] sm:$0xff] %v2794_v52  ;;  %3083 = vst [vmem:[#allocation2 + $0x18] sm:$0xff] %v2865_v55  ;;  %v2796_v6 = vadd.f32 %v2795_v56, %v2689_v48  ;;  %v2867_v59 = vadd.f32 %v2866_v57, %v2697_v49 }
 0x64a   : > { %3082 = vst [vmem:[#allocation2] sm:$0xff] %v2796_v6  ;;  %3084 = vst [vmem:[#allocation2 + $0x10] sm:$0xff] %v2867_v59 }
 0x666   : > { %v2935_v16 = vpop.f32.mrf.mxu1  ;;  %v3006_v60 = vpop.f32.mrf.mxu0 }
 0x667   : > { %v2936_v62 = vadd.f32 %v2935_v16, %v2701_v33  ;;  %v3007_v34 = vadd.f32 %v3006_v60, %v2709_v36 }
 0x668   : > { %v2937_v0 = vpop.f32.mrf.mxu1  ;;  %v3008_v2 = vpop.f32.mrf.mxu0 }
 0x669   : > { %3085 = vst [vmem:[#allocation2 + $0x20] sm:$0xff] %v2936_v62  ;;  %3087 = vst [vmem:[#allocation2 + $0x40] sm:$0xff] %v3007_v34  ;;  %v2938_v3 = vadd.f32 %v2937_v0, %v2705_v53  ;;  %v3009_v20 = vadd.f32 %v3008_v2, %v2713_v54 }
 0x66b   : > { %3086 = vst [vmem:[#allocation2 + $0x28] sm:$0xff] %v2938_v3  ;;  %3088 = vst [vmem:[#allocation2 + $0x38] sm:$0xff] %v3009_v20 }
 0x687   : > { %v3077_v8 = vpop.f32.mrf.mxu1 }
 0x688   : > { %v3078_v5 = vadd.f32 %v3338_v41, %v3077_v8 }
 0x689   : > { %v3432_v15 = vpop.f32.mrf.mxu1 }
 0x68a   : > { %3089 = vst [vmem:[#allocation2 + $0x8] sm:$0xff] %v3078_v5 }
 0x68b PF: > { %s3345_s1 = sshll.u32 %s4062_s17, 8  ;;  %s3122_s15 = sshll.u32 %s4199_s29, 4  ;;  %s3123_s15 = int_to_ptr.vmem [resolvable:$true] %s3122_s15 }
 0x68c   : > { %s3120_s21 = scalar_lea.hbm %s4435_s9, %s3345_s1  ;;  %s3103_s26 = scalar_lea.sflag [#allocation7], %s4195_s25 }
 0x68d   : > { %s3850_s22 = scalar_lea.vmem %s3123_s15, 256  ;;  %p4464_p9 = scmp.ne.s32.totalorder %s4445_s23, 0 }
 0x68e   : > { %p3851_p3 = scmp.ne.s32.totalorder %s3123_s15, %s3850_s22  ;;  %s3984_s11 = smov [#allocation20]  }
 0x68f   : > { %s3854_s30 = sshll.u32 %s3984_s11, 4  ;;  %s3855_s30 = int_to_ptr.vmem [resolvable:$false] %s3854_s30 }
 0x690   : > { %p3852_p10 = pnand %p3851_p3, %p4464_p9  ;;  %s3856_s18 = scalar_lea.vmem %s3855_s30, 512 }
 0x691   : > { %p3857_p4 = scmp.lt.s32.totalorder %s3123_s15, %s3855_s30  ;;  %p3858_p7 = scmp.lt.s32.totalorder %s3856_s18, %s3850_s22 }
 0x692   : > { %p3853_p0 = pneg %p3852_p10 }
 0x693   : > { %p3859_p5 = por %p3858_p7, %p3857_p4 }
 0x695   : > { %p3860_p13 = pnand %p3859_p5, %p3853_p0 }
 0x697   : > { %3863 = shalt.err (!%p3860_p13)
}
 0x698   : > { %s3864_s20 = scalar_lea.hbm %s3120_s21, 256  ;;  %s3868_s12 = scalar_lea.hbm %s4435_s9, 1280 }
 0x699   : > { %p3865_p6 = scmp.ne.s32.totalorder %s3120_s21, %s3864_s20  ;;  %p3869_p12 = scmp.lt.s32.totalorder %s3120_s21, %s4435_s9 }
 0x69a   : > { %p3870_p1 = scmp.lt.s32.totalorder %s3868_s12, %s3864_s20 }
 0x69b   : > { %p3866_p11 = pnand %p3865_p6, %p4464_p9 }
 0x69c   : > { %p3871_p2 = por %p3870_p1, %p3869_p12 }
 0x69d   : > { %p3867_p8 = pneg %p3866_p11 }
 0x69f   : > { %p3872_p3 = pnand %p3871_p2, %p3867_p8 }
 0x6a1   : > { %3875 = shalt.err (!%p3872_p3)
}
 0x6a2   : > { %3471 = dma.vmem_to_hbm [thread:$0]  (%p4464_p9), %s3123_s15, 256, %s3120_s21, %s3103_s26  }
 0x6a3   : > { %s3434_s22 = smul.u32 384, %s4062_s17  ;;  %s3136_s11 = sshll.u32 %s4201_s28, 4  ;;  %s3137_s11 = int_to_ptr.vmem [resolvable:$true] %s3136_s11 }
 0x6a4   : > { %s3108_s0 = scalar_lea.sflag [#allocation22], %s4195_s25  ;;  %s3876_s1 = scalar_lea.vmem %s3137_s11, 384 }
 0x6a5   : > { %s3134_s29 = scalar_lea.hbm %s4436_s10, %s3434_s22  ;;  %p3877_p10 = scmp.ne.s32.totalorder %s3137_s11, %s3876_s1 }
 0x6a6   : > { %s3985_s20 = smov [#allocation21]  }
 0x6a7   : > { %p3878_p0 = pnand %p3877_p10, %p4464_p9  ;;  %s3880_s12 = sshll.u32 %s3985_s20, 4  ;;  %s3881_s12 = int_to_ptr.vmem [resolvable:$false] %s3880_s12 }
 0x6a8   : > { %s3882_s27 = scalar_lea.vmem %s3881_s12, 768  ;;  %p3883_p7 = scmp.lt.s32.totalorder %s3137_s11, %s3881_s12 }
 0x6a9   : > { %p3879_p4 = pneg %p3878_p0  ;;  %p3884_p5 = scmp.lt.s32.totalorder %s3882_s27, %s3876_s1 }
 0x6ab   : > { %p3885_p13 = por %p3884_p5, %p3883_p7 }
 0x6ad   : > { %p3886_p6 = pnand %p3885_p13, %p3879_p4 }
 0x6af   : > { %3889 = shalt.err (!%p3886_p6)
}
 0x6b0   : > { %s3890_s17 = scalar_lea.hbm %s3134_s29, 384  ;;  %s3894_s21 = scalar_lea.hbm %s4436_s10, 1920 }
 0x6b1   : > { %p3891_p11 = scmp.ne.s32.totalorder %s3134_s29, %s3890_s17  ;;  %p3895_p1 = scmp.lt.s32.totalorder %s3134_s29, %s4436_s10 }
 0x6b2   : > { %p3896_p2 = scmp.lt.s32.totalorder %s3894_s21, %s3890_s17 }
 0x6b3   : > { %p3892_p8 = pnand %p3891_p11, %p4464_p9 }
 0x6b4   : > { %p3897_p3 = por %p3896_p2, %p3895_p1 }
 0x6b5   : > { %p3893_p12 = pneg %p3892_p8 }
 0x6b7   : > { %p3898_p10 = pnand %p3897_p3, %p3893_p12 }
 0x6b9   : > { %3901 = shalt.err (!%p3898_p10)
}
 0x6ba   : > { %3472 = dma.vmem_to_hbm [thread:$0]  (%p4464_p9), %s3137_s11, 384, %s3134_s29, %s3108_s0  }
 0x6bb PF: > { %p3528_p0 = scmp.ge.s32.totalorder %s3960_s16, 2  ;;  %s3148_s22 = sand.u32 1, %s3948_s13  }
 0x6bc   : > { %p4465_p4 = scmp.ne.s32.totalorder %s4446_s24, 0  ;;  %s3149_s30 = scalar_lea.sflag [#allocation7], %s3148_s22 }
 0x6be   : > { %p3504_p7 = pnand %p3528_p0, %p4465_p4 }
 0x6c0   : > { %p3505_p5 = pneg %p3504_p7 }
 0x6c2   : > { %3939 = dma.done.wait (%p3505_p5), %s3149_s30, 256  }
 0x6c3   : > { %3941 = vsyncadd (%p3505_p5), %s3149_s30, 4294967040  ;;  %s3158_s18 = scalar_lea.sflag [#allocation22], %s3148_s22 }
 0x6c4   : > { %3943 = dma.done.wait (%p3505_p5), %s3158_s18, 384  }
 0x6c5   : > { %3945 = vsyncadd (%p3505_p5), %s3158_s18, 4294966912  ;;  %s4466_s1 = sld [smem:[#allocation30_spill]]  ;;  %p29_p9 = scmp.ge.s32.totalorder %s4066_s19, 7  }
 0x6c6   : > { %s4467_s15 = sld [smem:[#allocation31_spill]]  ;;  %s4468_s13 = smov %s3952_s14 }
 0x6c7   : > { %s4470_s16 = smov %s4066_s19  ;;  %31 = sbr.rel (!%p29_p9) target bundleno = 13 (0xd), region = 150 }
 0x6cb   : > { %s4469_s14 = smov %s4466_s1 }
 0x6cc   :  { %3163 = vsyncpa [#allocation6], 1 }
 0x6cd   :  { %3165 = vsyncpa [#allocation6 + $0x1], 1 }
 0x6ce   :  { %3166 = vsyncpa [#allocation9], 1 }
 0x6cf   :  { %3167 = vsyncpa [#allocation12], 1 }
 0x6d0   :  { %3168 = vsyncpa [#allocation15], 1 }
 0x6d1   :  { %3169 = vsyncpa [#allocation18], 1 }
 0x6d2   :  { %3170 = vsyncpa [#allocation7], 1 }
 0x6d3   :  { %3172 = vsyncpa [#allocation7 + $0x1], 1 }
 0x6d4   :  { %3173 = vsyncpa [#allocation22], 1 }
 0x6d5   :  { %3175 = vsyncpa [#allocation22 + $0x1], 1 }

</bundles_post_ra>
